<compile_context>
chip_gen: v6e
topology: v6e:2x2x1
jax: 0.10.0
libtpu: 0.0.40
codegen_flags: <defaults>
</compile_context>

<pallas_src>
import functools
from itertools import product

import jax
import jax.numpy as jnp
from jax import lax
from jax.experimental import pallas as pl
from jax.experimental.pallas import tpu as pltpu

BN_EPS = 1e-5

# 19 taps = union of the three separable kernels' supports:
# (kd, kh, kw) in {0,1,2}^3 with at least one index at the center (==1).
UNION_TAPS = tuple((kd, kh, kw) for kd, kh, kw in product(range(3), repeat=3)
                   if kd == 1 or kh == 1 or kw == 1)
NTAPS = len(UNION_TAPS)  # 19


def _vmem_capacity_bytes():
    try:
        info = pltpu.get_tpu_info()
        cap = getattr(info, "vmem_capacity_bytes", None)
        if cap:
            return int(cap)
    except Exception:
        pass
    return 64 * 1024 * 1024        # conservative (v7x) fallback


def _pick_d_tile(D, HW, Cin, Cout_pad, L, vmem_limit):
    """Largest depth tile that keeps blocks lane-dense and inside VMEM."""
    budget = max(vmem_limit - (4 << 20), 8 << 20)
    candidates = [dt for dt in range(1, D + 1)
                  if D % dt == 0 and ((dt * HW) % 128 == 0 or dt == D)]
    best = None
    for dt in candidates:
        lanes = dt * HW
        vmem = (2 * (dt + 2) * Cin * L * 2        # bf16 input window, double-buffered
                + 2 * Cout_pad * lanes * 2        # bf16 conv block, double-buffered
                + 2 * Cout_pad * lanes * 4        # pass-2 f32 output block
                + NTAPS * Cin * lanes * 4         # f32 staging scratch
                + 2 * Cout_pad * lanes * 4)       # f32 accumulator value + slack
        acc_bytes = Cout_pad * lanes * 4
        if vmem <= budget and acc_bytes <= (128 << 10):
            if best is None or dt > best:
                best = dt
    if best is None:
        best = candidates[0] if candidates else D
    return best


def _conv_stats_kernel(xw_ref, wu_ref, bias_ref, masks_ref,
                       conv_ref, stat_ref, stage_ref,
                       *, d_tile, cin, H, W):
    """Pass 1: fused 3-branch conv via one stacked-K GEMM + bias + BN partial stats."""
    HW = H * W
    mask_l = masks_ref[0:1, :]                     # (1, HW) f32: delta_w = -1 valid cols
    mask_r = masks_ref[1:2, :]                     # (1, HW) f32: delta_w = +1 valid cols

    # Load + upcast each halo'd depth plane once (d_tile+2 small planes).
    win = [xw_ref[0, 0, j].astype(jnp.float32) for j in range(d_tile + 2)]  # (Cin, L)

    # Build the stacked-K RHS: every (tap, out-depth) pair is a static lane slice
    # of one plane; wrap-around columns from the +/-1 W shift are zeroed.
    # All rows/cols of the scratch are rewritten every step (no stale data).
    for t, (kd, kh, kw) in enumerate(UNION_TAPS):
        off = kh * W + kw                          # flat lane offset of this tap
        for od in range(d_tile):
            piece = win[od + kd][:, off:off + HW]  # (Cin, HW)
            if kw == 0:
                piece = piece * mask_l
            elif kw == 2:
                piece = piece * mask_r
            stage_ref[t * cin:(t + 1) * cin, od * HW:(od + 1) * HW] = piece

    # Single MXU matmul: (Cout_pad, NTAPS*Cin) x (NTAPS*Cin, d_tile*HW).
    conv = jnp.dot(wu_ref[...], stage_ref[...],
                   preferred_element_type=jnp.float32) + bias_ref[...]

    conv_ref[0, 0] = conv.astype(conv_ref.dtype)   # bf16 intermediate (lane-dense store)
    stat_ref[0, 0, :, 0:1] = jnp.sum(conv, axis=1, keepdims=True)
    stat_ref[0, 0, :, 1:2] = jnp.sum(conv * conv, axis=1, keepdims=True)


def _bn_relu_kernel(conv_ref, scale_ref, shift_ref, o_ref, *, cout):
    """Pass 2: folded BN (one FMA per element) + ReLU, channel-major output."""
    y = conv_ref[0, 0].astype(jnp.float32) * scale_ref[...] + shift_ref[...]
    o_ref[0] = jnp.maximum(y[:cout, :], 0.0)


@jax.jit
def e2e3d_forward(x, params):
    """x: (N, C_in, D, H, W) float32 -> (N, C_out, D, H, W) float32."""
    w_d, b_d, w_h, b_h, w_w, b_w, gamma, beta = params
    N, Cin, D, H, W = x.shape
    pd, ph, pw = w_d.shape[0], w_h.shape[0], w_w.shape[0]
    Cout = pd + ph + pw
    Cout_pad = ((Cout + 7) // 8) * 8
    HW = H * W
    Hp = H + 2
    L = Hp * W + 2                 # H-padded plane, flattened, + one guard lane each side
    K = NTAPS * Cin

    vmem_cap = _vmem_capacity_bytes()
    vmem_limit = max(min(vmem_cap * 3 // 4, 100 * 1024 * 1024), 32 * 1024 * 1024)
    d_tile = _pick_d_tile(D, HW, Cin, Cout_pad, L, vmem_limit)
    nblk = D // d_tile
    lanes = d_tile * HW

    # ---- light host-side prep: one padded, windowed bf16 copy of the input -----
    xp = jnp.pad(x, ((0, 0), (0, 0), (1, 1), (1, 1), (0, 0)))            # pad D, H
    planes = xp.transpose(0, 2, 1, 3, 4).reshape(N, D + 2, Cin, Hp * W)
    planes = jnp.pad(planes, ((0, 0), (0, 0), (0, 0), (1, 1)))           # lane guards
    planes = planes.astype(jnp.bfloat16)                                 # (N, D+2, Cin, L)
    # Overlapping depth windows -> ONE input slab / DMA per grid step.
    xwin = jnp.stack([planes[:, i * d_tile:i * d_tile + d_tile + 2]
                      for i in range(nblk)], axis=1)                     # (N,nblk,dt+2,Cin,L)

    # Dense union-tap weights (Cout_pad, NTAPS*Cin); a tap shared by several
    # branches fills their disjoint output-channel row ranges.
    wu = jnp.zeros((Cout_pad, K), jnp.float32)
    for t, (kd, kh, kw) in enumerate(UNION_TAPS):
        cols = slice(t * Cin, (t + 1) * Cin)
        if kd == 1:                                  # conv_d (1,3,3)
            wu = wu.at[0:pd, cols].set(w_d[:, :, 0, kh, kw])
        if kh == 1:                                  # conv_h (3,1,3)
            wu = wu.at[pd:pd + ph, cols].set(w_h[:, :, kd, 0, kw])
        if kw == 1:                                  # conv_w (3,3,1)
            wu = wu.at[pd + ph:Cout, cols].set(w_w[:, :, kd, kh, 0])
    bias = jnp.zeros((Cout_pad, 1), jnp.float32).at[:Cout, 0].set(
        jnp.concatenate([b_d, b_h, b_w]))

    # W-wrap masks as a tiny resident input (no per-step iota work).
    col = jnp.arange(HW, dtype=jnp.int32) % W
    masks = jnp.stack([(col > 0), (col < W - 1)]).astype(jnp.float32)    # (2, HW)

    grid = (N, nblk)
    par = ("parallel", "parallel")   # all (n, depth-tile) blocks independent (v7x megacore)
    cparams = pltpu.CompilerParams(dimension_semantics=par,
                                   vmem_limit_bytes=int(vmem_limit))

    conv_flops = 2 * N * nblk * Cout_pad * K * lanes
    conv_bytes = (2 * N * nblk * (d_tile + 2) * Cin * L      # bf16 window reads
                  + 2 * N * D * Cout_pad * HW                # bf16 conv writes
                  + 4 * N * nblk * Cout_pad * 2              # stats writes
                  + 4 * Cout_pad * (K + 1) + 4 * 2 * HW)     # resident weights/masks

    conv_out, stats = pl.pallas_call(
        functools.partial(_conv_stats_kernel, d_tile=d_tile, cin=Cin, H=H, W=W),
        out_shape=(jax.ShapeDtypeStruct((N, nblk, Cout_pad, lanes), jnp.bfloat16),
                   jax.ShapeDtypeStruct((N, nblk, Cout_pad, 2), jnp.float32)),
        grid_spec=pltpu.PrefetchScalarGridSpec(
            num_scalar_prefetch=0,
            grid=grid,
            in_specs=[
                pl.BlockSpec((1, 1, d_tile + 2, Cin, L), lambda n, d: (n, d, 0, 0, 0)),
                pl.BlockSpec((Cout_pad, K), lambda n, d: (0, 0)),
                pl.BlockSpec((Cout_pad, 1), lambda n, d: (0, 0)),
                pl.BlockSpec((2, HW), lambda n, d: (0, 0)),
            ],
            out_specs=(pl.BlockSpec((1, 1, Cout_pad, lanes), lambda n, d: (n, d, 0, 0)),
                       pl.BlockSpec((1, 1, Cout_pad, 2), lambda n, d: (n, d, 0, 0))),
            scratch_shapes=[pltpu.VMEM((K, lanes), jnp.float32)],
        ),
        compiler_params=cparams,
        cost_estimate=pl.CostEstimate(flops=conv_flops, transcendentals=0,
                                      bytes_accessed=conv_bytes),
    )(xwin, wu, bias, masks)

    # ---- fold batch stats into per-channel scale/shift (tiny, O(Cout)) ---------
    cnt = jnp.float32(N * D * HW)
    s = jnp.sum(stats[:, :, :Cout, 0], axis=(0, 1))
    sq = jnp.sum(stats[:, :, :Cout, 1], axis=(0, 1))
    mean = s / cnt
    var = jnp.maximum(sq / cnt - mean * mean, 0.0)     # clamp E[x^2]-mean^2 >= 0
    scale = gamma * lax.rsqrt(var + BN_EPS)
    shift = beta - mean * scale
    scale_p = jnp.zeros((Cout_pad, 1), jnp.float32).at[:Cout, 0].set(scale)
    shift_p = jnp.zeros((Cout_pad, 1), jnp.float32).at[:Cout, 0].set(shift)

    # Pass 2 writes the channel-major output directly -> no trailing transpose.
    out = pl.pallas_call(
        functools.partial(_bn_relu_kernel, cout=Cout),
        out_shape=jax.ShapeDtypeStruct((N, Cout, D * HW), jnp.float32),
        grid_spec=pltpu.PrefetchScalarGridSpec(
            num_scalar_prefetch=0,
            grid=grid,
            in_specs=[pl.BlockSpec((1, 1, Cout_pad, lanes), lambda n, d: (n, d, 0, 0)),
                      pl.BlockSpec((Cout_pad, 1), lambda n, d: (0, 0)),
                      pl.BlockSpec((Cout_pad, 1), lambda n, d: (0, 0))],
            out_specs=pl.BlockSpec((1, Cout, lanes), lambda n, d: (n, 0, d)),
        ),
        compiler_params=cparams,
        cost_estimate=pl.CostEstimate(
            flops=2 * N * D * Cout_pad * HW, transcendentals=0,
            bytes_accessed=2 * N * D * Cout_pad * HW + 4 * N * Cout * D * HW),
    )(conv_out, scale_p, shift_p)

    return out.reshape(N, Cout, D, H, W)


def reference_forward(x, params):
    """Pure-JAX reference mirroring the PyTorch forward (training-mode BN)."""
    w_d, b_d, w_h, b_h, w_w, b_w, gamma, beta = params

    def conv3d(x, w, b, pad):
        o = lax.conv_general_dilated(
            x, w, window_strides=(1, 1, 1),
            padding=[(pad[0], pad[0]), (pad[1], pad[1]), (pad[2], pad[2])],
            dimension_numbers=("NCDHW", "OIDHW", "NCDHW"),
            precision=lax.Precision.HIGHEST)
        return o + b[None, :, None, None, None]

    out = jnp.concatenate([conv3d(x, w_d, b_d, (0, 1, 1)),
                           conv3d(x, w_h, b_h, (1, 0, 1)),
                           conv3d(x, w_w, b_w, (1, 1, 0))], axis=1)
    mean = out.mean(axis=(0, 2, 3, 4), keepdims=True)
    var = jnp.square(out - mean).mean(axis=(0, 2, 3, 4), keepdims=True)
    xhat = (out - mean) * lax.rsqrt(var + BN_EPS)
    y = xhat * gamma[None, :, None, None, None] + beta[None, :, None, None, None]
    return jnp.maximum(y, 0.0)


def init_params(key, in_channels, out_channels):
    planes = out_channels // 3
    rem = out_channels % 3
    pd = planes + (1 if rem > 0 else 0)
    ph = planes + (1 if rem > 1 else 0)
    pw = planes
    ks = jax.random.split(key, 8)
    w_d = jax.random.normal(ks[0], (pd, in_channels, 1, 3, 3), jnp.float32) * 0.1
    b_d = jax.random.normal(ks[1], (pd,), jnp.float32) * 0.1
    w_h = jax.random.normal(ks[2], (ph, in_channels, 3, 1, 3), jnp.float32) * 0.1
    b_h = jax.random.normal(ks[3], (ph,), jnp.float32) * 0.1
    w_w = jax.random.normal(ks[4], (pw, in_channels, 3, 3, 1), jnp.float32) * 0.1
    b_w = jax.random.normal(ks[5], (pw,), jnp.float32) * 0.1
    gamma = 1.0 + 0.1 * jax.random.normal(ks[6], (out_channels,), jnp.float32)
    beta = 0.1 * jax.random.normal(ks[7], (out_channels,), jnp.float32)
    return (w_d, b_d, w_h, b_h, w_w, b_w, gamma, beta)


if __name__ == "__main__":
    # Small shapes: batch=2, in_channels=4, out_channels=6, spatial D=H=W=8
    N, Cin, Cout, D, H, W = 2, 4, 6, 8, 8, 8
    key = jax.random.PRNGKey(0)
    kx, kp = jax.random.split(key)
    x = jax.random.normal(kx, (N, Cin, D, H, W), jnp.float32)
    params = init_params(kp, Cin, Cout)

    out = jax.block_until_ready(e2e3d_forward(x, params))
    ref = jax.block_until_ready(reference_forward(x, params))

    assert out.shape == (N, Cout, D, H, W), out.shape
    assert bool(jnp.all(jnp.isfinite(out)))
    err = float(jnp.max(jnp.abs(out - ref)))
    assert jnp.allclose(out, ref, atol=2e-2, rtol=2e-2), err

    # TODO(synk): BatchNorm3d running_mean/running_var updates (stateful side
    # effect) are not modeled; they do not affect the forward output.
    # TODO(synk): at production channel counts (Cin multiple of 16) switch the
    # staging scratch / GEMM to bf16 for full MXU rate.
    print("KERNEL_OK")
</pallas_src>

<mosaic_0001>
module attributes {stable_mosaic.version = 11 : i64} {
  func.func @_conv_stats_kernel(%arg0: i32, %arg1: i32, %arg2: memref<1x1x10x4x82xbf16, #tpu.memory_space<vmem>>, %arg3: memref<8x76xf32, #tpu.memory_space<vmem>>, %arg4: memref<8x1xf32, #tpu.memory_space<vmem>>, %arg5: memref<2x64xf32, #tpu.memory_space<vmem>>, %arg6: memref<1x1x8x512xbf16, #tpu.memory_space<vmem>>, %arg7: memref<1x1x8x2xf32, #tpu.memory_space<vmem>>, %arg8: memref<76x512xf32, #tpu.memory_space<vmem>>) attributes {dimension_semantics = [#tpu.dimension_semantics<parallel>, #tpu.dimension_semantics<parallel>], iteration_bounds = array<i64: 2, 1>, scalar_prefetch = 0 : i64, scratch_operands = 1 : i64, tpu.core_type = #tpu.core_type<tc>, window_params = [{transform_indices = @transform_0, window_bounds = array<i64: 1, 1, 10, 4, 82>}, {pipeline_mode = #tpu.pipeline_mode<synchronous>, transform_indices = @transform_1, window_bounds = array<i64: 8, 76>}, {pipeline_mode = #tpu.pipeline_mode<synchronous>, transform_indices = @transform_2, window_bounds = array<i64: 8, 1>}, {pipeline_mode = #tpu.pipeline_mode<synchronous>, transform_indices = @transform_3, window_bounds = array<i64: 2, 64>}, {transform_indices = @transform_4, window_bounds = array<i64: 1, 1, 8, 512>}, {transform_indices = @transform_5, window_bounds = array<i64: 1, 1, 8, 2>}]} {
    %c0 = arith.constant 0 : index
    %c0_0 = arith.constant 0 : index
    %0 = vector.load %arg5[%c0, %c0_0] : memref<2x64xf32, #tpu.memory_space<vmem>>, vector<1x64xf32>
    %c1 = arith.constant 1 : index
    %c0_1 = arith.constant 0 : index
    %1 = vector.load %arg5[%c1, %c0_1] : memref<2x64xf32, #tpu.memory_space<vmem>>, vector<1x64xf32>
    %c0_2 = arith.constant 0 : index
    %c0_3 = arith.constant 0 : index
    %c0_4 = arith.constant 0 : index
    %c0_5 = arith.constant 0 : index
    %c0_6 = arith.constant 0 : index
    %2 = vector.load %arg2[%c0_2, %c0_3, %c0_4, %c0_5, %c0_6] : memref<1x1x10x4x82xbf16, #tpu.memory_space<vmem>>, vector<1x1x1x4x82xbf16>
    %3 = vector.shape_cast %2 : vector<1x1x1x4x82xbf16> to vector<4x82xbf16>
    %4 = arith.extf %3 : vector<4x82xbf16> to vector<4x82xf32>
    %c0_7 = arith.constant 0 : index
    %c0_8 = arith.constant 0 : index
    %c1_9 = arith.constant 1 : index
    %c0_10 = arith.constant 0 : index
    %c0_11 = arith.constant 0 : index
    %5 = vector.load %arg2[%c0_7, %c0_8, %c1_9, %c0_10, %c0_11] : memref<1x1x10x4x82xbf16, #tpu.memory_space<vmem>>, vector<1x1x1x4x82xbf16>
    %6 = vector.shape_cast %5 : vector<1x1x1x4x82xbf16> to vector<4x82xbf16>
    %7 = arith.extf %6 : vector<4x82xbf16> to vector<4x82xf32>
    %c0_12 = arith.constant 0 : index
    %c0_13 = arith.constant 0 : index
    %c2 = arith.constant 2 : index
    %c0_14 = arith.constant 0 : index
    %c0_15 = arith.constant 0 : index
    %8 = vector.load %arg2[%c0_12, %c0_13, %c2, %c0_14, %c0_15] : memref<1x1x10x4x82xbf16, #tpu.memory_space<vmem>>, vector<1x1x1x4x82xbf16>
    %9 = vector.shape_cast %8 : vector<1x1x1x4x82xbf16> to vector<4x82xbf16>
    %10 = arith.extf %9 : vector<4x82xbf16> to vector<4x82xf32>
    %c0_16 = arith.constant 0 : index
    %c0_17 = arith.constant 0 : index
    %c3 = arith.constant 3 : index
    %c0_18 = arith.constant 0 : index
    %c0_19 = arith.constant 0 : index
    %11 = vector.load %arg2[%c0_16, %c0_17, %c3, %c0_18, %c0_19] : memref<1x1x10x4x82xbf16, #tpu.memory_space<vmem>>, vector<1x1x1x4x82xbf16>
    %12 = vector.shape_cast %11 : vector<1x1x1x4x82xbf16> to vector<4x82xbf16>
    %13 = arith.extf %12 : vector<4x82xbf16> to vector<4x82xf32>
    %c0_20 = arith.constant 0 : index
    %c0_21 = arith.constant 0 : index
    %c4 = arith.constant 4 : index
    %c0_22 = arith.constant 0 : index
    %c0_23 = arith.constant 0 : index
    %14 = vector.load %arg2[%c0_20, %c0_21, %c4, %c0_22, %c0_23] : memref<1x1x10x4x82xbf16, #tpu.memory_space<vmem>>, vector<1x1x1x4x82xbf16>
    %15 = vector.shape_cast %14 : vector<1x1x1x4x82xbf16> to vector<4x82xbf16>
    %16 = arith.extf %15 : vector<4x82xbf16> to vector<4x82xf32>
    %c0_24 = arith.constant 0 : index
    %c0_25 = arith.constant 0 : index
    %c5 = arith.constant 5 : index
    %c0_26 = arith.constant 0 : index
    %c0_27 = arith.constant 0 : index
    %17 = vector.load %arg2[%c0_24, %c0_25, %c5, %c0_26, %c0_27] : memref<1x1x10x4x82xbf16, #tpu.memory_space<vmem>>, vector<1x1x1x4x82xbf16>
    %18 = vector.shape_cast %17 : vector<1x1x1x4x82xbf16> to vector<4x82xbf16>
    %19 = arith.extf %18 : vector<4x82xbf16> to vector<4x82xf32>
    %c0_28 = arith.constant 0 : index
    %c0_29 = arith.constant 0 : index
    %c6 = arith.constant 6 : index
    %c0_30 = arith.constant 0 : index
    %c0_31 = arith.constant 0 : index
    %20 = vector.load %arg2[%c0_28, %c0_29, %c6, %c0_30, %c0_31] : memref<1x1x10x4x82xbf16, #tpu.memory_space<vmem>>, vector<1x1x1x4x82xbf16>
    %21 = vector.shape_cast %20 : vector<1x1x1x4x82xbf16> to vector<4x82xbf16>
    %22 = arith.extf %21 : vector<4x82xbf16> to vector<4x82xf32>
    %c0_32 = arith.constant 0 : index
    %c0_33 = arith.constant 0 : index
    %c7 = arith.constant 7 : index
    %c0_34 = arith.constant 0 : index
    %c0_35 = arith.constant 0 : index
    %23 = vector.load %arg2[%c0_32, %c0_33, %c7, %c0_34, %c0_35] : memref<1x1x10x4x82xbf16, #tpu.memory_space<vmem>>, vector<1x1x1x4x82xbf16>
    %24 = vector.shape_cast %23 : vector<1x1x1x4x82xbf16> to vector<4x82xbf16>
    %25 = arith.extf %24 : vector<4x82xbf16> to vector<4x82xf32>
    %c0_36 = arith.constant 0 : index
    %c0_37 = arith.constant 0 : index
    %c8 = arith.constant 8 : index
    %c0_38 = arith.constant 0 : index
    %c0_39 = arith.constant 0 : index
    %26 = vector.load %arg2[%c0_36, %c0_37, %c8, %c0_38, %c0_39] : memref<1x1x10x4x82xbf16, #tpu.memory_space<vmem>>, vector<1x1x1x4x82xbf16>
    %27 = vector.shape_cast %26 : vector<1x1x1x4x82xbf16> to vector<4x82xbf16>
    %28 = arith.extf %27 : vector<4x82xbf16> to vector<4x82xf32>
    %c0_40 = arith.constant 0 : index
    %c0_41 = arith.constant 0 : index
    %c9 = arith.constant 9 : index
    %c0_42 = arith.constant 0 : index
    %c0_43 = arith.constant 0 : index
    %29 = vector.load %arg2[%c0_40, %c0_41, %c9, %c0_42, %c0_43] : memref<1x1x10x4x82xbf16, #tpu.memory_space<vmem>>, vector<1x1x1x4x82xbf16>
    %30 = vector.shape_cast %29 : vector<1x1x1x4x82xbf16> to vector<4x82xbf16>
    %31 = arith.extf %30 : vector<4x82xbf16> to vector<4x82xf32>
    %32 = vector.extract_strided_slice %4 {offsets = [0, 1], sizes = [4, 64], strides = [1, 1]} : vector<4x82xf32> to vector<4x64xf32>
    %c0_44 = arith.constant 0 : index
    %c0_45 = arith.constant 0 : index
    %33 = vector.load %arg8[%c0_44, %c0_45] : memref<76x512xf32, #tpu.memory_space<vmem>>, vector<4x64xf32>
    tpu.vector_store %arg8[%c0_44, %c0_45], %32 {strides = array<i32>} : memref<76x512xf32, #tpu.memory_space<vmem>>, vector<4x64xf32>,
    %34 = vector.extract_strided_slice %7 {offsets = [0, 1], sizes = [4, 64], strides = [1, 1]} : vector<4x82xf32> to vector<4x64xf32>
    %c0_46 = arith.constant 0 : index
    %c64 = arith.constant 64 : index
    %35 = vector.load %arg8[%c0_46, %c64] : memref<76x512xf32, #tpu.memory_space<vmem>>, vector<4x64xf32>
    tpu.vector_store %arg8[%c0_46, %c64], %34 {strides = array<i32>} : memref<76x512xf32, #tpu.memory_space<vmem>>, vector<4x64xf32>,
    %36 = vector.extract_strided_slice %10 {offsets = [0, 1], sizes = [4, 64], strides = [1, 1]} : vector<4x82xf32> to vector<4x64xf32>
    %c0_47 = arith.constant 0 : index
    %c128 = arith.constant 128 : index
    %37 = vector.load %arg8[%c0_47, %c128] : memref<76x512xf32, #tpu.memory_space<vmem>>, vector<4x64xf32>
    tpu.vector_store %arg8[%c0_47, %c128], %36 {strides = array<i32>} : memref<76x512xf32, #tpu.memory_space<vmem>>, vector<4x64xf32>,
    %38 = vector.extract_strided_slice %13 {offsets = [0, 1], sizes = [4, 64], strides = [1, 1]} : vector<4x82xf32> to vector<4x64xf32>
    %c0_48 = arith.constant 0 : index
    %c192 = arith.constant 192 : index
    %39 = vector.load %arg8[%c0_48, %c192] : memref<76x512xf32, #tpu.memory_space<vmem>>, vector<4x64xf32>
    tpu.vector_store %arg8[%c0_48, %c192], %38 {strides = array<i32>} : memref<76x512xf32, #tpu.memory_space<vmem>>, vector<4x64xf32>,
    %40 = vector.extract_strided_slice %16 {offsets = [0, 1], sizes = [4, 64], strides = [1, 1]} : vector<4x82xf32> to vector<4x64xf32>
    %c0_49 = arith.constant 0 : index
    %c256 = arith.constant 256 : index
    %41 = vector.load %arg8[%c0_49, %c256] : memref<76x512xf32, #tpu.memory_space<vmem>>, vector<4x64xf32>
    tpu.vector_store %arg8[%c0_49, %c256], %40 {strides = array<i32>} : memref<76x512xf32, #tpu.memory_space<vmem>>, vector<4x64xf32>,
    %42 = vector.extract_strided_slice %19 {offsets = [0, 1], sizes = [4, 64], strides = [1, 1]} : vector<4x82xf32> to vector<4x64xf32>
    %c0_50 = arith.constant 0 : index
    %c320 = arith.constant 320 : index
    %43 = vector.load %arg8[%c0_50, %c320] : memref<76x512xf32, #tpu.memory_space<vmem>>, vector<4x64xf32>
    tpu.vector_store %arg8[%c0_50, %c320], %42 {strides = array<i32>} : memref<76x512xf32, #tpu.memory_space<vmem>>, vector<4x64xf32>,
    %44 = vector.extract_strided_slice %22 {offsets = [0, 1], sizes = [4, 64], strides = [1, 1]} : vector<4x82xf32> to vector<4x64xf32>
    %c0_51 = arith.constant 0 : index
    %c384 = arith.constant 384 : index
    %45 = vector.load %arg8[%c0_51, %c384] : memref<76x512xf32, #tpu.memory_space<vmem>>, vector<4x64xf32>
    tpu.vector_store %arg8[%c0_51, %c384], %44 {strides = array<i32>} : memref<76x512xf32, #tpu.memory_space<vmem>>, vector<4x64xf32>,
    %46 = vector.extract_strided_slice %25 {offsets = [0, 1], sizes = [4, 64], strides = [1, 1]} : vector<4x82xf32> to vector<4x64xf32>
    %c0_52 = arith.constant 0 : index
    %c448 = arith.constant 448 : index
    %47 = vector.load %arg8[%c0_52, %c448] : memref<76x512xf32, #tpu.memory_space<vmem>>, vector<4x64xf32>
    tpu.vector_store %arg8[%c0_52, %c448], %46 {strides = array<i32>} : memref<76x512xf32, #tpu.memory_space<vmem>>, vector<4x64xf32>,
    %48 = vector.extract_strided_slice %4 {offsets = [0, 8], sizes = [4, 64], strides = [1, 1]} : vector<4x82xf32> to vector<4x64xf32>
    %49 = vector.broadcast %0 : vector<1x64xf32> to vector<4x64xf32>
    %50 = arith.mulf %48, %49 : vector<4x64xf32>
    %c4_53 = arith.constant 4 : index
    %c0_54 = arith.constant 0 : index
    %51 = vector.load %arg8[%c4_53, %c0_54] : memref<76x512xf32, #tpu.memory_space<vmem>>, vector<4x64xf32>
    tpu.vector_store %arg8[%c4_53, %c0_54], %50 {strides = array<i32>} : memref<76x512xf32, #tpu.memory_space<vmem>>, vector<4x64xf32>,
    %52 = vector.extract_strided_slice %7 {offsets = [0, 8], sizes = [4, 64], strides = [1, 1]} : vector<4x82xf32> to vector<4x64xf32>
    %53 = vector.broadcast %0 : vector<1x64xf32> to vector<4x64xf32>
    %54 = arith.mulf %52, %53 : vector<4x64xf32>
    %c4_55 = arith.constant 4 : index
    %c64_56 = arith.constant 64 : index
    %55 = vector.load %arg8[%c4_55, %c64_56] : memref<76x512xf32, #tpu.memory_space<vmem>>, vector<4x64xf32>
    tpu.vector_store %arg8[%c4_55, %c64_56], %54 {strides = array<i32>} : memref<76x512xf32, #tpu.memory_space<vmem>>, vector<4x64xf32>,
    %56 = vector.extract_strided_slice %10 {offsets = [0, 8], sizes = [4, 64], strides = [1, 1]} : vector<4x82xf32> to vector<4x64xf32>
    %57 = vector.broadcast %0 : vector<1x64xf32> to vector<4x64xf32>
    %58 = arith.mulf %56, %57 : vector<4x64xf32>
    %c4_57 = arith.constant 4 : index
    %c128_58 = arith.constant 128 : index
    %59 = vector.load %arg8[%c4_57, %c128_58] : memref<76x512xf32, #tpu.memory_space<vmem>>, vector<4x64xf32>
    tpu.vector_store %arg8[%c4_57, %c128_58], %58 {strides = array<i32>} : memref<76x512xf32, #tpu.memory_space<vmem>>, vector<4x64xf32>,
    %60 = vector.extract_strided_slice %13 {offsets = [0, 8], sizes = [4, 64], strides = [1, 1]} : vector<4x82xf32> to vector<4x64xf32>
    %61 = vector.broadcast %0 : vector<1x64xf32> to vector<4x64xf32>
    %62 = arith.mulf %60, %61 : vector<4x64xf32>
    %c4_59 = arith.constant 4 : index
    %c192_60 = arith.constant 192 : index
    %63 = vector.load %arg8[%c4_59, %c192_60] : memref<76x512xf32, #tpu.memory_space<vmem>>, vector<4x64xf32>
    tpu.vector_store %arg8[%c4_59, %c192_60], %62 {strides = array<i32>} : memref<76x512xf32, #tpu.memory_space<vmem>>, vector<4x64xf32>,
    %64 = vector.extract_strided_slice %16 {offsets = [0, 8], sizes = [4, 64], strides = [1, 1]} : vector<4x82xf32> to vector<4x64xf32>
    %65 = vector.broadcast %0 : vector<1x64xf32> to vector<4x64xf32>
    %66 = arith.mulf %64, %65 : vector<4x64xf32>
    %c4_61 = arith.constant 4 : index
    %c256_62 = arith.constant 256 : index
    %67 = vector.load %arg8[%c4_61, %c256_62] : memref<76x512xf32, #tpu.memory_space<vmem>>, vector<4x64xf32>
    tpu.vector_store %arg8[%c4_61, %c256_62], %66 {strides = array<i32>} : memref<76x512xf32, #tpu.memory_space<vmem>>, vector<4x64xf32>,
    %68 = vector.extract_strided_slice %19 {offsets = [0, 8], sizes = [4, 64], strides = [1, 1]} : vector<4x82xf32> to vector<4x64xf32>
    %69 = vector.broadcast %0 : vector<1x64xf32> to vector<4x64xf32>
    %70 = arith.mulf %68, %69 : vector<4x64xf32>
    %c4_63 = arith.constant 4 : index
    %c320_64 = arith.constant 320 : index
    %71 = vector.load %arg8[%c4_63, %c320_64] : memref<76x512xf32, #tpu.memory_space<vmem>>, vector<4x64xf32>
    tpu.vector_store %arg8[%c4_63, %c320_64], %70 {strides = array<i32>} : memref<76x512xf32, #tpu.memory_space<vmem>>, vector<4x64xf32>,
    %72 = vector.extract_strided_slice %22 {offsets = [0, 8], sizes = [4, 64], strides = [1, 1]} : vector<4x82xf32> to vector<4x64xf32>
    %73 = vector.broadcast %0 : vector<1x64xf32> to vector<4x64xf32>
    %74 = arith.mulf %72, %73 : vector<4x64xf32>
    %c4_65 = arith.constant 4 : index
    %c384_66 = arith.constant 384 : index
    %75 = vector.load %arg8[%c4_65, %c384_66] : memref<76x512xf32, #tpu.memory_space<vmem>>, vector<4x64xf32>
    tpu.vector_store %arg8[%c4_65, %c384_66], %74 {strides = array<i32>} : memref<76x512xf32, #tpu.memory_space<vmem>>, vector<4x64xf32>,
    %76 = vector.extract_strided_slice %25 {offsets = [0, 8], sizes = [4, 64], strides = [1, 1]} : vector<4x82xf32> to vector<4x64xf32>
    %77 = vector.broadcast %0 : vector<1x64xf32> to vector<4x64xf32>
    %78 = arith.mulf %76, %77 : vector<4x64xf32>
    %c4_67 = arith.constant 4 : index
    %c448_68 = arith.constant 448 : index
    %79 = vector.load %arg8[%c4_67, %c448_68] : memref<76x512xf32, #tpu.memory_space<vmem>>, vector<4x64xf32>
    tpu.vector_store %arg8[%c4_67, %c448_68], %78 {strides = array<i32>} : memref<76x512xf32, #tpu.memory_space<vmem>>, vector<4x64xf32>,
    %80 = vector.extract_strided_slice %4 {offsets = [0, 9], sizes = [4, 64], strides = [1, 1]} : vector<4x82xf32> to vector<4x64xf32>
    %c8_69 = arith.constant 8 : index
    %c0_70 = arith.constant 0 : index
    %81 = vector.load %arg8[%c8_69, %c0_70] : memref<76x512xf32, #tpu.memory_space<vmem>>, vector<4x64xf32>
    tpu.vector_store %arg8[%c8_69, %c0_70], %80 {strides = array<i32>} : memref<76x512xf32, #tpu.memory_space<vmem>>, vector<4x64xf32>,
    %82 = vector.extract_strided_slice %7 {offsets = [0, 9], sizes = [4, 64], strides = [1, 1]} : vector<4x82xf32> to vector<4x64xf32>
    %c8_71 = arith.constant 8 : index
    %c64_72 = arith.constant 64 : index
    %83 = vector.load %arg8[%c8_71, %c64_72] : memref<76x512xf32, #tpu.memory_space<vmem>>, vector<4x64xf32>
    tpu.vector_store %arg8[%c8_71, %c64_72], %82 {strides = array<i32>} : memref<76x512xf32, #tpu.memory_space<vmem>>, vector<4x64xf32>,
    %84 = vector.extract_strided_slice %10 {offsets = [0, 9], sizes = [4, 64], strides = [1, 1]} : vector<4x82xf32> to vector<4x64xf32>
    %c8_73 = arith.constant 8 : index
    %c128_74 = arith.constant 128 : index
    %85 = vector.load %arg8[%c8_73, %c128_74] : memref<76x512xf32, #tpu.memory_space<vmem>>, vector<4x64xf32>
    tpu.vector_store %arg8[%c8_73, %c128_74], %84 {strides = array<i32>} : memref<76x512xf32, #tpu.memory_space<vmem>>, vector<4x64xf32>,
    %86 = vector.extract_strided_slice %13 {offsets = [0, 9], sizes = [4, 64], strides = [1, 1]} : vector<4x82xf32> to vector<4x64xf32>
    %c8_75 = arith.constant 8 : index
    %c192_76 = arith.constant 192 : index
    %87 = vector.load %arg8[%c8_75, %c192_76] : memref<76x512xf32, #tpu.memory_space<vmem>>, vector<4x64xf32>
    tpu.vector_store %arg8[%c8_75, %c192_76], %86 {strides = array<i32>} : memref<76x512xf32, #tpu.memory_space<vmem>>, vector<4x64xf32>,
    %88 = vector.extract_strided_slice %16 {offsets = [0, 9], sizes = [4, 64], strides = [1, 1]} : vector<4x82xf32> to vector<4x64xf32>
    %c8_77 = arith.constant 8 : index
    %c256_78 = arith.constant 256 : index
    %89 = vector.load %arg8[%c8_77, %c256_78] : memref<76x512xf32, #tpu.memory_space<vmem>>, vector<4x64xf32>
    tpu.vector_store %arg8[%c8_77, %c256_78], %88 {strides = array<i32>} : memref<76x512xf32, #tpu.memory_space<vmem>>, vector<4x64xf32>,
    %90 = vector.extract_strided_slice %19 {offsets = [0, 9], sizes = [4, 64], strides = [1, 1]} : vector<4x82xf32> to vector<4x64xf32>
    %c8_79 = arith.constant 8 : index
    %c320_80 = arith.constant 320 : index
    %91 = vector.load %arg8[%c8_79, %c320_80] : memref<76x512xf32, #tpu.memory_space<vmem>>, vector<4x64xf32>
    tpu.vector_store %arg8[%c8_79, %c320_80], %90 {strides = array<i32>} : memref<76x512xf32, #tpu.memory_space<vmem>>, vector<4x64xf32>,
    %92 = vector.extract_strided_slice %22 {offsets = [0, 9], sizes = [4, 64], strides = [1, 1]} : vector<4x82xf32> to vector<4x64xf32>
    %c8_81 = arith.constant 8 : index
    %c384_82 = arith.constant 384 : index
    %93 = vector.load %arg8[%c8_81, %c384_82] : memref<76x512xf32, #tpu.memory_space<vmem>>, vector<4x64xf32>
    tpu.vector_store %arg8[%c8_81, %c384_82], %92 {strides = array<i32>} : memref<76x512xf32, #tpu.memory_space<vmem>>, vector<4x64xf32>,
    %94 = vector.extract_strided_slice %25 {offsets = [0, 9], sizes = [4, 64], strides = [1, 1]} : vector<4x82xf32> to vector<4x64xf32>
    %c8_83 = arith.constant 8 : index
    %c448_84 = arith.constant 448 : index
    %95 = vector.load %arg8[%c8_83, %c448_84] : memref<76x512xf32, #tpu.memory_space<vmem>>, vector<4x64xf32>
    tpu.vector_store %arg8[%c8_83, %c448_84], %94 {strides = array<i32>} : memref<76x512xf32, #tpu.memory_space<vmem>>, vector<4x64xf32>,
    %96 = vector.extract_strided_slice %4 {offsets = [0, 10], sizes = [4, 64], strides = [1, 1]} : vector<4x82xf32> to vector<4x64xf32>
    %97 = vector.broadcast %1 : vector<1x64xf32> to vector<4x64xf32>
    %98 = arith.mulf %96, %97 : vector<4x64xf32>
    %c12 = arith.constant 12 : index
    %c0_85 = arith.constant 0 : index
    %99 = vector.load %arg8[%c12, %c0_85] : memref<76x512xf32, #tpu.memory_space<vmem>>, vector<4x64xf32>
    tpu.vector_store %arg8[%c12, %c0_85], %98 {strides = array<i32>} : memref<76x512xf32, #tpu.memory_space<vmem>>, vector<4x64xf32>,
    %100 = vector.extract_strided_slice %7 {offsets = [0, 10], sizes = [4, 64], strides = [1, 1]} : vector<4x82xf32> to vector<4x64xf32>
    %101 = vector.broadcast %1 : vector<1x64xf32> to vector<4x64xf32>
    %102 = arith.mulf %100, %101 : vector<4x64xf32>
    %c12_86 = arith.constant 12 : index
    %c64_87 = arith.constant 64 : index
    %103 = vector.load %arg8[%c12_86, %c64_87] : memref<76x512xf32, #tpu.memory_space<vmem>>, vector<4x64xf32>
    tpu.vector_store %arg8[%c12_86, %c64_87], %102 {strides = array<i32>} : memref<76x512xf32, #tpu.memory_space<vmem>>, vector<4x64xf32>,
    %104 = vector.extract_strided_slice %10 {offsets = [0, 10], sizes = [4, 64], strides = [1, 1]} : vector<4x82xf32> to vector<4x64xf32>
    %105 = vector.broadcast %1 : vector<1x64xf32> to vector<4x64xf32>
    %106 = arith.mulf %104, %105 : vector<4x64xf32>
    %c12_88 = arith.constant 12 : index
    %c128_89 = arith.constant 128 : index
    %107 = vector.load %arg8[%c12_88, %c128_89] : memref<76x512xf32, #tpu.memory_space<vmem>>, vector<4x64xf32>
    tpu.vector_store %arg8[%c12_88, %c128_89], %106 {strides = array<i32>} : memref<76x512xf32, #tpu.memory_space<vmem>>, vector<4x64xf32>,
    %108 = vector.extract_strided_slice %13 {offsets = [0, 10], sizes = [4, 64], strides = [1, 1]} : vector<4x82xf32> to vector<4x64xf32>
    %109 = vector.broadcast %1 : vector<1x64xf32> to vector<4x64xf32>
    %110 = arith.mulf %108, %109 : vector<4x64xf32>
    %c12_90 = arith.constant 12 : index
    %c192_91 = arith.constant 192 : index
    %111 = vector.load %arg8[%c12_90, %c192_91] : memref<76x512xf32, #tpu.memory_space<vmem>>, vector<4x64xf32>
    tpu.vector_store %arg8[%c12_90, %c192_91], %110 {strides = array<i32>} : memref<76x512xf32, #tpu.memory_space<vmem>>, vector<4x64xf32>,
    %112 = vector.extract_strided_slice %16 {offsets = [0, 10], sizes = [4, 64], strides = [1, 1]} : vector<4x82xf32> to vector<4x64xf32>
    %113 = vector.broadcast %1 : vector<1x64xf32> to vector<4x64xf32>
    %114 = arith.mulf %112, %113 : vector<4x64xf32>
    %c12_92 = arith.constant 12 : index
    %c256_93 = arith.constant 256 : index
    %115 = vector.load %arg8[%c12_92, %c256_93] : memref<76x512xf32, #tpu.memory_space<vmem>>, vector<4x64xf32>
    tpu.vector_store %arg8[%c12_92, %c256_93], %114 {strides = array<i32>} : memref<76x512xf32, #tpu.memory_space<vmem>>, vector<4x64xf32>,
    %116 = vector.extract_strided_slice %19 {offsets = [0, 10], sizes = [4, 64], strides = [1, 1]} : vector<4x82xf32> to vector<4x64xf32>
    %117 = vector.broadcast %1 : vector<1x64xf32> to vector<4x64xf32>
    %118 = arith.mulf %116, %117 : vector<4x64xf32>
    %c12_94 = arith.constant 12 : index
    %c320_95 = arith.constant 320 : index
    %119 = vector.load %arg8[%c12_94, %c320_95] : memref<76x512xf32, #tpu.memory_space<vmem>>, vector<4x64xf32>
    tpu.vector_store %arg8[%c12_94, %c320_95], %118 {strides = array<i32>} : memref<76x512xf32, #tpu.memory_space<vmem>>, vector<4x64xf32>,
    %120 = vector.extract_strided_slice %22 {offsets = [0, 10], sizes = [4, 64], strides = [1, 1]} : vector<4x82xf32> to vector<4x64xf32>
    %121 = vector.broadcast %1 : vector<1x64xf32> to vector<4x64xf32>
    %122 = arith.mulf %120, %121 : vector<4x64xf32>
    %c12_96 = arith.constant 12 : index
    %c384_97 = arith.constant 384 : index
    %123 = vector.load %arg8[%c12_96, %c384_97] : memref<76x512xf32, #tpu.memory_space<vmem>>, vector<4x64xf32>
    tpu.vector_store %arg8[%c12_96, %c384_97], %122 {strides = array<i32>} : memref<76x512xf32, #tpu.memory_space<vmem>>, vector<4x64xf32>,
    %124 = vector.extract_strided_slice %25 {offsets = [0, 10], sizes = [4, 64], strides = [1, 1]} : vector<4x82xf32> to vector<4x64xf32>
    %125 = vector.broadcast %1 : vector<1x64xf32> to vector<4x64xf32>
    %126 = arith.mulf %124, %125 : vector<4x64xf32>
    %c12_98 = arith.constant 12 : index
    %c448_99 = arith.constant 448 : index
    %127 = vector.load %arg8[%c12_98, %c448_99] : memref<76x512xf32, #tpu.memory_space<vmem>>, vector<4x64xf32>
    tpu.vector_store %arg8[%c12_98, %c448_99], %126 {strides = array<i32>} : memref<76x512xf32, #tpu.memory_space<vmem>>, vector<4x64xf32>,
    %128 = vector.extract_strided_slice %4 {offsets = [0, 17], sizes = [4, 64], strides = [1, 1]} : vector<4x82xf32> to vector<4x64xf32>
    %c16 = arith.constant 16 : index
    %c0_100 = arith.constant 0 : index
    %129 = vector.load %arg8[%c16, %c0_100] : memref<76x512xf32, #tpu.memory_space<vmem>>, vector<4x64xf32>
    tpu.vector_store %arg8[%c16, %c0_100], %128 {strides = array<i32>} : memref<76x512xf32, #tpu.memory_space<vmem>>, vector<4x64xf32>,
    %130 = vector.extract_strided_slice %7 {offsets = [0, 17], sizes = [4, 64], strides = [1, 1]} : vector<4x82xf32> to vector<4x64xf32>
    %c16_101 = arith.constant 16 : index
    %c64_102 = arith.constant 64 : index
    %131 = vector.load %arg8[%c16_101, %c64_102] : memref<76x512xf32, #tpu.memory_space<vmem>>, vector<4x64xf32>
    tpu.vector_store %arg8[%c16_101, %c64_102], %130 {strides = array<i32>} : memref<76x512xf32, #tpu.memory_space<vmem>>, vector<4x64xf32>,
    %132 = vector.extract_strided_slice %10 {offsets = [0, 17], sizes = [4, 64], strides = [1, 1]} : vector<4x82xf32> to vector<4x64xf32>
    %c16_103 = arith.constant 16 : index
    %c128_104 = arith.constant 128 : index
    %133 = vector.load %arg8[%c16_103, %c128_104] : memref<76x512xf32, #tpu.memory_space<vmem>>, vector<4x64xf32>
    tpu.vector_store %arg8[%c16_103, %c128_104], %132 {strides = array<i32>} : memref<76x512xf32, #tpu.memory_space<vmem>>, vector<4x64xf32>,
    %134 = vector.extract_strided_slice %13 {offsets = [0, 17], sizes = [4, 64], strides = [1, 1]} : vector<4x82xf32> to vector<4x64xf32>
    %c16_105 = arith.constant 16 : index
    %c192_106 = arith.constant 192 : index
    %135 = vector.load %arg8[%c16_105, %c192_106] : memref<76x512xf32, #tpu.memory_space<vmem>>, vector<4x64xf32>
    tpu.vector_store %arg8[%c16_105, %c192_106], %134 {strides = array<i32>} : memref<76x512xf32, #tpu.memory_space<vmem>>, vector<4x64xf32>,
    %136 = vector.extract_strided_slice %16 {offsets = [0, 17], sizes = [4, 64], strides = [1, 1]} : vector<4x82xf32> to vector<4x64xf32>
    %c16_107 = arith.constant 16 : index
    %c256_108 = arith.constant 256 : index
    %137 = vector.load %arg8[%c16_107, %c256_108] : memref<76x512xf32, #tpu.memory_space<vmem>>, vector<4x64xf32>
    tpu.vector_store %arg8[%c16_107, %c256_108], %136 {strides = array<i32>} : memref<76x512xf32, #tpu.memory_space<vmem>>, vector<4x64xf32>,
    %138 = vector.extract_strided_slice %19 {offsets = [0, 17], sizes = [4, 64], strides = [1, 1]} : vector<4x82xf32> to vector<4x64xf32>
    %c16_109 = arith.constant 16 : index
    %c320_110 = arith.constant 320 : index
    %139 = vector.load %arg8[%c16_109, %c320_110] : memref<76x512xf32, #tpu.memory_space<vmem>>, vector<4x64xf32>
    tpu.vector_store %arg8[%c16_109, %c320_110], %138 {strides = array<i32>} : memref<76x512xf32, #tpu.memory_space<vmem>>, vector<4x64xf32>,
    %140 = vector.extract_strided_slice %22 {offsets = [0, 17], sizes = [4, 64], strides = [1, 1]} : vector<4x82xf32> to vector<4x64xf32>
    %c16_111 = arith.constant 16 : index
    %c384_112 = arith.constant 384 : index
    %141 = vector.load %arg8[%c16_111, %c384_112] : memref<76x512xf32, #tpu.memory_space<vmem>>, vector<4x64xf32>
    tpu.vector_store %arg8[%c16_111, %c384_112], %140 {strides = array<i32>} : memref<76x512xf32, #tpu.memory_space<vmem>>, vector<4x64xf32>,
    %142 = vector.extract_strided_slice %25 {offsets = [0, 17], sizes = [4, 64], strides = [1, 1]} : vector<4x82xf32> to vector<4x64xf32>
    %c16_113 = arith.constant 16 : index
    %c448_114 = arith.constant 448 : index
    %143 = vector.load %arg8[%c16_113, %c448_114] : memref<76x512xf32, #tpu.memory_space<vmem>>, vector<4x64xf32>
    tpu.vector_store %arg8[%c16_113, %c448_114], %142 {strides = array<i32>} : memref<76x512xf32, #tpu.memory_space<vmem>>, vector<4x64xf32>,
    %144 = vector.extract_strided_slice %7 {offsets = [0, 0], sizes = [4, 64], strides = [1, 1]} : vector<4x82xf32> to vector<4x64xf32>
    %145 = vector.broadcast %0 : vector<1x64xf32> to vector<4x64xf32>
    %146 = arith.mulf %144, %145 : vector<4x64xf32>
    %c20 = arith.constant 20 : index
    %c0_115 = arith.constant 0 : index
    %147 = vector.load %arg8[%c20, %c0_115] : memref<76x512xf32, #tpu.memory_space<vmem>>, vector<4x64xf32>
    tpu.vector_store %arg8[%c20, %c0_115], %146 {strides = array<i32>} : memref<76x512xf32, #tpu.memory_space<vmem>>, vector<4x64xf32>,
    %148 = vector.extract_strided_slice %10 {offsets = [0, 0], sizes = [4, 64], strides = [1, 1]} : vector<4x82xf32> to vector<4x64xf32>
    %149 = vector.broadcast %0 : vector<1x64xf32> to vector<4x64xf32>
    %150 = arith.mulf %148, %149 : vector<4x64xf32>
    %c20_116 = arith.constant 20 : index
    %c64_117 = arith.constant 64 : index
    %151 = vector.load %arg8[%c20_116, %c64_117] : memref<76x512xf32, #tpu.memory_space<vmem>>, vector<4x64xf32>
    tpu.vector_store %arg8[%c20_116, %c64_117], %150 {strides = array<i32>} : memref<76x512xf32, #tpu.memory_space<vmem>>, vector<4x64xf32>,
    %152 = vector.extract_strided_slice %13 {offsets = [0, 0], sizes = [4, 64], strides = [1, 1]} : vector<4x82xf32> to vector<4x64xf32>
    %153 = vector.broadcast %0 : vector<1x64xf32> to vector<4x64xf32>
    %154 = arith.mulf %152, %153 : vector<4x64xf32>
    %c20_118 = arith.constant 20 : index
    %c128_119 = arith.constant 128 : index
    %155 = vector.load %arg8[%c20_118, %c128_119] : memref<76x512xf32, #tpu.memory_space<vmem>>, vector<4x64xf32>
    tpu.vector_store %arg8[%c20_118, %c128_119], %154 {strides = array<i32>} : memref<76x512xf32, #tpu.memory_space<vmem>>, vector<4x64xf32>,
    %156 = vector.extract_strided_slice %16 {offsets = [0, 0], sizes = [4, 64], strides = [1, 1]} : vector<4x82xf32> to vector<4x64xf32>
    %157 = vector.broadcast %0 : vector<1x64xf32> to vector<4x64xf32>
    %158 = arith.mulf %156, %157 : vector<4x64xf32>
    %c20_120 = arith.constant 20 : index
    %c192_121 = arith.constant 192 : index
    %159 = vector.load %arg8[%c20_120, %c192_121] : memref<76x512xf32, #tpu.memory_space<vmem>>, vector<4x64xf32>
    tpu.vector_store %arg8[%c20_120, %c192_121], %158 {strides = array<i32>} : memref<76x512xf32, #tpu.memory_space<vmem>>, vector<4x64xf32>,
    %160 = vector.extract_strided_slice %19 {offsets = [0, 0], sizes = [4, 64], strides = [1, 1]} : vector<4x82xf32> to vector<4x64xf32>
    %161 = vector.broadcast %0 : vector<1x64xf32> to vector<4x64xf32>
    %162 = arith.mulf %160, %161 : vector<4x64xf32>
    %c20_122 = arith.constant 20 : index
    %c256_123 = arith.constant 256 : index
    %163 = vector.load %arg8[%c20_122, %c256_123] : memref<76x512xf32, #tpu.memory_space<vmem>>, vector<4x64xf32>
    tpu.vector_store %arg8[%c20_122, %c256_123], %162 {strides = array<i32>} : memref<76x512xf32, #tpu.memory_space<vmem>>, vector<4x64xf32>,
    %164 = vector.extract_strided_slice %22 {offsets = [0, 0], sizes = [4, 64], strides = [1, 1]} : vector<4x82xf32> to vector<4x64xf32>
    %165 = vector.broadcast %0 : vector<1x64xf32> to vector<4x64xf32>
    %166 = arith.mulf %164, %165 : vector<4x64xf32>
    %c20_124 = arith.constant 20 : index
    %c320_125 = arith.constant 320 : index
    %167 = vector.load %arg8[%c20_124, %c320_125] : memref<76x512xf32, #tpu.memory_space<vmem>>, vector<4x64xf32>
    tpu.vector_store %arg8[%c20_124, %c320_125], %166 {strides = array<i32>} : memref<76x512xf32, #tpu.memory_space<vmem>>, vector<4x64xf32>,
    %168 = vector.extract_strided_slice %25 {offsets = [0, 0], sizes = [4, 64], strides = [1, 1]} : vector<4x82xf32> to vector<4x64xf32>
    %169 = vector.broadcast %0 : vector<1x64xf32> to vector<4x64xf32>
    %170 = arith.mulf %168, %169 : vector<4x64xf32>
    %c20_126 = arith.constant 20 : index
    %c384_127 = arith.constant 384 : index
    %171 = vector.load %arg8[%c20_126, %c384_127] : memref<76x512xf32, #tpu.memory_space<vmem>>, vector<4x64xf32>
    tpu.vector_store %arg8[%c20_126, %c384_127], %170 {strides = array<i32>} : memref<76x512xf32, #tpu.memory_space<vmem>>, vector<4x64xf32>,
    %172 = vector.extract_strided_slice %28 {offsets = [0, 0], sizes = [4, 64], strides = [1, 1]} : vector<4x82xf32> to vector<4x64xf32>
    %173 = vector.broadcast %0 : vector<1x64xf32> to vector<4x64xf32>
    %174 = arith.mulf %172, %173 : vector<4x64xf32>
    %c20_128 = arith.constant 20 : index
    %c448_129 = arith.constant 448 : index
    %175 = vector.load %arg8[%c20_128, %c448_129] : memref<76x512xf32, #tpu.memory_space<vmem>>, vector<4x64xf32>
    tpu.vector_store %arg8[%c20_128, %c448_129], %174 {strides = array<i32>} : memref<76x512xf32, #tpu.memory_space<vmem>>, vector<4x64xf32>,
    %176 = vector.extract_strided_slice %7 {offsets = [0, 1], sizes = [4, 64], strides = [1, 1]} : vector<4x82xf32> to vector<4x64xf32>
    %c24 = arith.constant 24 : index
    %c0_130 = arith.constant 0 : index
    %177 = vector.load %arg8[%c24, %c0_130] : memref<76x512xf32, #tpu.memory_space<vmem>>, vector<4x64xf32>
    tpu.vector_store %arg8[%c24, %c0_130], %176 {strides = array<i32>} : memref<76x512xf32, #tpu.memory_space<vmem>>, vector<4x64xf32>,
    %178 = vector.extract_strided_slice %10 {offsets = [0, 1], sizes = [4, 64], strides = [1, 1]} : vector<4x82xf32> to vector<4x64xf32>
    %c24_131 = arith.constant 24 : index
    %c64_132 = arith.constant 64 : index
    %179 = vector.load %arg8[%c24_131, %c64_132] : memref<76x512xf32, #tpu.memory_space<vmem>>, vector<4x64xf32>
    tpu.vector_store %arg8[%c24_131, %c64_132], %178 {strides = array<i32>} : memref<76x512xf32, #tpu.memory_space<vmem>>, vector<4x64xf32>,
    %180 = vector.extract_strided_slice %13 {offsets = [0, 1], sizes = [4, 64], strides = [1, 1]} : vector<4x82xf32> to vector<4x64xf32>
    %c24_133 = arith.constant 24 : index
    %c128_134 = arith.constant 128 : index
    %181 = vector.load %arg8[%c24_133, %c128_134] : memref<76x512xf32, #tpu.memory_space<vmem>>, vector<4x64xf32>
    tpu.vector_store %arg8[%c24_133, %c128_134], %180 {strides = array<i32>} : memref<76x512xf32, #tpu.memory_space<vmem>>, vector<4x64xf32>,
    %182 = vector.extract_strided_slice %16 {offsets = [0, 1], sizes = [4, 64], strides = [1, 1]} : vector<4x82xf32> to vector<4x64xf32>
    %c24_135 = arith.constant 24 : index
    %c192_136 = arith.constant 192 : index
    %183 = vector.load %arg8[%c24_135, %c192_136] : memref<76x512xf32, #tpu.memory_space<vmem>>, vector<4x64xf32>
    tpu.vector_store %arg8[%c24_135, %c192_136], %182 {strides = array<i32>} : memref<76x512xf32, #tpu.memory_space<vmem>>, vector<4x64xf32>,
    %184 = vector.extract_strided_slice %19 {offsets = [0, 1], sizes = [4, 64], strides = [1, 1]} : vector<4x82xf32> to vector<4x64xf32>
    %c24_137 = arith.constant 24 : index
    %c256_138 = arith.constant 256 : index
    %185 = vector.load %arg8[%c24_137, %c256_138] : memref<76x512xf32, #tpu.memory_space<vmem>>, vector<4x64xf32>
    tpu.vector_store %arg8[%c24_137, %c256_138], %184 {strides = array<i32>} : memref<76x512xf32, #tpu.memory_space<vmem>>, vector<4x64xf32>,
    %186 = vector.extract_strided_slice %22 {offsets = [0, 1], sizes = [4, 64], strides = [1, 1]} : vector<4x82xf32> to vector<4x64xf32>
    %c24_139 = arith.constant 24 : index
    %c320_140 = arith.constant 320 : index
    %187 = vector.load %arg8[%c24_139, %c320_140] : memref<76x512xf32, #tpu.memory_space<vmem>>, vector<4x64xf32>
    tpu.vector_store %arg8[%c24_139, %c320_140], %186 {strides = array<i32>} : memref<76x512xf32, #tpu.memory_space<vmem>>, vector<4x64xf32>,
    %188 = vector.extract_strided_slice %25 {offsets = [0, 1], sizes = [4, 64], strides = [1, 1]} : vector<4x82xf32> to vector<4x64xf32>
    %c24_141 = arith.constant 24 : index
    %c384_142 = arith.constant 384 : index
    %189 = vector.load %arg8[%c24_141, %c384_142] : memref<76x512xf32, #tpu.memory_space<vmem>>, vector<4x64xf32>
    tpu.vector_store %arg8[%c24_141, %c384_142], %188 {strides = array<i32>} : memref<76x512xf32, #tpu.memory_space<vmem>>, vector<4x64xf32>,
    %190 = vector.extract_strided_slice %28 {offsets = [0, 1], sizes = [4, 64], strides = [1, 1]} : vector<4x82xf32> to vector<4x64xf32>
    %c24_143 = arith.constant 24 : index
    %c448_144 = arith.constant 448 : index
    %191 = vector.load %arg8[%c24_143, %c448_144] : memref<76x512xf32, #tpu.memory_space<vmem>>, vector<4x64xf32>
    tpu.vector_store %arg8[%c24_143, %c448_144], %190 {strides = array<i32>} : memref<76x512xf32, #tpu.memory_space<vmem>>, vector<4x64xf32>,
    %192 = vector.extract_strided_slice %7 {offsets = [0, 2], sizes = [4, 64], strides = [1, 1]} : vector<4x82xf32> to vector<4x64xf32>
    %193 = vector.broadcast %1 : vector<1x64xf32> to vector<4x64xf32>
    %194 = arith.mulf %192, %193 : vector<4x64xf32>
    %c28 = arith.constant 28 : index
    %c0_145 = arith.constant 0 : index
    %195 = vector.load %arg8[%c28, %c0_145] : memref<76x512xf32, #tpu.memory_space<vmem>>, vector<4x64xf32>
    tpu.vector_store %arg8[%c28, %c0_145], %194 {strides = array<i32>} : memref<76x512xf32, #tpu.memory_space<vmem>>, vector<4x64xf32>,
    %196 = vector.extract_strided_slice %10 {offsets = [0, 2], sizes = [4, 64], strides = [1, 1]} : vector<4x82xf32> to vector<4x64xf32>
    %197 = vector.broadcast %1 : vector<1x64xf32> to vector<4x64xf32>
    %198 = arith.mulf %196, %197 : vector<4x64xf32>
    %c28_146 = arith.constant 28 : index
    %c64_147 = arith.constant 64 : index
    %199 = vector.load %arg8[%c28_146, %c64_147] : memref<76x512xf32, #tpu.memory_space<vmem>>, vector<4x64xf32>
    tpu.vector_store %arg8[%c28_146, %c64_147], %198 {strides = array<i32>} : memref<76x512xf32, #tpu.memory_space<vmem>>, vector<4x64xf32>,
    %200 = vector.extract_strided_slice %13 {offsets = [0, 2], sizes = [4, 64], strides = [1, 1]} : vector<4x82xf32> to vector<4x64xf32>
    %201 = vector.broadcast %1 : vector<1x64xf32> to vector<4x64xf32>
    %202 = arith.mulf %200, %201 : vector<4x64xf32>
    %c28_148 = arith.constant 28 : index
    %c128_149 = arith.constant 128 : index
    %203 = vector.load %arg8[%c28_148, %c128_149] : memref<76x512xf32, #tpu.memory_space<vmem>>, vector<4x64xf32>
    tpu.vector_store %arg8[%c28_148, %c128_149], %202 {strides = array<i32>} : memref<76x512xf32, #tpu.memory_space<vmem>>, vector<4x64xf32>,
    %204 = vector.extract_strided_slice %16 {offsets = [0, 2], sizes = [4, 64], strides = [1, 1]} : vector<4x82xf32> to vector<4x64xf32>
    %205 = vector.broadcast %1 : vector<1x64xf32> to vector<4x64xf32>
    %206 = arith.mulf %204, %205 : vector<4x64xf32>
    %c28_150 = arith.constant 28 : index
    %c192_151 = arith.constant 192 : index
    %207 = vector.load %arg8[%c28_150, %c192_151] : memref<76x512xf32, #tpu.memory_space<vmem>>, vector<4x64xf32>
    tpu.vector_store %arg8[%c28_150, %c192_151], %206 {strides = array<i32>} : memref<76x512xf32, #tpu.memory_space<vmem>>, vector<4x64xf32>,
    %208 = vector.extract_strided_slice %19 {offsets = [0, 2], sizes = [4, 64], strides = [1, 1]} : vector<4x82xf32> to vector<4x64xf32>
    %209 = vector.broadcast %1 : vector<1x64xf32> to vector<4x64xf32>
    %210 = arith.mulf %208, %209 : vector<4x64xf32>
    %c28_152 = arith.constant 28 : index
    %c256_153 = arith.constant 256 : index
    %211 = vector.load %arg8[%c28_152, %c256_153] : memref<76x512xf32, #tpu.memory_space<vmem>>, vector<4x64xf32>
    tpu.vector_store %arg8[%c28_152, %c256_153], %210 {strides = array<i32>} : memref<76x512xf32, #tpu.memory_space<vmem>>, vector<4x64xf32>,
    %212 = vector.extract_strided_slice %22 {offsets = [0, 2], sizes = [4, 64], strides = [1, 1]} : vector<4x82xf32> to vector<4x64xf32>
    %213 = vector.broadcast %1 : vector<1x64xf32> to vector<4x64xf32>
    %214 = arith.mulf %212, %213 : vector<4x64xf32>
    %c28_154 = arith.constant 28 : index
    %c320_155 = arith.constant 320 : index
    %215 = vector.load %arg8[%c28_154, %c320_155] : memref<76x512xf32, #tpu.memory_space<vmem>>, vector<4x64xf32>
    tpu.vector_store %arg8[%c28_154, %c320_155], %214 {strides = array<i32>} : memref<76x512xf32, #tpu.memory_space<vmem>>, vector<4x64xf32>,
    %216 = vector.extract_strided_slice %25 {offsets = [0, 2], sizes = [4, 64], strides = [1, 1]} : vector<4x82xf32> to vector<4x64xf32>
    %217 = vector.broadcast %1 : vector<1x64xf32> to vector<4x64xf32>
    %218 = arith.mulf %216, %217 : vector<4x64xf32>
    %c28_156 = arith.constant 28 : index
    %c384_157 = arith.constant 384 : index
    %219 = vector.load %arg8[%c28_156, %c384_157] : memref<76x512xf32, #tpu.memory_space<vmem>>, vector<4x64xf32>
    tpu.vector_store %arg8[%c28_156, %c384_157], %218 {strides = array<i32>} : memref<76x512xf32, #tpu.memory_space<vmem>>, vector<4x64xf32>,
    %220 = vector.extract_strided_slice %28 {offsets = [0, 2], sizes = [4, 64], strides = [1, 1]} : vector<4x82xf32> to vector<4x64xf32>
    %221 = vector.broadcast %1 : vector<1x64xf32> to vector<4x64xf32>
    %222 = arith.mulf %220, %221 : vector<4x64xf32>
    %c28_158 = arith.constant 28 : index
    %c448_159 = arith.constant 448 : index
    %223 = vector.load %arg8[%c28_158, %c448_159] : memref<76x512xf32, #tpu.memory_space<vmem>>, vector<4x64xf32>
    tpu.vector_store %arg8[%c28_158, %c448_159], %222 {strides = array<i32>} : memref<76x512xf32, #tpu.memory_space<vmem>>, vector<4x64xf32>,
    %224 = vector.extract_strided_slice %7 {offsets = [0, 8], sizes = [4, 64], strides = [1, 1]} : vector<4x82xf32> to vector<4x64xf32>
    %225 = vector.broadcast %0 : vector<1x64xf32> to vector<4x64xf32>
    %226 = arith.mulf %224, %225 : vector<4x64xf32>
    %c32 = arith.constant 32 : index
    %c0_160 = arith.constant 0 : index
    %227 = vector.load %arg8[%c32, %c0_160] : memref<76x512xf32, #tpu.memory_space<vmem>>, vector<4x64xf32>
    tpu.vector_store %arg8[%c32, %c0_160], %226 {strides = array<i32>} : memref<76x512xf32, #tpu.memory_space<vmem>>, vector<4x64xf32>,
    %228 = vector.extract_strided_slice %10 {offsets = [0, 8], sizes = [4, 64], strides = [1, 1]} : vector<4x82xf32> to vector<4x64xf32>
    %229 = vector.broadcast %0 : vector<1x64xf32> to vector<4x64xf32>
    %230 = arith.mulf %228, %229 : vector<4x64xf32>
    %c32_161 = arith.constant 32 : index
    %c64_162 = arith.constant 64 : index
    %231 = vector.load %arg8[%c32_161, %c64_162] : memref<76x512xf32, #tpu.memory_space<vmem>>, vector<4x64xf32>
    tpu.vector_store %arg8[%c32_161, %c64_162], %230 {strides = array<i32>} : memref<76x512xf32, #tpu.memory_space<vmem>>, vector<4x64xf32>,
    %232 = vector.extract_strided_slice %13 {offsets = [0, 8], sizes = [4, 64], strides = [1, 1]} : vector<4x82xf32> to vector<4x64xf32>
    %233 = vector.broadcast %0 : vector<1x64xf32> to vector<4x64xf32>
    %234 = arith.mulf %232, %233 : vector<4x64xf32>
    %c32_163 = arith.constant 32 : index
    %c128_164 = arith.constant 128 : index
    %235 = vector.load %arg8[%c32_163, %c128_164] : memref<76x512xf32, #tpu.memory_space<vmem>>, vector<4x64xf32>
    tpu.vector_store %arg8[%c32_163, %c128_164], %234 {strides = array<i32>} : memref<76x512xf32, #tpu.memory_space<vmem>>, vector<4x64xf32>,
    %236 = vector.extract_strided_slice %16 {offsets = [0, 8], sizes = [4, 64], strides = [1, 1]} : vector<4x82xf32> to vector<4x64xf32>
    %237 = vector.broadcast %0 : vector<1x64xf32> to vector<4x64xf32>
    %238 = arith.mulf %236, %237 : vector<4x64xf32>
    %c32_165 = arith.constant 32 : index
    %c192_166 = arith.constant 192 : index
    %239 = vector.load %arg8[%c32_165, %c192_166] : memref<76x512xf32, #tpu.memory_space<vmem>>, vector<4x64xf32>
    tpu.vector_store %arg8[%c32_165, %c192_166], %238 {strides = array<i32>} : memref<76x512xf32, #tpu.memory_space<vmem>>, vector<4x64xf32>,
    %240 = vector.extract_strided_slice %19 {offsets = [0, 8], sizes = [4, 64], strides = [1, 1]} : vector<4x82xf32> to vector<4x64xf32>
    %241 = vector.broadcast %0 : vector<1x64xf32> to vector<4x64xf32>
    %242 = arith.mulf %240, %241 : vector<4x64xf32>
    %c32_167 = arith.constant 32 : index
    %c256_168 = arith.constant 256 : index
    %243 = vector.load %arg8[%c32_167, %c256_168] : memref<76x512xf32, #tpu.memory_space<vmem>>, vector<4x64xf32>
    tpu.vector_store %arg8[%c32_167, %c256_168], %242 {strides = array<i32>} : memref<76x512xf32, #tpu.memory_space<vmem>>, vector<4x64xf32>,
    %244 = vector.extract_strided_slice %22 {offsets = [0, 8], sizes = [4, 64], strides = [1, 1]} : vector<4x82xf32> to vector<4x64xf32>
    %245 = vector.broadcast %0 : vector<1x64xf32> to vector<4x64xf32>
    %246 = arith.mulf %244, %245 : vector<4x64xf32>
    %c32_169 = arith.constant 32 : index
    %c320_170 = arith.constant 320 : index
    %247 = vector.load %arg8[%c32_169, %c320_170] : memref<76x512xf32, #tpu.memory_space<vmem>>, vector<4x64xf32>
    tpu.vector_store %arg8[%c32_169, %c320_170], %246 {strides = array<i32>} : memref<76x512xf32, #tpu.memory_space<vmem>>, vector<4x64xf32>,
    %248 = vector.extract_strided_slice %25 {offsets = [0, 8], sizes = [4, 64], strides = [1, 1]} : vector<4x82xf32> to vector<4x64xf32>
    %249 = vector.broadcast %0 : vector<1x64xf32> to vector<4x64xf32>
    %250 = arith.mulf %248, %249 : vector<4x64xf32>
    %c32_171 = arith.constant 32 : index
    %c384_172 = arith.constant 384 : index
    %251 = vector.load %arg8[%c32_171, %c384_172] : memref<76x512xf32, #tpu.memory_space<vmem>>, vector<4x64xf32>
    tpu.vector_store %arg8[%c32_171, %c384_172], %250 {strides = array<i32>} : memref<76x512xf32, #tpu.memory_space<vmem>>, vector<4x64xf32>,
    %252 = vector.extract_strided_slice %28 {offsets = [0, 8], sizes = [4, 64], strides = [1, 1]} : vector<4x82xf32> to vector<4x64xf32>
    %253 = vector.broadcast %0 : vector<1x64xf32> to vector<4x64xf32>
    %254 = arith.mulf %252, %253 : vector<4x64xf32>
    %c32_173 = arith.constant 32 : index
    %c448_174 = arith.constant 448 : index
    %255 = vector.load %arg8[%c32_173, %c448_174] : memref<76x512xf32, #tpu.memory_space<vmem>>, vector<4x64xf32>
    tpu.vector_store %arg8[%c32_173, %c448_174], %254 {strides = array<i32>} : memref<76x512xf32, #tpu.memory_space<vmem>>, vector<4x64xf32>,
    %256 = vector.extract_strided_slice %7 {offsets = [0, 9], sizes = [4, 64], strides = [1, 1]} : vector<4x82xf32> to vector<4x64xf32>
    %c36 = arith.constant 36 : index
    %c0_175 = arith.constant 0 : index
    %257 = vector.load %arg8[%c36, %c0_175] : memref<76x512xf32, #tpu.memory_space<vmem>>, vector<4x64xf32>
    tpu.vector_store %arg8[%c36, %c0_175], %256 {strides = array<i32>} : memref<76x512xf32, #tpu.memory_space<vmem>>, vector<4x64xf32>,
    %258 = vector.extract_strided_slice %10 {offsets = [0, 9], sizes = [4, 64], strides = [1, 1]} : vector<4x82xf32> to vector<4x64xf32>
    %c36_176 = arith.constant 36 : index
    %c64_177 = arith.constant 64 : index
    %259 = vector.load %arg8[%c36_176, %c64_177] : memref<76x512xf32, #tpu.memory_space<vmem>>, vector<4x64xf32>
    tpu.vector_store %arg8[%c36_176, %c64_177], %258 {strides = array<i32>} : memref<76x512xf32, #tpu.memory_space<vmem>>, vector<4x64xf32>,
    %260 = vector.extract_strided_slice %13 {offsets = [0, 9], sizes = [4, 64], strides = [1, 1]} : vector<4x82xf32> to vector<4x64xf32>
    %c36_178 = arith.constant 36 : index
    %c128_179 = arith.constant 128 : index
    %261 = vector.load %arg8[%c36_178, %c128_179] : memref<76x512xf32, #tpu.memory_space<vmem>>, vector<4x64xf32>
    tpu.vector_store %arg8[%c36_178, %c128_179], %260 {strides = array<i32>} : memref<76x512xf32, #tpu.memory_space<vmem>>, vector<4x64xf32>,
    %262 = vector.extract_strided_slice %16 {offsets = [0, 9], sizes = [4, 64], strides = [1, 1]} : vector<4x82xf32> to vector<4x64xf32>
    %c36_180 = arith.constant 36 : index
    %c192_181 = arith.constant 192 : index
    %263 = vector.load %arg8[%c36_180, %c192_181] : memref<76x512xf32, #tpu.memory_space<vmem>>, vector<4x64xf32>
    tpu.vector_store %arg8[%c36_180, %c192_181], %262 {strides = array<i32>} : memref<76x512xf32, #tpu.memory_space<vmem>>, vector<4x64xf32>,
    %264 = vector.extract_strided_slice %19 {offsets = [0, 9], sizes = [4, 64], strides = [1, 1]} : vector<4x82xf32> to vector<4x64xf32>
    %c36_182 = arith.constant 36 : index
    %c256_183 = arith.constant 256 : index
    %265 = vector.load %arg8[%c36_182, %c256_183] : memref<76x512xf32, #tpu.memory_space<vmem>>, vector<4x64xf32>
    tpu.vector_store %arg8[%c36_182, %c256_183], %264 {strides = array<i32>} : memref<76x512xf32, #tpu.memory_space<vmem>>, vector<4x64xf32>,
    %266 = vector.extract_strided_slice %22 {offsets = [0, 9], sizes = [4, 64], strides = [1, 1]} : vector<4x82xf32> to vector<4x64xf32>
    %c36_184 = arith.constant 36 : index
    %c320_185 = arith.constant 320 : index
    %267 = vector.load %arg8[%c36_184, %c320_185] : memref<76x512xf32, #tpu.memory_space<vmem>>, vector<4x64xf32>
    tpu.vector_store %arg8[%c36_184, %c320_185], %266 {strides = array<i32>} : memref<76x512xf32, #tpu.memory_space<vmem>>, vector<4x64xf32>,
    %268 = vector.extract_strided_slice %25 {offsets = [0, 9], sizes = [4, 64], strides = [1, 1]} : vector<4x82xf32> to vector<4x64xf32>
    %c36_186 = arith.constant 36 : index
    %c384_187 = arith.constant 384 : index
    %269 = vector.load %arg8[%c36_186, %c384_187] : memref<76x512xf32, #tpu.memory_space<vmem>>, vector<4x64xf32>
    tpu.vector_store %arg8[%c36_186, %c384_187], %268 {strides = array<i32>} : memref<76x512xf32, #tpu.memory_space<vmem>>, vector<4x64xf32>,
    %270 = vector.extract_strided_slice %28 {offsets = [0, 9], sizes = [4, 64], strides = [1, 1]} : vector<4x82xf32> to vector<4x64xf32>
    %c36_188 = arith.constant 36 : index
    %c448_189 = arith.constant 448 : index
    %271 = vector.load %arg8[%c36_188, %c448_189] : memref<76x512xf32, #tpu.memory_space<vmem>>, vector<4x64xf32>
    tpu.vector_store %arg8[%c36_188, %c448_189], %270 {strides = array<i32>} : memref<76x512xf32, #tpu.memory_space<vmem>>, vector<4x64xf32>,
    %272 = vector.extract_strided_slice %7 {offsets = [0, 10], sizes = [4, 64], strides = [1, 1]} : vector<4x82xf32> to vector<4x64xf32>
    %273 = vector.broadcast %1 : vector<1x64xf32> to vector<4x64xf32>
    %274 = arith.mulf %272, %273 : vector<4x64xf32>
    %c40 = arith.constant 40 : index
    %c0_190 = arith.constant 0 : index
    %275 = vector.load %arg8[%c40, %c0_190] : memref<76x512xf32, #tpu.memory_space<vmem>>, vector<4x64xf32>
    tpu.vector_store %arg8[%c40, %c0_190], %274 {strides = array<i32>} : memref<76x512xf32, #tpu.memory_space<vmem>>, vector<4x64xf32>,
    %276 = vector.extract_strided_slice %10 {offsets = [0, 10], sizes = [4, 64], strides = [1, 1]} : vector<4x82xf32> to vector<4x64xf32>
    %277 = vector.broadcast %1 : vector<1x64xf32> to vector<4x64xf32>
    %278 = arith.mulf %276, %277 : vector<4x64xf32>
    %c40_191 = arith.constant 40 : index
    %c64_192 = arith.constant 64 : index
    %279 = vector.load %arg8[%c40_191, %c64_192] : memref<76x512xf32, #tpu.memory_space<vmem>>, vector<4x64xf32>
    tpu.vector_store %arg8[%c40_191, %c64_192], %278 {strides = array<i32>} : memref<76x512xf32, #tpu.memory_space<vmem>>, vector<4x64xf32>,
    %280 = vector.extract_strided_slice %13 {offsets = [0, 10], sizes = [4, 64], strides = [1, 1]} : vector<4x82xf32> to vector<4x64xf32>
    %281 = vector.broadcast %1 : vector<1x64xf32> to vector<4x64xf32>
    %282 = arith.mulf %280, %281 : vector<4x64xf32>
    %c40_193 = arith.constant 40 : index
    %c128_194 = arith.constant 128 : index
    %283 = vector.load %arg8[%c40_193, %c128_194] : memref<76x512xf32, #tpu.memory_space<vmem>>, vector<4x64xf32>
    tpu.vector_store %arg8[%c40_193, %c128_194], %282 {strides = array<i32>} : memref<76x512xf32, #tpu.memory_space<vmem>>, vector<4x64xf32>,
    %284 = vector.extract_strided_slice %16 {offsets = [0, 10], sizes = [4, 64], strides = [1, 1]} : vector<4x82xf32> to vector<4x64xf32>
    %285 = vector.broadcast %1 : vector<1x64xf32> to vector<4x64xf32>
    %286 = arith.mulf %284, %285 : vector<4x64xf32>
    %c40_195 = arith.constant 40 : index
    %c192_196 = arith.constant 192 : index
    %287 = vector.load %arg8[%c40_195, %c192_196] : memref<76x512xf32, #tpu.memory_space<vmem>>, vector<4x64xf32>
    tpu.vector_store %arg8[%c40_195, %c192_196], %286 {strides = array<i32>} : memref<76x512xf32, #tpu.memory_space<vmem>>, vector<4x64xf32>,
    %288 = vector.extract_strided_slice %19 {offsets = [0, 10], sizes = [4, 64], strides = [1, 1]} : vector<4x82xf32> to vector<4x64xf32>
    %289 = vector.broadcast %1 : vector<1x64xf32> to vector<4x64xf32>
    %290 = arith.mulf %288, %289 : vector<4x64xf32>
    %c40_197 = arith.constant 40 : index
    %c256_198 = arith.constant 256 : index
    %291 = vector.load %arg8[%c40_197, %c256_198] : memref<76x512xf32, #tpu.memory_space<vmem>>, vector<4x64xf32>
    tpu.vector_store %arg8[%c40_197, %c256_198], %290 {strides = array<i32>} : memref<76x512xf32, #tpu.memory_space<vmem>>, vector<4x64xf32>,
    %292 = vector.extract_strided_slice %22 {offsets = [0, 10], sizes = [4, 64], strides = [1, 1]} : vector<4x82xf32> to vector<4x64xf32>
    %293 = vector.broadcast %1 : vector<1x64xf32> to vector<4x64xf32>
    %294 = arith.mulf %292, %293 : vector<4x64xf32>
    %c40_199 = arith.constant 40 : index
    %c320_200 = arith.constant 320 : index
    %295 = vector.load %arg8[%c40_199, %c320_200] : memref<76x512xf32, #tpu.memory_space<vmem>>, vector<4x64xf32>
    tpu.vector_store %arg8[%c40_199, %c320_200], %294 {strides = array<i32>} : memref<76x512xf32, #tpu.memory_space<vmem>>, vector<4x64xf32>,
    %296 = vector.extract_strided_slice %25 {offsets = [0, 10], sizes = [4, 64], strides = [1, 1]} : vector<4x82xf32> to vector<4x64xf32>
    %297 = vector.broadcast %1 : vector<1x64xf32> to vector<4x64xf32>
    %298 = arith.mulf %296, %297 : vector<4x64xf32>
    %c40_201 = arith.constant 40 : index
    %c384_202 = arith.constant 384 : index
    %299 = vector.load %arg8[%c40_201, %c384_202] : memref<76x512xf32, #tpu.memory_space<vmem>>, vector<4x64xf32>
    tpu.vector_store %arg8[%c40_201, %c384_202], %298 {strides = array<i32>} : memref<76x512xf32, #tpu.memory_space<vmem>>, vector<4x64xf32>,
    %300 = vector.extract_strided_slice %28 {offsets = [0, 10], sizes = [4, 64], strides = [1, 1]} : vector<4x82xf32> to vector<4x64xf32>
    %301 = vector.broadcast %1 : vector<1x64xf32> to vector<4x64xf32>
    %302 = arith.mulf %300, %301 : vector<4x64xf32>
    %c40_203 = arith.constant 40 : index
    %c448_204 = arith.constant 448 : index
    %303 = vector.load %arg8[%c40_203, %c448_204] : memref<76x512xf32, #tpu.memory_space<vmem>>, vector<4x64xf32>
    tpu.vector_store %arg8[%c40_203, %c448_204], %302 {strides = array<i32>} : memref<76x512xf32, #tpu.memory_space<vmem>>, vector<4x64xf32>,
    %304 = vector.extract_strided_slice %7 {offsets = [0, 16], sizes = [4, 64], strides = [1, 1]} : vector<4x82xf32> to vector<4x64xf32>
    %305 = vector.broadcast %0 : vector<1x64xf32> to vector<4x64xf32>
    %306 = arith.mulf %304, %305 : vector<4x64xf32>
    %c44 = arith.constant 44 : index
    %c0_205 = arith.constant 0 : index
    %307 = vector.load %arg8[%c44, %c0_205] : memref<76x512xf32, #tpu.memory_space<vmem>>, vector<4x64xf32>
    tpu.vector_store %arg8[%c44, %c0_205], %306 {strides = array<i32>} : memref<76x512xf32, #tpu.memory_space<vmem>>, vector<4x64xf32>,
    %308 = vector.extract_strided_slice %10 {offsets = [0, 16], sizes = [4, 64], strides = [1, 1]} : vector<4x82xf32> to vector<4x64xf32>
    %309 = vector.broadcast %0 : vector<1x64xf32> to vector<4x64xf32>
    %310 = arith.mulf %308, %309 : vector<4x64xf32>
    %c44_206 = arith.constant 44 : index
    %c64_207 = arith.constant 64 : index
    %311 = vector.load %arg8[%c44_206, %c64_207] : memref<76x512xf32, #tpu.memory_space<vmem>>, vector<4x64xf32>
    tpu.vector_store %arg8[%c44_206, %c64_207], %310 {strides = array<i32>} : memref<76x512xf32, #tpu.memory_space<vmem>>, vector<4x64xf32>,
    %312 = vector.extract_strided_slice %13 {offsets = [0, 16], sizes = [4, 64], strides = [1, 1]} : vector<4x82xf32> to vector<4x64xf32>
    %313 = vector.broadcast %0 : vector<1x64xf32> to vector<4x64xf32>
    %314 = arith.mulf %312, %313 : vector<4x64xf32>
    %c44_208 = arith.constant 44 : index
    %c128_209 = arith.constant 128 : index
    %315 = vector.load %arg8[%c44_208, %c128_209] : memref<76x512xf32, #tpu.memory_space<vmem>>, vector<4x64xf32>
    tpu.vector_store %arg8[%c44_208, %c128_209], %314 {strides = array<i32>} : memref<76x512xf32, #tpu.memory_space<vmem>>, vector<4x64xf32>,
    %316 = vector.extract_strided_slice %16 {offsets = [0, 16], sizes = [4, 64], strides = [1, 1]} : vector<4x82xf32> to vector<4x64xf32>
    %317 = vector.broadcast %0 : vector<1x64xf32> to vector<4x64xf32>
    %318 = arith.mulf %316, %317 : vector<4x64xf32>
    %c44_210 = arith.constant 44 : index
    %c192_211 = arith.constant 192 : index
    %319 = vector.load %arg8[%c44_210, %c192_211] : memref<76x512xf32, #tpu.memory_space<vmem>>, vector<4x64xf32>
    tpu.vector_store %arg8[%c44_210, %c192_211], %318 {strides = array<i32>} : memref<76x512xf32, #tpu.memory_space<vmem>>, vector<4x64xf32>,
    %320 = vector.extract_strided_slice %19 {offsets = [0, 16], sizes = [4, 64], strides = [1, 1]} : vector<4x82xf32> to vector<4x64xf32>
    %321 = vector.broadcast %0 : vector<1x64xf32> to vector<4x64xf32>
    %322 = arith.mulf %320, %321 : vector<4x64xf32>
    %c44_212 = arith.constant 44 : index
    %c256_213 = arith.constant 256 : index
    %323 = vector.load %arg8[%c44_212, %c256_213] : memref<76x512xf32, #tpu.memory_space<vmem>>, vector<4x64xf32>
    tpu.vector_store %arg8[%c44_212, %c256_213], %322 {strides = array<i32>} : memref<76x512xf32, #tpu.memory_space<vmem>>, vector<4x64xf32>,
    %324 = vector.extract_strided_slice %22 {offsets = [0, 16], sizes = [4, 64], strides = [1, 1]} : vector<4x82xf32> to vector<4x64xf32>
    %325 = vector.broadcast %0 : vector<1x64xf32> to vector<4x64xf32>
    %326 = arith.mulf %324, %325 : vector<4x64xf32>
    %c44_214 = arith.constant 44 : index
    %c320_215 = arith.constant 320 : index
    %327 = vector.load %arg8[%c44_214, %c320_215] : memref<76x512xf32, #tpu.memory_space<vmem>>, vector<4x64xf32>
    tpu.vector_store %arg8[%c44_214, %c320_215], %326 {strides = array<i32>} : memref<76x512xf32, #tpu.memory_space<vmem>>, vector<4x64xf32>,
    %328 = vector.extract_strided_slice %25 {offsets = [0, 16], sizes = [4, 64], strides = [1, 1]} : vector<4x82xf32> to vector<4x64xf32>
    %329 = vector.broadcast %0 : vector<1x64xf32> to vector<4x64xf32>
    %330 = arith.mulf %328, %329 : vector<4x64xf32>
    %c44_216 = arith.constant 44 : index
    %c384_217 = arith.constant 384 : index
    %331 = vector.load %arg8[%c44_216, %c384_217] : memref<76x512xf32, #tpu.memory_space<vmem>>, vector<4x64xf32>
    tpu.vector_store %arg8[%c44_216, %c384_217], %330 {strides = array<i32>} : memref<76x512xf32, #tpu.memory_space<vmem>>, vector<4x64xf32>,
    %332 = vector.extract_strided_slice %28 {offsets = [0, 16], sizes = [4, 64], strides = [1, 1]} : vector<4x82xf32> to vector<4x64xf32>
    %333 = vector.broadcast %0 : vector<1x64xf32> to vector<4x64xf32>
    %334 = arith.mulf %332, %333 : vector<4x64xf32>
    %c44_218 = arith.constant 44 : index
    %c448_219 = arith.constant 448 : index
    %335 = vector.load %arg8[%c44_218, %c448_219] : memref<76x512xf32, #tpu.memory_space<vmem>>, vector<4x64xf32>
    tpu.vector_store %arg8[%c44_218, %c448_219], %334 {strides = array<i32>} : memref<76x512xf32, #tpu.memory_space<vmem>>, vector<4x64xf32>,
    %336 = vector.extract_strided_slice %7 {offsets = [0, 17], sizes = [4, 64], strides = [1, 1]} : vector<4x82xf32> to vector<4x64xf32>
    %c48 = arith.constant 48 : index
    %c0_220 = arith.constant 0 : index
    %337 = vector.load %arg8[%c48, %c0_220] : memref<76x512xf32, #tpu.memory_space<vmem>>, vector<4x64xf32>
    tpu.vector_store %arg8[%c48, %c0_220], %336 {strides = array<i32>} : memref<76x512xf32, #tpu.memory_space<vmem>>, vector<4x64xf32>,
    %338 = vector.extract_strided_slice %10 {offsets = [0, 17], sizes = [4, 64], strides = [1, 1]} : vector<4x82xf32> to vector<4x64xf32>
    %c48_221 = arith.constant 48 : index
    %c64_222 = arith.constant 64 : index
    %339 = vector.load %arg8[%c48_221, %c64_222] : memref<76x512xf32, #tpu.memory_space<vmem>>, vector<4x64xf32>
    tpu.vector_store %arg8[%c48_221, %c64_222], %338 {strides = array<i32>} : memref<76x512xf32, #tpu.memory_space<vmem>>, vector<4x64xf32>,
    %340 = vector.extract_strided_slice %13 {offsets = [0, 17], sizes = [4, 64], strides = [1, 1]} : vector<4x82xf32> to vector<4x64xf32>
    %c48_223 = arith.constant 48 : index
    %c128_224 = arith.constant 128 : index
    %341 = vector.load %arg8[%c48_223, %c128_224] : memref<76x512xf32, #tpu.memory_space<vmem>>, vector<4x64xf32>
    tpu.vector_store %arg8[%c48_223, %c128_224], %340 {strides = array<i32>} : memref<76x512xf32, #tpu.memory_space<vmem>>, vector<4x64xf32>,
    %342 = vector.extract_strided_slice %16 {offsets = [0, 17], sizes = [4, 64], strides = [1, 1]} : vector<4x82xf32> to vector<4x64xf32>
    %c48_225 = arith.constant 48 : index
    %c192_226 = arith.constant 192 : index
    %343 = vector.load %arg8[%c48_225, %c192_226] : memref<76x512xf32, #tpu.memory_space<vmem>>, vector<4x64xf32>
    tpu.vector_store %arg8[%c48_225, %c192_226], %342 {strides = array<i32>} : memref<76x512xf32, #tpu.memory_space<vmem>>, vector<4x64xf32>,
    %344 = vector.extract_strided_slice %19 {offsets = [0, 17], sizes = [4, 64], strides = [1, 1]} : vector<4x82xf32> to vector<4x64xf32>
    %c48_227 = arith.constant 48 : index
    %c256_228 = arith.constant 256 : index
    %345 = vector.load %arg8[%c48_227, %c256_228] : memref<76x512xf32, #tpu.memory_space<vmem>>, vector<4x64xf32>
    tpu.vector_store %arg8[%c48_227, %c256_228], %344 {strides = array<i32>} : memref<76x512xf32, #tpu.memory_space<vmem>>, vector<4x64xf32>,
    %346 = vector.extract_strided_slice %22 {offsets = [0, 17], sizes = [4, 64], strides = [1, 1]} : vector<4x82xf32> to vector<4x64xf32>
    %c48_229 = arith.constant 48 : index
    %c320_230 = arith.constant 320 : index
    %347 = vector.load %arg8[%c48_229, %c320_230] : memref<76x512xf32, #tpu.memory_space<vmem>>, vector<4x64xf32>
    tpu.vector_store %arg8[%c48_229, %c320_230], %346 {strides = array<i32>} : memref<76x512xf32, #tpu.memory_space<vmem>>, vector<4x64xf32>,
    %348 = vector.extract_strided_slice %25 {offsets = [0, 17], sizes = [4, 64], strides = [1, 1]} : vector<4x82xf32> to vector<4x64xf32>
    %c48_231 = arith.constant 48 : index
    %c384_232 = arith.constant 384 : index
    %349 = vector.load %arg8[%c48_231, %c384_232] : memref<76x512xf32, #tpu.memory_space<vmem>>, vector<4x64xf32>
    tpu.vector_store %arg8[%c48_231, %c384_232], %348 {strides = array<i32>} : memref<76x512xf32, #tpu.memory_space<vmem>>, vector<4x64xf32>,
    %350 = vector.extract_strided_slice %28 {offsets = [0, 17], sizes = [4, 64], strides = [1, 1]} : vector<4x82xf32> to vector<4x64xf32>
    %c48_233 = arith.constant 48 : index
    %c448_234 = arith.constant 448 : index
    %351 = vector.load %arg8[%c48_233, %c448_234] : memref<76x512xf32, #tpu.memory_space<vmem>>, vector<4x64xf32>
    tpu.vector_store %arg8[%c48_233, %c448_234], %350 {strides = array<i32>} : memref<76x512xf32, #tpu.memory_space<vmem>>, vector<4x64xf32>,
    %352 = vector.extract_strided_slice %7 {offsets = [0, 18], sizes = [4, 64], strides = [1, 1]} : vector<4x82xf32> to vector<4x64xf32>
    %353 = vector.broadcast %1 : vector<1x64xf32> to vector<4x64xf32>
    %354 = arith.mulf %352, %353 : vector<4x64xf32>
    %c52 = arith.constant 52 : index
    %c0_235 = arith.constant 0 : index
    %355 = vector.load %arg8[%c52, %c0_235] : memref<76x512xf32, #tpu.memory_space<vmem>>, vector<4x64xf32>
    tpu.vector_store %arg8[%c52, %c0_235], %354 {strides = array<i32>} : memref<76x512xf32, #tpu.memory_space<vmem>>, vector<4x64xf32>,
    %356 = vector.extract_strided_slice %10 {offsets = [0, 18], sizes = [4, 64], strides = [1, 1]} : vector<4x82xf32> to vector<4x64xf32>
    %357 = vector.broadcast %1 : vector<1x64xf32> to vector<4x64xf32>
    %358 = arith.mulf %356, %357 : vector<4x64xf32>
    %c52_236 = arith.constant 52 : index
    %c64_237 = arith.constant 64 : index
    %359 = vector.load %arg8[%c52_236, %c64_237] : memref<76x512xf32, #tpu.memory_space<vmem>>, vector<4x64xf32>
    tpu.vector_store %arg8[%c52_236, %c64_237], %358 {strides = array<i32>} : memref<76x512xf32, #tpu.memory_space<vmem>>, vector<4x64xf32>,
    %360 = vector.extract_strided_slice %13 {offsets = [0, 18], sizes = [4, 64], strides = [1, 1]} : vector<4x82xf32> to vector<4x64xf32>
    %361 = vector.broadcast %1 : vector<1x64xf32> to vector<4x64xf32>
    %362 = arith.mulf %360, %361 : vector<4x64xf32>
    %c52_238 = arith.constant 52 : index
    %c128_239 = arith.constant 128 : index
    %363 = vector.load %arg8[%c52_238, %c128_239] : memref<76x512xf32, #tpu.memory_space<vmem>>, vector<4x64xf32>
    tpu.vector_store %arg8[%c52_238, %c128_239], %362 {strides = array<i32>} : memref<76x512xf32, #tpu.memory_space<vmem>>, vector<4x64xf32>,
    %364 = vector.extract_strided_slice %16 {offsets = [0, 18], sizes = [4, 64], strides = [1, 1]} : vector<4x82xf32> to vector<4x64xf32>
    %365 = vector.broadcast %1 : vector<1x64xf32> to vector<4x64xf32>
    %366 = arith.mulf %364, %365 : vector<4x64xf32>
    %c52_240 = arith.constant 52 : index
    %c192_241 = arith.constant 192 : index
    %367 = vector.load %arg8[%c52_240, %c192_241] : memref<76x512xf32, #tpu.memory_space<vmem>>, vector<4x64xf32>
    tpu.vector_store %arg8[%c52_240, %c192_241], %366 {strides = array<i32>} : memref<76x512xf32, #tpu.memory_space<vmem>>, vector<4x64xf32>,
    %368 = vector.extract_strided_slice %19 {offsets = [0, 18], sizes = [4, 64], strides = [1, 1]} : vector<4x82xf32> to vector<4x64xf32>
    %369 = vector.broadcast %1 : vector<1x64xf32> to vector<4x64xf32>
    %370 = arith.mulf %368, %369 : vector<4x64xf32>
    %c52_242 = arith.constant 52 : index
    %c256_243 = arith.constant 256 : index
    %371 = vector.load %arg8[%c52_242, %c256_243] : memref<76x512xf32, #tpu.memory_space<vmem>>, vector<4x64xf32>
    tpu.vector_store %arg8[%c52_242, %c256_243], %370 {strides = array<i32>} : memref<76x512xf32, #tpu.memory_space<vmem>>, vector<4x64xf32>,
    %372 = vector.extract_strided_slice %22 {offsets = [0, 18], sizes = [4, 64], strides = [1, 1]} : vector<4x82xf32> to vector<4x64xf32>
    %373 = vector.broadcast %1 : vector<1x64xf32> to vector<4x64xf32>
    %374 = arith.mulf %372, %373 : vector<4x64xf32>
    %c52_244 = arith.constant 52 : index
    %c320_245 = arith.constant 320 : index
    %375 = vector.load %arg8[%c52_244, %c320_245] : memref<76x512xf32, #tpu.memory_space<vmem>>, vector<4x64xf32>
    tpu.vector_store %arg8[%c52_244, %c320_245], %374 {strides = array<i32>} : memref<76x512xf32, #tpu.memory_space<vmem>>, vector<4x64xf32>,
    %376 = vector.extract_strided_slice %25 {offsets = [0, 18], sizes = [4, 64], strides = [1, 1]} : vector<4x82xf32> to vector<4x64xf32>
    %377 = vector.broadcast %1 : vector<1x64xf32> to vector<4x64xf32>
    %378 = arith.mulf %376, %377 : vector<4x64xf32>
    %c52_246 = arith.constant 52 : index
    %c384_247 = arith.constant 384 : index
    %379 = vector.load %arg8[%c52_246, %c384_247] : memref<76x512xf32, #tpu.memory_space<vmem>>, vector<4x64xf32>
    tpu.vector_store %arg8[%c52_246, %c384_247], %378 {strides = array<i32>} : memref<76x512xf32, #tpu.memory_space<vmem>>, vector<4x64xf32>,
    %380 = vector.extract_strided_slice %28 {offsets = [0, 18], sizes = [4, 64], strides = [1, 1]} : vector<4x82xf32> to vector<4x64xf32>
    %381 = vector.broadcast %1 : vector<1x64xf32> to vector<4x64xf32>
    %382 = arith.mulf %380, %381 : vector<4x64xf32>
    %c52_248 = arith.constant 52 : index
    %c448_249 = arith.constant 448 : index
    %383 = vector.load %arg8[%c52_248, %c448_249] : memref<76x512xf32, #tpu.memory_space<vmem>>, vector<4x64xf32>
    tpu.vector_store %arg8[%c52_248, %c448_249], %382 {strides = array<i32>} : memref<76x512xf32, #tpu.memory_space<vmem>>, vector<4x64xf32>,
    %384 = vector.extract_strided_slice %10 {offsets = [0, 1], sizes = [4, 64], strides = [1, 1]} : vector<4x82xf32> to vector<4x64xf32>
    %c56 = arith.constant 56 : index
    %c0_250 = arith.constant 0 : index
    %385 = vector.load %arg8[%c56, %c0_250] : memref<76x512xf32, #tpu.memory_space<vmem>>, vector<4x64xf32>
    tpu.vector_store %arg8[%c56, %c0_250], %384 {strides = array<i32>} : memref<76x512xf32, #tpu.memory_space<vmem>>, vector<4x64xf32>,
    %386 = vector.extract_strided_slice %13 {offsets = [0, 1], sizes = [4, 64], strides = [1, 1]} : vector<4x82xf32> to vector<4x64xf32>
    %c56_251 = arith.constant 56 : index
    %c64_252 = arith.constant 64 : index
    %387 = vector.load %arg8[%c56_251, %c64_252] : memref<76x512xf32, #tpu.memory_space<vmem>>, vector<4x64xf32>
    tpu.vector_store %arg8[%c56_251, %c64_252], %386 {strides = array<i32>} : memref<76x512xf32, #tpu.memory_space<vmem>>, vector<4x64xf32>,
    %388 = vector.extract_strided_slice %16 {offsets = [0, 1], sizes = [4, 64], strides = [1, 1]} : vector<4x82xf32> to vector<4x64xf32>
    %c56_253 = arith.constant 56 : index
    %c128_254 = arith.constant 128 : index
    %389 = vector.load %arg8[%c56_253, %c128_254] : memref<76x512xf32, #tpu.memory_space<vmem>>, vector<4x64xf32>
    tpu.vector_store %arg8[%c56_253, %c128_254], %388 {strides = array<i32>} : memref<76x512xf32, #tpu.memory_space<vmem>>, vector<4x64xf32>,
    %390 = vector.extract_strided_slice %19 {offsets = [0, 1], sizes = [4, 64], strides = [1, 1]} : vector<4x82xf32> to vector<4x64xf32>
    %c56_255 = arith.constant 56 : index
    %c192_256 = arith.constant 192 : index
    %391 = vector.load %arg8[%c56_255, %c192_256] : memref<76x512xf32, #tpu.memory_space<vmem>>, vector<4x64xf32>
    tpu.vector_store %arg8[%c56_255, %c192_256], %390 {strides = array<i32>} : memref<76x512xf32, #tpu.memory_space<vmem>>, vector<4x64xf32>,
    %392 = vector.extract_strided_slice %22 {offsets = [0, 1], sizes = [4, 64], strides = [1, 1]} : vector<4x82xf32> to vector<4x64xf32>
    %c56_257 = arith.constant 56 : index
    %c256_258 = arith.constant 256 : index
    %393 = vector.load %arg8[%c56_257, %c256_258] : memref<76x512xf32, #tpu.memory_space<vmem>>, vector<4x64xf32>
    tpu.vector_store %arg8[%c56_257, %c256_258], %392 {strides = array<i32>} : memref<76x512xf32, #tpu.memory_space<vmem>>, vector<4x64xf32>,
    %394 = vector.extract_strided_slice %25 {offsets = [0, 1], sizes = [4, 64], strides = [1, 1]} : vector<4x82xf32> to vector<4x64xf32>
    %c56_259 = arith.constant 56 : index
    %c320_260 = arith.constant 320 : index
    %395 = vector.load %arg8[%c56_259, %c320_260] : memref<76x512xf32, #tpu.memory_space<vmem>>, vector<4x64xf32>
    tpu.vector_store %arg8[%c56_259, %c320_260], %394 {strides = array<i32>} : memref<76x512xf32, #tpu.memory_space<vmem>>, vector<4x64xf32>,
    %396 = vector.extract_strided_slice %28 {offsets = [0, 1], sizes = [4, 64], strides = [1, 1]} : vector<4x82xf32> to vector<4x64xf32>
    %c56_261 = arith.constant 56 : index
    %c384_262 = arith.constant 384 : index
    %397 = vector.load %arg8[%c56_261, %c384_262] : memref<76x512xf32, #tpu.memory_space<vmem>>, vector<4x64xf32>
    tpu.vector_store %arg8[%c56_261, %c384_262], %396 {strides = array<i32>} : memref<76x512xf32, #tpu.memory_space<vmem>>, vector<4x64xf32>,
    %398 = vector.extract_strided_slice %31 {offsets = [0, 1], sizes = [4, 64], strides = [1, 1]} : vector<4x82xf32> to vector<4x64xf32>
    %c56_263 = arith.constant 56 : index
    %c448_264 = arith.constant 448 : index
    %399 = vector.load %arg8[%c56_263, %c448_264] : memref<76x512xf32, #tpu.memory_space<vmem>>, vector<4x64xf32>
    tpu.vector_store %arg8[%c56_263, %c448_264], %398 {strides = array<i32>} : memref<76x512xf32, #tpu.memory_space<vmem>>, vector<4x64xf32>,
    %400 = vector.extract_strided_slice %10 {offsets = [0, 8], sizes = [4, 64], strides = [1, 1]} : vector<4x82xf32> to vector<4x64xf32>
    %401 = vector.broadcast %0 : vector<1x64xf32> to vector<4x64xf32>
    %402 = arith.mulf %400, %401 : vector<4x64xf32>
    %c60 = arith.constant 60 : index
    %c0_265 = arith.constant 0 : index
    %403 = vector.load %arg8[%c60, %c0_265] : memref<76x512xf32, #tpu.memory_space<vmem>>, vector<4x64xf32>
    tpu.vector_store %arg8[%c60, %c0_265], %402 {strides = array<i32>} : memref<76x512xf32, #tpu.memory_space<vmem>>, vector<4x64xf32>,
    %404 = vector.extract_strided_slice %13 {offsets = [0, 8], sizes = [4, 64], strides = [1, 1]} : vector<4x82xf32> to vector<4x64xf32>
    %405 = vector.broadcast %0 : vector<1x64xf32> to vector<4x64xf32>
    %406 = arith.mulf %404, %405 : vector<4x64xf32>
    %c60_266 = arith.constant 60 : index
    %c64_267 = arith.constant 64 : index
    %407 = vector.load %arg8[%c60_266, %c64_267] : memref<76x512xf32, #tpu.memory_space<vmem>>, vector<4x64xf32>
    tpu.vector_store %arg8[%c60_266, %c64_267], %406 {strides = array<i32>} : memref<76x512xf32, #tpu.memory_space<vmem>>, vector<4x64xf32>,
    %408 = vector.extract_strided_slice %16 {offsets = [0, 8], sizes = [4, 64], strides = [1, 1]} : vector<4x82xf32> to vector<4x64xf32>
    %409 = vector.broadcast %0 : vector<1x64xf32> to vector<4x64xf32>
    %410 = arith.mulf %408, %409 : vector<4x64xf32>
    %c60_268 = arith.constant 60 : index
    %c128_269 = arith.constant 128 : index
    %411 = vector.load %arg8[%c60_268, %c128_269] : memref<76x512xf32, #tpu.memory_space<vmem>>, vector<4x64xf32>
    tpu.vector_store %arg8[%c60_268, %c128_269], %410 {strides = array<i32>} : memref<76x512xf32, #tpu.memory_space<vmem>>, vector<4x64xf32>,
    %412 = vector.extract_strided_slice %19 {offsets = [0, 8], sizes = [4, 64], strides = [1, 1]} : vector<4x82xf32> to vector<4x64xf32>
    %413 = vector.broadcast %0 : vector<1x64xf32> to vector<4x64xf32>
    %414 = arith.mulf %412, %413 : vector<4x64xf32>
    %c60_270 = arith.constant 60 : index
    %c192_271 = arith.constant 192 : index
    %415 = vector.load %arg8[%c60_270, %c192_271] : memref<76x512xf32, #tpu.memory_space<vmem>>, vector<4x64xf32>
    tpu.vector_store %arg8[%c60_270, %c192_271], %414 {strides = array<i32>} : memref<76x512xf32, #tpu.memory_space<vmem>>, vector<4x64xf32>,
    %416 = vector.extract_strided_slice %22 {offsets = [0, 8], sizes = [4, 64], strides = [1, 1]} : vector<4x82xf32> to vector<4x64xf32>
    %417 = vector.broadcast %0 : vector<1x64xf32> to vector<4x64xf32>
    %418 = arith.mulf %416, %417 : vector<4x64xf32>
    %c60_272 = arith.constant 60 : index
    %c256_273 = arith.constant 256 : index
    %419 = vector.load %arg8[%c60_272, %c256_273] : memref<76x512xf32, #tpu.memory_space<vmem>>, vector<4x64xf32>
    tpu.vector_store %arg8[%c60_272, %c256_273], %418 {strides = array<i32>} : memref<76x512xf32, #tpu.memory_space<vmem>>, vector<4x64xf32>,
    %420 = vector.extract_strided_slice %25 {offsets = [0, 8], sizes = [4, 64], strides = [1, 1]} : vector<4x82xf32> to vector<4x64xf32>
    %421 = vector.broadcast %0 : vector<1x64xf32> to vector<4x64xf32>
    %422 = arith.mulf %420, %421 : vector<4x64xf32>
    %c60_274 = arith.constant 60 : index
    %c320_275 = arith.constant 320 : index
    %423 = vector.load %arg8[%c60_274, %c320_275] : memref<76x512xf32, #tpu.memory_space<vmem>>, vector<4x64xf32>
    tpu.vector_store %arg8[%c60_274, %c320_275], %422 {strides = array<i32>} : memref<76x512xf32, #tpu.memory_space<vmem>>, vector<4x64xf32>,
    %424 = vector.extract_strided_slice %28 {offsets = [0, 8], sizes = [4, 64], strides = [1, 1]} : vector<4x82xf32> to vector<4x64xf32>
    %425 = vector.broadcast %0 : vector<1x64xf32> to vector<4x64xf32>
    %426 = arith.mulf %424, %425 : vector<4x64xf32>
    %c60_276 = arith.constant 60 : index
    %c384_277 = arith.constant 384 : index
    %427 = vector.load %arg8[%c60_276, %c384_277] : memref<76x512xf32, #tpu.memory_space<vmem>>, vector<4x64xf32>
    tpu.vector_store %arg8[%c60_276, %c384_277], %426 {strides = array<i32>} : memref<76x512xf32, #tpu.memory_space<vmem>>, vector<4x64xf32>,
    %428 = vector.extract_strided_slice %31 {offsets = [0, 8], sizes = [4, 64], strides = [1, 1]} : vector<4x82xf32> to vector<4x64xf32>
    %429 = vector.broadcast %0 : vector<1x64xf32> to vector<4x64xf32>
    %430 = arith.mulf %428, %429 : vector<4x64xf32>
    %c60_278 = arith.constant 60 : index
    %c448_279 = arith.constant 448 : index
    %431 = vector.load %arg8[%c60_278, %c448_279] : memref<76x512xf32, #tpu.memory_space<vmem>>, vector<4x64xf32>
    tpu.vector_store %arg8[%c60_278, %c448_279], %430 {strides = array<i32>} : memref<76x512xf32, #tpu.memory_space<vmem>>, vector<4x64xf32>,
    %432 = vector.extract_strided_slice %10 {offsets = [0, 9], sizes = [4, 64], strides = [1, 1]} : vector<4x82xf32> to vector<4x64xf32>
    %c64_280 = arith.constant 64 : index
    %c0_281 = arith.constant 0 : index
    %433 = vector.load %arg8[%c64_280, %c0_281] : memref<76x512xf32, #tpu.memory_space<vmem>>, vector<4x64xf32>
    tpu.vector_store %arg8[%c64_280, %c0_281], %432 {strides = array<i32>} : memref<76x512xf32, #tpu.memory_space<vmem>>, vector<4x64xf32>,
    %434 = vector.extract_strided_slice %13 {offsets = [0, 9], sizes = [4, 64], strides = [1, 1]} : vector<4x82xf32> to vector<4x64xf32>
    %c64_282 = arith.constant 64 : index
    %c64_283 = arith.constant 64 : index
    %435 = vector.load %arg8[%c64_282, %c64_283] : memref<76x512xf32, #tpu.memory_space<vmem>>, vector<4x64xf32>
    tpu.vector_store %arg8[%c64_282, %c64_283], %434 {strides = array<i32>} : memref<76x512xf32, #tpu.memory_space<vmem>>, vector<4x64xf32>,
    %436 = vector.extract_strided_slice %16 {offsets = [0, 9], sizes = [4, 64], strides = [1, 1]} : vector<4x82xf32> to vector<4x64xf32>
    %c64_284 = arith.constant 64 : index
    %c128_285 = arith.constant 128 : index
    %437 = vector.load %arg8[%c64_284, %c128_285] : memref<76x512xf32, #tpu.memory_space<vmem>>, vector<4x64xf32>
    tpu.vector_store %arg8[%c64_284, %c128_285], %436 {strides = array<i32>} : memref<76x512xf32, #tpu.memory_space<vmem>>, vector<4x64xf32>,
    %438 = vector.extract_strided_slice %19 {offsets = [0, 9], sizes = [4, 64], strides = [1, 1]} : vector<4x82xf32> to vector<4x64xf32>
    %c64_286 = arith.constant 64 : index
    %c192_287 = arith.constant 192 : index
    %439 = vector.load %arg8[%c64_286, %c192_287] : memref<76x512xf32, #tpu.memory_space<vmem>>, vector<4x64xf32>
    tpu.vector_store %arg8[%c64_286, %c192_287], %438 {strides = array<i32>} : memref<76x512xf32, #tpu.memory_space<vmem>>, vector<4x64xf32>,
    %440 = vector.extract_strided_slice %22 {offsets = [0, 9], sizes = [4, 64], strides = [1, 1]} : vector<4x82xf32> to vector<4x64xf32>
    %c64_288 = arith.constant 64 : index
    %c256_289 = arith.constant 256 : index
    %441 = vector.load %arg8[%c64_288, %c256_289] : memref<76x512xf32, #tpu.memory_space<vmem>>, vector<4x64xf32>
    tpu.vector_store %arg8[%c64_288, %c256_289], %440 {strides = array<i32>} : memref<76x512xf32, #tpu.memory_space<vmem>>, vector<4x64xf32>,
    %442 = vector.extract_strided_slice %25 {offsets = [0, 9], sizes = [4, 64], strides = [1, 1]} : vector<4x82xf32> to vector<4x64xf32>
    %c64_290 = arith.constant 64 : index
    %c320_291 = arith.constant 320 : index
    %443 = vector.load %arg8[%c64_290, %c320_291] : memref<76x512xf32, #tpu.memory_space<vmem>>, vector<4x64xf32>
    tpu.vector_store %arg8[%c64_290, %c320_291], %442 {strides = array<i32>} : memref<76x512xf32, #tpu.memory_space<vmem>>, vector<4x64xf32>,
    %444 = vector.extract_strided_slice %28 {offsets = [0, 9], sizes = [4, 64], strides = [1, 1]} : vector<4x82xf32> to vector<4x64xf32>
    %c64_292 = arith.constant 64 : index
    %c384_293 = arith.constant 384 : index
    %445 = vector.load %arg8[%c64_292, %c384_293] : memref<76x512xf32, #tpu.memory_space<vmem>>, vector<4x64xf32>
    tpu.vector_store %arg8[%c64_292, %c384_293], %444 {strides = array<i32>} : memref<76x512xf32, #tpu.memory_space<vmem>>, vector<4x64xf32>,
    %446 = vector.extract_strided_slice %31 {offsets = [0, 9], sizes = [4, 64], strides = [1, 1]} : vector<4x82xf32> to vector<4x64xf32>
    %c64_294 = arith.constant 64 : index
    %c448_295 = arith.constant 448 : index
    %447 = vector.load %arg8[%c64_294, %c448_295] : memref<76x512xf32, #tpu.memory_space<vmem>>, vector<4x64xf32>
    tpu.vector_store %arg8[%c64_294, %c448_295], %446 {strides = array<i32>} : memref<76x512xf32, #tpu.memory_space<vmem>>, vector<4x64xf32>,
    %448 = vector.extract_strided_slice %10 {offsets = [0, 10], sizes = [4, 64], strides = [1, 1]} : vector<4x82xf32> to vector<4x64xf32>
    %449 = vector.broadcast %1 : vector<1x64xf32> to vector<4x64xf32>
    %450 = arith.mulf %448, %449 : vector<4x64xf32>
    %c68 = arith.constant 68 : index
    %c0_296 = arith.constant 0 : index
    %451 = vector.load %arg8[%c68, %c0_296] : memref<76x512xf32, #tpu.memory_space<vmem>>, vector<4x64xf32>
    tpu.vector_store %arg8[%c68, %c0_296], %450 {strides = array<i32>} : memref<76x512xf32, #tpu.memory_space<vmem>>, vector<4x64xf32>,
    %452 = vector.extract_strided_slice %13 {offsets = [0, 10], sizes = [4, 64], strides = [1, 1]} : vector<4x82xf32> to vector<4x64xf32>
    %453 = vector.broadcast %1 : vector<1x64xf32> to vector<4x64xf32>
    %454 = arith.mulf %452, %453 : vector<4x64xf32>
    %c68_297 = arith.constant 68 : index
    %c64_298 = arith.constant 64 : index
    %455 = vector.load %arg8[%c68_297, %c64_298] : memref<76x512xf32, #tpu.memory_space<vmem>>, vector<4x64xf32>
    tpu.vector_store %arg8[%c68_297, %c64_298], %454 {strides = array<i32>} : memref<76x512xf32, #tpu.memory_space<vmem>>, vector<4x64xf32>,
    %456 = vector.extract_strided_slice %16 {offsets = [0, 10], sizes = [4, 64], strides = [1, 1]} : vector<4x82xf32> to vector<4x64xf32>
    %457 = vector.broadcast %1 : vector<1x64xf32> to vector<4x64xf32>
    %458 = arith.mulf %456, %457 : vector<4x64xf32>
    %c68_299 = arith.constant 68 : index
    %c128_300 = arith.constant 128 : index
    %459 = vector.load %arg8[%c68_299, %c128_300] : memref<76x512xf32, #tpu.memory_space<vmem>>, vector<4x64xf32>
    tpu.vector_store %arg8[%c68_299, %c128_300], %458 {strides = array<i32>} : memref<76x512xf32, #tpu.memory_space<vmem>>, vector<4x64xf32>,
    %460 = vector.extract_strided_slice %19 {offsets = [0, 10], sizes = [4, 64], strides = [1, 1]} : vector<4x82xf32> to vector<4x64xf32>
    %461 = vector.broadcast %1 : vector<1x64xf32> to vector<4x64xf32>
    %462 = arith.mulf %460, %461 : vector<4x64xf32>
    %c68_301 = arith.constant 68 : index
    %c192_302 = arith.constant 192 : index
    %463 = vector.load %arg8[%c68_301, %c192_302] : memref<76x512xf32, #tpu.memory_space<vmem>>, vector<4x64xf32>
    tpu.vector_store %arg8[%c68_301, %c192_302], %462 {strides = array<i32>} : memref<76x512xf32, #tpu.memory_space<vmem>>, vector<4x64xf32>,
    %464 = vector.extract_strided_slice %22 {offsets = [0, 10], sizes = [4, 64], strides = [1, 1]} : vector<4x82xf32> to vector<4x64xf32>
    %465 = vector.broadcast %1 : vector<1x64xf32> to vector<4x64xf32>
    %466 = arith.mulf %464, %465 : vector<4x64xf32>
    %c68_303 = arith.constant 68 : index
    %c256_304 = arith.constant 256 : index
    %467 = vector.load %arg8[%c68_303, %c256_304] : memref<76x512xf32, #tpu.memory_space<vmem>>, vector<4x64xf32>
    tpu.vector_store %arg8[%c68_303, %c256_304], %466 {strides = array<i32>} : memref<76x512xf32, #tpu.memory_space<vmem>>, vector<4x64xf32>,
    %468 = vector.extract_strided_slice %25 {offsets = [0, 10], sizes = [4, 64], strides = [1, 1]} : vector<4x82xf32> to vector<4x64xf32>
    %469 = vector.broadcast %1 : vector<1x64xf32> to vector<4x64xf32>
    %470 = arith.mulf %468, %469 : vector<4x64xf32>
    %c68_305 = arith.constant 68 : index
    %c320_306 = arith.constant 320 : index
    %471 = vector.load %arg8[%c68_305, %c320_306] : memref<76x512xf32, #tpu.memory_space<vmem>>, vector<4x64xf32>
    tpu.vector_store %arg8[%c68_305, %c320_306], %470 {strides = array<i32>} : memref<76x512xf32, #tpu.memory_space<vmem>>, vector<4x64xf32>,
    %472 = vector.extract_strided_slice %28 {offsets = [0, 10], sizes = [4, 64], strides = [1, 1]} : vector<4x82xf32> to vector<4x64xf32>
    %473 = vector.broadcast %1 : vector<1x64xf32> to vector<4x64xf32>
    %474 = arith.mulf %472, %473 : vector<4x64xf32>
    %c68_307 = arith.constant 68 : index
    %c384_308 = arith.constant 384 : index
    %475 = vector.load %arg8[%c68_307, %c384_308] : memref<76x512xf32, #tpu.memory_space<vmem>>, vector<4x64xf32>
    tpu.vector_store %arg8[%c68_307, %c384_308], %474 {strides = array<i32>} : memref<76x512xf32, #tpu.memory_space<vmem>>, vector<4x64xf32>,
    %476 = vector.extract_strided_slice %31 {offsets = [0, 10], sizes = [4, 64], strides = [1, 1]} : vector<4x82xf32> to vector<4x64xf32>
    %477 = vector.broadcast %1 : vector<1x64xf32> to vector<4x64xf32>
    %478 = arith.mulf %476, %477 : vector<4x64xf32>
    %c68_309 = arith.constant 68 : index
    %c448_310 = arith.constant 448 : index
    %479 = vector.load %arg8[%c68_309, %c448_310] : memref<76x512xf32, #tpu.memory_space<vmem>>, vector<4x64xf32>
    tpu.vector_store %arg8[%c68_309, %c448_310], %478 {strides = array<i32>} : memref<76x512xf32, #tpu.memory_space<vmem>>, vector<4x64xf32>,
    %480 = vector.extract_strided_slice %10 {offsets = [0, 17], sizes = [4, 64], strides = [1, 1]} : vector<4x82xf32> to vector<4x64xf32>
    %c72 = arith.constant 72 : index
    %c0_311 = arith.constant 0 : index
    %481 = vector.load %arg8[%c72, %c0_311] : memref<76x512xf32, #tpu.memory_space<vmem>>, vector<4x64xf32>
    tpu.vector_store %arg8[%c72, %c0_311], %480 {strides = array<i32>} : memref<76x512xf32, #tpu.memory_space<vmem>>, vector<4x64xf32>,
    %482 = vector.extract_strided_slice %13 {offsets = [0, 17], sizes = [4, 64], strides = [1, 1]} : vector<4x82xf32> to vector<4x64xf32>
    %c72_312 = arith.constant 72 : index
    %c64_313 = arith.constant 64 : index
    %483 = vector.load %arg8[%c72_312, %c64_313] : memref<76x512xf32, #tpu.memory_space<vmem>>, vector<4x64xf32>
    tpu.vector_store %arg8[%c72_312, %c64_313], %482 {strides = array<i32>} : memref<76x512xf32, #tpu.memory_space<vmem>>, vector<4x64xf32>,
    %484 = vector.extract_strided_slice %16 {offsets = [0, 17], sizes = [4, 64], strides = [1, 1]} : vector<4x82xf32> to vector<4x64xf32>
    %c72_314 = arith.constant 72 : index
    %c128_315 = arith.constant 128 : index
    %485 = vector.load %arg8[%c72_314, %c128_315] : memref<76x512xf32, #tpu.memory_space<vmem>>, vector<4x64xf32>
    tpu.vector_store %arg8[%c72_314, %c128_315], %484 {strides = array<i32>} : memref<76x512xf32, #tpu.memory_space<vmem>>, vector<4x64xf32>,
    %486 = vector.extract_strided_slice %19 {offsets = [0, 17], sizes = [4, 64], strides = [1, 1]} : vector<4x82xf32> to vector<4x64xf32>
    %c72_316 = arith.constant 72 : index
    %c192_317 = arith.constant 192 : index
    %487 = vector.load %arg8[%c72_316, %c192_317] : memref<76x512xf32, #tpu.memory_space<vmem>>, vector<4x64xf32>
    tpu.vector_store %arg8[%c72_316, %c192_317], %486 {strides = array<i32>} : memref<76x512xf32, #tpu.memory_space<vmem>>, vector<4x64xf32>,
    %488 = vector.extract_strided_slice %22 {offsets = [0, 17], sizes = [4, 64], strides = [1, 1]} : vector<4x82xf32> to vector<4x64xf32>
    %c72_318 = arith.constant 72 : index
    %c256_319 = arith.constant 256 : index
    %489 = vector.load %arg8[%c72_318, %c256_319] : memref<76x512xf32, #tpu.memory_space<vmem>>, vector<4x64xf32>
    tpu.vector_store %arg8[%c72_318, %c256_319], %488 {strides = array<i32>} : memref<76x512xf32, #tpu.memory_space<vmem>>, vector<4x64xf32>,
    %490 = vector.extract_strided_slice %25 {offsets = [0, 17], sizes = [4, 64], strides = [1, 1]} : vector<4x82xf32> to vector<4x64xf32>
    %c72_320 = arith.constant 72 : index
    %c320_321 = arith.constant 320 : index
    %491 = vector.load %arg8[%c72_320, %c320_321] : memref<76x512xf32, #tpu.memory_space<vmem>>, vector<4x64xf32>
    tpu.vector_store %arg8[%c72_320, %c320_321], %490 {strides = array<i32>} : memref<76x512xf32, #tpu.memory_space<vmem>>, vector<4x64xf32>,
    %492 = vector.extract_strided_slice %28 {offsets = [0, 17], sizes = [4, 64], strides = [1, 1]} : vector<4x82xf32> to vector<4x64xf32>
    %c72_322 = arith.constant 72 : index
    %c384_323 = arith.constant 384 : index
    %493 = vector.load %arg8[%c72_322, %c384_323] : memref<76x512xf32, #tpu.memory_space<vmem>>, vector<4x64xf32>
    tpu.vector_store %arg8[%c72_322, %c384_323], %492 {strides = array<i32>} : memref<76x512xf32, #tpu.memory_space<vmem>>, vector<4x64xf32>,
    %494 = vector.extract_strided_slice %31 {offsets = [0, 17], sizes = [4, 64], strides = [1, 1]} : vector<4x82xf32> to vector<4x64xf32>
    %c72_324 = arith.constant 72 : index
    %c448_325 = arith.constant 448 : index
    %495 = vector.load %arg8[%c72_324, %c448_325] : memref<76x512xf32, #tpu.memory_space<vmem>>, vector<4x64xf32>
    tpu.vector_store %arg8[%c72_324, %c448_325], %494 {strides = array<i32>} : memref<76x512xf32, #tpu.memory_space<vmem>>, vector<4x64xf32>,
    %c0_326 = arith.constant 0 : index
    %c0_327 = arith.constant 0 : index
    %496 = vector.load %arg3[%c0_326, %c0_327] : memref<8x76xf32, #tpu.memory_space<vmem>>, vector<8x76xf32>
    %c0_328 = arith.constant 0 : index
    %c0_329 = arith.constant 0 : index
    %497 = vector.load %arg8[%c0_328, %c0_329] : memref<76x512xf32, #tpu.memory_space<vmem>>, vector<76x512xf32>
    %cst = arith.constant dense<0.000000e+00> : vector<8x512xf32>
    %498 = tpu.matmul %496, %497, %cst {dimension_numbers = #tpu.dot_dimension_numbers<[1], [0], [0], [1], [0, 0, 1, 1], [], []>} : vector<8x76xf32>, vector<76x512xf32>, vector<8x512xf32> -> vector<8x512xf32>
    %c0_330 = arith.constant 0 : index
    %c0_331 = arith.constant 0 : index
    %499 = vector.load %arg4[%c0_330, %c0_331] : memref<8x1xf32, #tpu.memory_space<vmem>>, vector<8x1xf32>
    %500 = vector.broadcast %499 : vector<8x1xf32> to vector<8x512xf32>
    %501 = arith.addf %498, %500 : vector<8x512xf32>
    %502 = arith.truncf %501 : vector<8x512xf32> to vector<8x512xbf16>
    %c0_332 = arith.constant 0 : index
    %c0_333 = arith.constant 0 : index
    %c0_334 = arith.constant 0 : index
    %c0_335 = arith.constant 0 : index
    %503 = vector.load %arg6[%c0_332, %c0_333, %c0_334, %c0_335] : memref<1x1x8x512xbf16, #tpu.memory_space<vmem>>, vector<1x1x8x512xbf16>
    %504 = vector.shape_cast %503 : vector<1x1x8x512xbf16> to vector<8x512xbf16>
    %505 = vector.shape_cast %502 : vector<8x512xbf16> to vector<1x1x8x512xbf16>
    tpu.vector_store %arg6[%c0_332, %c0_333, %c0_334, %c0_335], %505 {strides = array<i32>} : memref<1x1x8x512xbf16, #tpu.memory_space<vmem>>, vector<1x1x8x512xbf16>,
    %cst_336 = arith.constant dense<0.000000e+00> : vector<8xf32>
    %506 = vector.multi_reduction <add>, %501, %cst_336 [1] : vector<8x512xf32> to vector<8xf32>
    %507 = vector.shape_cast %506 : vector<8xf32> to vector<8x1xf32>
    %c0_337 = arith.constant 0 : index
    %c0_338 = arith.constant 0 : index
    %c0_339 = arith.constant 0 : index
    %c0_340 = arith.constant 0 : index
    %508 = vector.load %arg7[%c0_337, %c0_338, %c0_339, %c0_340] : memref<1x1x8x2xf32, #tpu.memory_space<vmem>>, vector<1x1x8x1xf32>
    %509 = vector.shape_cast %508 : vector<1x1x8x1xf32> to vector<8x1xf32>
    %510 = vector.shape_cast %507 : vector<8x1xf32> to vector<1x1x8x1xf32>
    tpu.vector_store %arg7[%c0_337, %c0_338, %c0_339, %c0_340], %510 {strides = array<i32>} : memref<1x1x8x2xf32, #tpu.memory_space<vmem>>, vector<1x1x8x1xf32>,
    %511 = arith.mulf %501, %501 : vector<8x512xf32>
    %cst_341 = arith.constant dense<0.000000e+00> : vector<8xf32>
    %512 = vector.multi_reduction <add>, %511, %cst_341 [1] : vector<8x512xf32> to vector<8xf32>
    %513 = vector.shape_cast %512 : vector<8xf32> to vector<8x1xf32>
    %c0_342 = arith.constant 0 : index
    %c0_343 = arith.constant 0 : index
    %c0_344 = arith.constant 0 : index
    %c1_345 = arith.constant 1 : index
    %514 = vector.load %arg7[%c0_342, %c0_343, %c0_344, %c1_345] : memref<1x1x8x2xf32, #tpu.memory_space<vmem>>, vector<1x1x8x1xf32>
    %515 = vector.shape_cast %514 : vector<1x1x8x1xf32> to vector<8x1xf32>
    %516 = vector.shape_cast %513 : vector<8x1xf32> to vector<1x1x8x1xf32>
    tpu.vector_store %arg7[%c0_342, %c0_343, %c0_344, %c1_345], %516 {strides = array<i32>} : memref<1x1x8x2xf32, #tpu.memory_space<vmem>>, vector<1x1x8x1xf32>,
    return
  }
  func.func @transform_0(%arg0: i32, %arg1: i32) -> (i32, i32, i32, i32, i32) {
    %c0_i32 = arith.constant 0 : i32
    %c0_i32_0 = arith.constant 0 : i32
    %c0_i32_1 = arith.constant 0 : i32
    %c0_i32_2 = arith.constant 0 : i32
    return %arg0, %arg1, %c0_i32, %c0_i32_0, %c0_i32_1 : i32, i32, i32, i32, i32
  }
  func.func @transform_1(%arg0: i32, %arg1: i32) -> (i32, i32) {
    %c0_i32 = arith.constant 0 : i32
    %c0_i32_0 = arith.constant 0 : i32
    %c0_i32_1 = arith.constant 0 : i32
    return %c0_i32, %c0_i32_0 : i32, i32
  }
  func.func @transform_2(%arg0: i32, %arg1: i32) -> (i32, i32) {
    %c0_i32 = arith.constant 0 : i32
    %c0_i32_0 = arith.constant 0 : i32
    %c0_i32_1 = arith.constant 0 : i32
    return %c0_i32, %c0_i32_0 : i32, i32
  }
  func.func @transform_3(%arg0: i32, %arg1: i32) -> (i32, i32) {
    %c0_i32 = arith.constant 0 : i32
    %c0_i32_0 = arith.constant 0 : i32
    %c0_i32_1 = arith.constant 0 : i32
    return %c0_i32, %c0_i32_0 : i32, i32
  }
  func.func @transform_4(%arg0: i32, %arg1: i32) -> (i32, i32, i32, i32) {
    %c0_i32 = arith.constant 0 : i32
    %c0_i32_0 = arith.constant 0 : i32
    %c0_i32_1 = arith.constant 0 : i32
    return %arg0, %arg1, %c0_i32, %c0_i32_0 : i32, i32, i32, i32
  }
  func.func @transform_5(%arg0: i32, %arg1: i32) -> (i32, i32, i32, i32) {
    %c0_i32 = arith.constant 0 : i32
    %c0_i32_0 = arith.constant 0 : i32
    %c0_i32_1 = arith.constant 0 : i32
    return %arg0, %arg1, %c0_i32, %c0_i32_0 : i32, i32, i32, i32
  }
}

module attributes {stable_mosaic.version = 11 : i64} {
  func.func @_bn_relu_kernel(%arg0: i32, %arg1: i32, %arg2: memref<1x1x8x512xbf16, #tpu.memory_space<vmem>>, %arg3: memref<8x1xf32, #tpu.memory_space<vmem>>, %arg4: memref<8x1xf32, #tpu.memory_space<vmem>>, %arg5: memref<1x6x512xf32, #tpu.memory_space<vmem>>) attributes {dimension_semantics = [#tpu.dimension_semantics<parallel>, #tpu.dimension_semantics<parallel>], iteration_bounds = array<i64: 2, 1>, scalar_prefetch = 0 : i64, scratch_operands = 0 : i64, tpu.core_type = #tpu.core_type<tc>, window_params = [{transform_indices = @transform_0, window_bounds = array<i64: 1, 1, 8, 512>}, {pipeline_mode = #tpu.pipeline_mode<synchronous>, transform_indices = @transform_1, window_bounds = array<i64: 8, 1>}, {pipeline_mode = #tpu.pipeline_mode<synchronous>, transform_indices = @transform_2, window_bounds = array<i64: 8, 1>}, {transform_indices = @transform_3, window_bounds = array<i64: 1, 6, 512>}]} {
    %c0 = arith.constant 0 : index
    %c0_0 = arith.constant 0 : index
    %c0_1 = arith.constant 0 : index
    %c0_2 = arith.constant 0 : index
    %0 = vector.load %arg2[%c0, %c0_0, %c0_1, %c0_2] : memref<1x1x8x512xbf16, #tpu.memory_space<vmem>>, vector<1x1x8x512xbf16>
    %1 = vector.shape_cast %0 : vector<1x1x8x512xbf16> to vector<8x512xbf16>
    %2 = arith.extf %1 : vector<8x512xbf16> to vector<8x512xf32>
    %c0_3 = arith.constant 0 : index
    %c0_4 = arith.constant 0 : index
    %3 = vector.load %arg3[%c0_3, %c0_4] : memref<8x1xf32, #tpu.memory_space<vmem>>, vector<8x1xf32>
    %4 = vector.broadcast %3 : vector<8x1xf32> to vector<8x512xf32>
    %5 = arith.mulf %2, %4 : vector<8x512xf32>
    %c0_5 = arith.constant 0 : index
    %c0_6 = arith.constant 0 : index
    %6 = vector.load %arg4[%c0_5, %c0_6] : memref<8x1xf32, #tpu.memory_space<vmem>>, vector<8x1xf32>
    %7 = vector.broadcast %6 : vector<8x1xf32> to vector<8x512xf32>
    %8 = arith.addf %5, %7 : vector<8x512xf32>
    %9 = vector.extract_strided_slice %8 {offsets = [0, 0], sizes = [6, 512], strides = [1, 1]} : vector<8x512xf32> to vector<6x512xf32>
    %cst = arith.constant 0.000000e+00 : f32
    %10 = vector.broadcast %cst : f32 to vector<6x512xf32>
    %11 = arith.maximumf %9, %10 : vector<6x512xf32>
    %c0_7 = arith.constant 0 : index
    %c0_8 = arith.constant 0 : index
    %c0_9 = arith.constant 0 : index
    %12 = vector.load %arg5[%c0_7, %c0_8, %c0_9] : memref<1x6x512xf32, #tpu.memory_space<vmem>>, vector<1x6x512xf32>
    %13 = vector.shape_cast %12 : vector<1x6x512xf32> to vector<6x512xf32>
    %14 = vector.shape_cast %11 : vector<6x512xf32> to vector<1x6x512xf32>
    tpu.vector_store %arg5[%c0_7, %c0_8, %c0_9], %14 {strides = array<i32>} : memref<1x6x512xf32, #tpu.memory_space<vmem>>, vector<1x6x512xf32>,
    return
  }
  func.func @transform_0(%arg0: i32, %arg1: i32) -> (i32, i32, i32, i32) {
    %c0_i32 = arith.constant 0 : i32
    %c0_i32_0 = arith.constant 0 : i32
    %c0_i32_1 = arith.constant 0 : i32
    return %arg0, %arg1, %c0_i32, %c0_i32_0 : i32, i32, i32, i32
  }
  func.func @transform_1(%arg0: i32, %arg1: i32) -> (i32, i32) {
    %c0_i32 = arith.constant 0 : i32
    %c0_i32_0 = arith.constant 0 : i32
    %c0_i32_1 = arith.constant 0 : i32
    return %c0_i32, %c0_i32_0 : i32, i32
  }
  func.func @transform_2(%arg0: i32, %arg1: i32) -> (i32, i32) {
    %c0_i32 = arith.constant 0 : i32
    %c0_i32_0 = arith.constant 0 : i32
    %c0_i32_1 = arith.constant 0 : i32
    return %c0_i32, %c0_i32_0 : i32, i32
  }
  func.func @transform_3(%arg0: i32, %arg1: i32) -> (i32, i32, i32) {
    %c0_i32 = arith.constant 0 : i32
    %c0_i32_0 = arith.constant 0 : i32
    return %arg0, %c0_i32, %arg1 : i32, i32, i32
  }
}

</mosaic_0001>

<bundles_post_ra>
// kernel: e2e3d_forward.3
= control target key start
LH: loop header
LB: loop body
LE: loop exit
PB: predicated region body
PF: predicated region fallthrough
CT: control target
= control target key end

     0   :  { %s416_s12 = smov 0   ;;  %s418_s13 = smov 0   ;;  %s455_s0 = inlined_call_operand.vmem [shape: bf16[2,1,8,512], index: 0, kind: input, shape index: {}]   ;;  %s456_s1 = inlined_call_operand.vmem [shape: f32[8,1], index: 1, kind: input, shape index: {}]   ;;  %s457_s2 = inlined_call_operand.vmem [shape: f32[8,1], index: 2, kind: input, shape index: {}]   ;;  %s458_s3 = inlined_call_operand.vmem [shape: f32[2,6,512], index: 3, kind: output, shape index: {}]  }
   0x1   :  { %s420_s14 = smov 0  }
   0x2 LB: > { %s25_s15 = sadd.s32 1, %s389_s13  ;;  %p336_p0 = scmp.ge.s32.totalorder %s393_s14, 1  ;;  %s393_s14 = sphi %s420_s14, %s13_s14   ;;  %s389_s13 = sphi %s418_s13, %s460_s13   ;;  %s385_s12 = sphi %s416_s12, %s459_s12  }
   0x3   : > { %p27_p1 = scmp.ge.s32.totalorder %s25_s15, 2  ;;  %p157_p2 = scmp.lt.s32.totalorder %s393_s14, 3 }
   0x5   : > { %s462_s15 = smov (%p27_p1, %s25_s15), 0  ;;  %p158_p3 = pnand %p336_p0, %p157_p2 }
   0x6   : > { %p189_p4 = scmp.lt.s32.totalorder (!%p158_p3), %s385_s12, 1 }
   0x7   : > { %161 = sbr.rel (%p158_p3) target bundleno = 148 (0x94), region = 32 }
   0xc   : > { %v214_v0 = vld [vmem:[%s456_s1] sm:$0xff]  ;;  %v395_v1 = vmov 0   ;;  %s464_s12 = smov (!%p189_p4, %s385_s12), 1 }
   0xd   : > { %370 = vset.pattern.permute.xlu0 %v395_v1  ;;  %v224_v2 = vld [vmem:[%s457_s2] sm:$0xff]  ;;  %s343_s20 = sshll.u32 %s464_s12, 4  ;;  %s344_s24 = sshll.u32 %s464_s12, 5 }
   0xe   : > { %217 = vperm.xlu0 %370, %v214_v0   ;;  %s197_s23 = scalar_lea.vmem %s455_s0, %s343_s20  ;;  %s206_s27 = scalar_lea.vmem %s458_s3, %s344_s24 }
   0xf   : > { %v208_v3 = vld [vmem:[%s197_s23] sm:$0xff]  ;;  %v209_v4 = vld [vmem:[%s197_s23 + $0x8] sm:$0xff] }
  0x10   : > { %v210_v5 = vunpack.c.l.bf16 %v208_v3  ;;  %v211_v6 = vunpack.c.h.bf16 %v208_v3  ;;  %v212_v7 = vunpack.c.l.bf16 %v209_v4  ;;  %v213_v8 = vunpack.c.h.bf16 %v209_v4 }
  0x12   : > { %227 = vperm.xlu0 %370, %v224_v2  }
  0x89   : > { %v218_v9 = vpop.permute.xlu0 %217 }
  0x8a   : > { %v220_v10 = vmul.f32 %v218_v9, %v210_v5  ;;  %v221_v11 = vmul.f32 %v218_v9, %v211_v6  ;;  %v222_v12 = vmul.f32 %v218_v9, %v212_v7  ;;  %v223_v13 = vmul.f32 %v218_v9, %v213_v8 }
  0x8d   : > { %v228_v14 = vpop.permute.xlu0 %227 }
  0x8e   : > { %v230_v15 = vadd.f32 %v228_v14, %v220_v10  ;;  %v231_v16 = vadd.f32 %v228_v14, %v221_v11  ;;  %v232_v17 = vadd.f32 %v228_v14, %v222_v12  ;;  %v233_v18 = vadd.f32 %v228_v14, %v223_v13 }
  0x90   : > { %v234_v19 = vmax.f32 %v230_v15, 0.0  ;;  %v235_v20 = vmax.f32 %v231_v16, 0.0  ;;  %v236_v21 = vmax.f32 %v232_v17, 0.0  ;;  %v237_v22 = vmax.f32 %v233_v18, 0.0 }
  0x92   : > { %238 = vst [vmem:[%s206_s27] sm:$0x3f] %v234_v19  ;;  %239 = vst [vmem:[%s206_s27 + $0x8] sm:$0x3f] %v235_v20 }
  0x93   : > { %240 = vst [vmem:[%s206_s27 + $0x10] sm:$0x3f] %v236_v21  ;;  %241 = vst [vmem:[%s206_s27 + $0x18] sm:$0x3f] %v237_v22 }
  0x94 PF: > { %s13_s14 = sadd.s32 1, %s393_s14   ;;  %s459_s12 = smov %s389_s13 }
  0x95   : > { %p10_p5 = scmp.ge.s32.totalorder %s13_s14, 4   ;;  %s460_s13 = smov %s462_s15 }
  0x97   :  { %12 = sbr.rel (!%p10_p5) target bundleno = 2 (0x2), region = 62 }

// kernel: e2e3d_forward.2
= control target key start
LH: loop header
LB: loop body
LE: loop exit
PB: predicated region body
PF: predicated region fallthrough
CT: control target
= control target key end

     0   :  { %s1681_s18 = smov 0   ;;  %s1683_s19 = smov 0   ;;  %s2255_s0 = inlined_call_operand.vmem [shape: bf16[2,1,10,4,82], index: 0, kind: input, shape index: {}]   ;;  %s2256_s1 = inlined_call_operand.vmem [shape: f32[8,76], index: 1, kind: input, shape index: {}]   ;;  %s2257_s2 = inlined_call_operand.vmem [shape: f32[8,1], index: 2, kind: input, shape index: {}]   ;;  %s2258_s3 = inlined_call_operand.vmem [shape: f32[2,64], index: 3, kind: input, shape index: {}]   ;;  %s2259_s4 = inlined_call_operand.vmem [shape: bf16[2,1,8,512], index: 4, kind: output, shape index: {0}]   ;;  %s2260_s5 = inlined_call_operand.vmem [shape: f32[2,1,8,2], index: 5, kind: output, shape index: {1}]  }
   0x1   :  { %s1685_s20 = smov 0  }
   0x2 LB: > { %s28_s21 = sadd.s32 1, %s1621_s19  ;;  %p1403_p0 = scmp.ge.s32.totalorder %s1625_s20, 1  ;;  %s1625_s20 = sphi %s1685_s20, %s16_s20   ;;  %s1621_s19 = sphi %s1683_s19, %s2262_s19   ;;  %s1617_s18 = sphi %s1681_s18, %s2261_s18  }
   0x3   : > { %p30_p1 = scmp.ge.s32.totalorder %s28_s21, 2  ;;  %p212_p2 = scmp.lt.s32.totalorder %s1625_s20, 3 }
   0x5   : > { %s2264_s21 = smov (%p30_p1, %s28_s21), 0  ;;  %p213_p3 = pnand %p1403_p0, %p212_p2 }
   0x6   : > { %s1627_s24 = smov (!%p213_p3), 10   ;;  %s1628_s27 = smov (!%p213_p3), 18  }
   0x7   : > { %216 = sbr.rel (%p213_p3) target bundleno = 754 (0x2f2), region = 36  ;;  %p255_p4 = scmp.lt.s32.totalorder (!%p213_p3), %s1617_s18, 1 }
   0x8   : > { %s1629_s28 = smov (!%p213_p3), 8   ;;  %s1630_s29 = smov (!%p213_p3), 16  }
   0x9   : > { %s1631_s9 = smov (!%p213_p3), 2   ;;  %s1632_s10 = smov (!%p213_p3), 111  }
   0xa   : > { %s1633_s11 = smov (!%p213_p3), 47   ;;  %s1634_s12 = smov (!%p213_p3), 119  }
   0xb   : > { %s1635_s13 = smov (!%p213_p3), 127   ;;  %s1636_s14 = smov (!%p213_p3), 55  }
   0xc   : > { %v1418_v0 = vld [vmem:[%s2258_s3 + $0x1] ss:$0 sm:$0xff]  ;;  %v1705_v1 = vld [vmem:[%s2258_s3] ss:$0 sm:$0xff]  ;;  %s2266_s18 = smov (!%p255_p4, %s1617_s18), 1  ;;  %s1637_s15 = smov 63  }
   0xd   : > { %456 = vrot.lane.b32.xlu0 %v1418_v0, %s1627_s24  ;;  %886 = vrot.lane.b32.xlu1 %v1418_v0, %s1628_s27  ;;  %s1432_s30 = smul.u32 20, %s2266_s18  ;;  %s1638_s16 = smov 54   ;;  %vm315_vm0 = vcmask 519168   ;;  %vm321_vm1 = vcmask 1043968   ;;  %vm1075_vm2 = vcmask 1043456   ;;  %vm367_vm3 = vcmask 523268  }
   0xe   : > { %s1639_s17 = smov 118   ;;  %s1640_s22 = smov 120   ;;  %vm375_vm4 = vcmask 1048068   ;;  %vm1071_vm5 = vcmask 621568   ;;  %vm1253_vm6 = vcmask 7168   ;;  %vm1264_vm7 = vcmask 15368  }
   0xf   : > { %s1715_s8 = scalar_lea.vmem %s2255_s0, %s1432_s30  ;;  %s1641_s23 = smov 56  }
  0x10   : > { %v1409_v2 = vld [vmem:[%s1715_s8 + $0x4] sm:$0x3]  ;;  %v1411_v3 = vld [vmem:[%s1715_s8 + $0x8] sm:$0x3]  ;;  %v1410_v4 = vld [vmem:[%s1715_s8 + $0x6] sm:$0x3] }
  0x11   : > { %358 = vrot.lane.b32.xlu0 %v1705_v1, %s1629_s28  ;;  %795 = vrot.lane.b32.xlu1 %v1705_v1, %s1630_s29  ;;  %v1720_v5 = vunpack.c.l.bf16 %v1409_v2  ;;  %v1722_v6 = vunpack.c.l.bf16 %v1411_v3  ;;  %v1412_v7 = vld [vmem:[%s1715_s8 + $0xa] sm:$0x3]  ;;  %v1725_v8 = vunpack.c.l.bf16 %v1410_v4  ;;  %v1413_v12 = vld [vmem:[%s1715_s8 + $0xc] sm:$0x3]  ;;  %s1642_s24 = smov 110   ;;  %s1643_s25 = smov 46  }
  0x12   : > { %v1727_v9 = vunpack.c.l.bf16 %v1412_v7  ;;  %v1415_v13 = vld [vmem:[%s1715_s8 + $0x10] sm:$0x3]  ;;  %v1742_v14 = vunpack.c.l.bf16 %v1413_v12  ;;  %v1414_v16 = vld [vmem:[%s1715_s8 + $0xe] sm:$0x3]  ;;  %v1416_v17 = vld [vmem:[%s1715_s8 + $0x12] sm:$0x3] }
  0x13   : > { %v1731_v10 = vpack.i.bf16 %v1720_v5, %v1722_v6  ;;  %v1744_v15 = vunpack.c.l.bf16 %v1415_v13  ;;  %v1755_v19 = vunpack.c.l.bf16 %v1414_v16  ;;  %v1757_v20 = vunpack.c.l.bf16 %v1416_v17  ;;  %v1408_v21 = vld [vmem:[%s1715_s8 + $0x2] sm:$0x3]  ;;  %s1644_s26 = smov 112   ;;  %s1645_s27 = smov 48  }
  0x14   : > { %v1486_v11 = vpack.i.bf16 %v1725_v8, %v1727_v9  ;;  %v1761_v22 = vunpack.c.l.bf16 %v1408_v21  ;;  %v731_v25 = vcombine.low %v1725_v8, %v1725_v8  ;;  %v726_v29 = vcombine.low %v1720_v5, %v1720_v5  ;;  %s1646_s28 = smov 62   ;;  %s1647_s29 = smov 126  }
  0x15   : > { %628 = vrot.lane.b32.xlu0 %v1418_v0, %s1631_s9  ;;  %1482 = vrot.lane.b32.xlu1 %v1731_v10, %s1632_s10  ;;  %v1753_v18 = vpack.i.bf16 %v1742_v14, %v1744_v15  ;;  %v1516_v23 = vpack.i.bf16 %v1755_v19, %v1757_v20  ;;  %v1788_v28 = vpack.i.bf16 %v1727_v9, %v1755_v19  ;;  %s1648_s30 = smov 64  }
  0x16   : > { %v721_v24 = vcombine.low %v1761_v22, %v1761_v22  ;;  %v1521_v26 = vpack.i.bf16 %v1761_v22, %v1725_v8  ;;  %v736_v30 = vcombine.low %v1722_v6, %v1722_v6 }
  0x18   : > { %v1551_v27 = vpack.i.bf16 %v721_v24, %v731_v25  ;;  %v1561_v31 = vpack.i.bf16 %v726_v29, %v736_v30 }
  0x19   : > { %1487 = vrot.lane.b32.xlu0 %v1486_v11, %s1633_s11  ;;  %1492 = vrot.lane.b32.xlu1 %v1731_v10, %s1634_s12 }
  0x1d   : > { %1502 = vrot.lane.b32.xlu0 %v1731_v10, %s1635_s13  ;;  %1497 = vrot.lane.b32.xlu1 %v1486_v11, %s1636_s14 }
  0x21   : > { %1512 = vrot.lane.b32.xlu0 %v1486_v11, %s1637_s15  ;;  %1507 = vrot.lane.b32.xlu1 %v1753_v18, %s1632_s10 }
  0x25   : > { %1532 = vrot.lane.b32.xlu0 %v1731_v10, %s1633_s11  ;;  %1517 = vrot.lane.b32.xlu1 %v1516_v23, %s1633_s11 }
  0x29   : > { %1547 = vrot.lane.b32.xlu0 %v1516_v23, %s1637_s15  ;;  %1522 = vrot.lane.b32.xlu1 %v1521_v26, %s1632_s10 }
  0x2d   : > { %1552 = vrot.lane.b32.xlu0 %v1551_v27, %s1634_s12  ;;  %1527 = vrot.lane.b32.xlu1 %v1753_v18, %s1634_s12 }
  0x31   : > { %1567 = vrot.lane.b32.xlu0 %v1753_v18, %s1633_s11  ;;  %1537 = vrot.lane.b32.xlu1 %v1516_v23, %s1636_s14 }
  0x35   : > { %1542 = vrot.lane.b32.xlu1 %v1753_v18, %s1635_s13 }
  0x39   : > { %1557 = vrot.lane.b32.xlu1 %v1788_v28, %s1632_s10 }
  0x3d   : > { %1562 = vrot.lane.b32.xlu1 %v1561_v31, %s1636_s14 }
  0x41   : > { %1572 = vrot.lane.b32.xlu1 %v1521_v26, %s1635_s13 }
  0x7f   : > { %v1798_v32 = vpop.permute.xlu0 %456  ;;  %v1819_v38 = vpop.permute.xlu1 %886 }
  0x80   : > { %v487_v33 = vmul.f32 %v1798_v32, %v1722_v6  ;;  %v1804_v34 = vmul.f32 %v1798_v32, %v1725_v8  ;;  %v1817_v37 = vmul.f32 %v1798_v32, %v1761_v22  ;;  %v473_v40 = vmul.f32 %v1798_v32, %v1720_v5 }
  0x81   : > { %v1840_v43 = vmul.f32 %v1798_v32, %v1755_v19  ;;  %v1860_v52 = vmul.f32 %v1798_v32, %v1727_v9  ;;  %v1909_v27 = vmul.f32 %v1798_v32, %v1742_v14 }
  0x82   : > { %773 = vrot.lane.b32.xlu1 %v487_v33, %s1638_s16  ;;  %769 = vrot.lane.b32.xlu0 %v1804_v34, %s1639_s17  ;;  %v489_v50 = vcombine.low %v487_v33, %v487_v33  ;;  %v475_v60 = vcombine.low %v473_v40, %v473_v40  ;;  %v482_v7 = vcombine.low %v1804_v34, %v1804_v34 }
  0x83   : > { %v1809_v35 = vpop.permute.xlu0 %358  ;;  %v1831_v41 = vpop.permute.xlu1 %795  ;;  %v496_v61 = vcombine.low %v1860_v52, %v1860_v52  ;;  %v903_v34 = vmul.f32 %v1819_v38, %v1725_v8 }
  0x84   : > { %v1813_v36 = vmul.f32 %v1809_v35, %v1725_v8  ;;  %v1827_v39 = vmul.f32 %v1809_v35, %v1722_v6  ;;  %v1844_v44 = vmul.f32 %v1809_v35, %v1761_v22  ;;  %v1856_v51 = vmul.f32 %v1809_v35, %v1720_v5 }
  0x85   : > { %v1891_v12 = vmul.f32 %v1809_v35, %v1727_v9 }
  0x86   : > { %695 = vrot.lane.b32.xlu1 %v1813_v36, %s1640_s22  ;;  %761 = vrot.lane.b32.xlu0 %v1817_v37, %s1639_s17  ;;  %v393_v11 = vcombine.low %v1827_v39, %v1827_v39  ;;  %v379_v26 = vcombine.low %v1856_v51, %v1856_v51 }
  0x87   : > { %v1833_v42 = vpop.permute.xlu0 %628  ;;  %v1483_v45 = vpop.permute.xlu1 %1482  ;;  %v400_v25 = vcombine.low %v1891_v12, %v1891_v12 }
  0x88   : > { %v1485_v46 = vunpack.i.h.bf16 %v1483_v45  ;;  %v1484_v47 = vunpack.i.l.bf16 %v1483_v45  ;;  %v503_v45 = vcombine.low %v1909_v27, %v1909_v27 }
  0x8a   : > { %765 = vrot.lane.b32.xlu1 %v473_v40, %s1638_s16  ;;  %699 = vrot.lane.b32.xlu0 %v1827_v39, %s1641_s23  ;;  %526 = vst.msk [vmem:[#allocation2 + $0x48] sm:$0xf] %vm315_vm0, %v1485_v46  ;;  %1010 = vst.msk [vmem:[#allocation2 + $0x120] sm:$0xf] %vm315_vm0, %v1485_v46  ;;  %v889_v39 = vmul.f32 %v1819_v38, %v1761_v22  ;;  %v386_v40 = vcombine.low %v1813_v36, %v1813_v36 }
  0x8b   : > { %v1488_v48 = vpop.permute.xlu0 %1487  ;;  %534 = vst.msk [vmem:[#allocation2 + $0x50] sm:$0xf] %vm315_vm0, %v1484_v47  ;;  %1012 = vst.msk [vmem:[#allocation2 + $0x128] sm:$0xf] %vm315_vm0, %v1484_v47  ;;  %v1493_v53 = vpop.permute.xlu1 %1492  ;;  %v1933_v36 = vmul.f32 %v1798_v32, %v1744_v15 }
  0x8c   : > { %v1490_v49 = vunpack.i.h.bf16 %v1488_v48  ;;  %v1489_v54 = vunpack.i.l.bf16 %v1488_v48  ;;  %v1495_v55 = vunpack.i.h.bf16 %v1493_v53  ;;  %v1494_v56 = vunpack.i.l.bf16 %v1493_v53 }
  0x8d   : > { %v905_v53 = vcombine.low %v903_v34, %v903_v34 }
  0x8e   : > { %785 = vrot.lane.b32.xlu0 %v1840_v43, %s1639_s17  ;;  %687 = vrot.lane.b32.xlu1 %v1844_v44, %s1640_s22  ;;  %530 = vst.msk [vmem:[#allocation2 + $0x48] sm:$0xf] %vm321_vm1, %v1490_v49  ;;  %1011 = vst.msk [vmem:[#allocation2 + $0x120] sm:$0xf] %vm321_vm1, %v1490_v49 }
  0x8f   : > { %v1503_v57 = vpop.permute.xlu0 %1502  ;;  %538 = vst.msk [vmem:[#allocation2 + $0x50] sm:$0xf] %vm321_vm1, %v1489_v54  ;;  %1013 = vst.msk [vmem:[#allocation2 + $0x128] sm:$0xf] %vm321_vm1, %v1489_v54  ;;  %v1498_v62 = vpop.permute.xlu1 %1497  ;;  %v891_v54 = vcombine.low %v889_v39, %v889_v39 }
  0x90   : > { %v1505_v58 = vunpack.i.h.bf16 %v1503_v57  ;;  %430 = vst.msk [vmem:[#allocation2 + $0x28] sm:$0xf] %vm315_vm0, %v1495_v55  ;;  %978 = vst.msk [vmem:[#allocation2 + $0x100] sm:$0xf] %vm315_vm0, %v1495_v55  ;;  %v1504_v59 = vunpack.i.l.bf16 %v1503_v57  ;;  %v1500_v63 = vunpack.i.h.bf16 %v1498_v62  ;;  %v1499_v0 = vunpack.i.l.bf16 %v1498_v62 }
  0x91   : > { %438 = vst.msk [vmem:[#allocation2 + $0x30] sm:$0xf] %vm315_vm0, %v1494_v56  ;;  %980 = vst.msk [vmem:[#allocation2 + $0x108] sm:$0xf] %vm315_vm0, %v1494_v56 }
  0x92   : > { %490 = vrot.lane.b32.xlu0 %v489_v50, %s1639_s17  ;;  %691 = vrot.lane.b32.xlu1 %v1856_v51, %s1641_s23  ;;  %327 = vst.msk [vmem:[#allocation2 + $0x8] sm:$0xf] %vm315_vm0, %v1505_v58  ;;  %945 = vst.msk [vmem:[#allocation2 + $0xe0] sm:$0xf] %vm315_vm0, %v1505_v58 }
  0x93   : > { %337 = vst.msk [vmem:[#allocation2 + $0x10] sm:$0xf] %vm315_vm0, %v1504_v59  ;;  %947 = vst.msk [vmem:[#allocation2 + $0xe8] sm:$0xf] %vm315_vm0, %v1504_v59  ;;  %v1513_v2 = vpop.permute.xlu0 %1512  ;;  %v1508_v13 = vpop.permute.xlu1 %1507 }
  0x94   : > { %v1515_v3 = vunpack.i.h.bf16 %v1513_v2  ;;  %v1514_v4 = vunpack.i.l.bf16 %v1513_v2  ;;  %434 = vst.msk [vmem:[#allocation2 + $0x28] sm:$0xf] %vm321_vm1, %v1500_v63  ;;  %442 = vst.msk [vmem:[#allocation2 + $0x30] sm:$0xf] %vm321_vm1, %v1499_v0  ;;  %v1510_v16 = vunpack.i.h.bf16 %v1508_v13  ;;  %v1509_v17 = vunpack.i.l.bf16 %v1508_v13 }
  0x95   : > { %979 = vst.msk [vmem:[#allocation2 + $0x100] sm:$0xf] %vm321_vm1, %v1500_v63  ;;  %981 = vst.msk [vmem:[#allocation2 + $0x108] sm:$0xf] %vm321_vm1, %v1499_v0  ;;  %v1061_v23 = vld [vmem:[#allocation2 + $0x120] sm:$0xf]  ;;  %v998_v63 = vcombine.low %v1933_v36, %v1933_v36  ;;  %v510_v0 = vcombine.low %v1840_v43, %v1840_v43  ;;  %v910_v2 = vmul.f32 %v1819_v38, %v1722_v6 }
  0x96   : > { %476 = vrot.lane.b32.xlu0 %v475_v60, %s1639_s17  ;;  %497 = vrot.lane.b32.xlu1 %v496_v61, %s1638_s16  ;;  %332 = vst.msk [vmem:[#allocation2 + $0x8] sm:$0xf] %vm321_vm1, %v1515_v3  ;;  %342 = vst.msk [vmem:[#allocation2 + $0x10] sm:$0xf] %vm321_vm1, %v1514_v4  ;;  %v1062_v21 = vld [vmem:[#allocation2 + $0x128] sm:$0xf]  ;;  %v812_v60 = vmul.f32 %v1831_v41, %v1725_v8  ;;  %v1003_v13 = vmul.f32 %v1798_v32, %v1757_v20 }
  0x97   : > { %946 = vst.msk [vmem:[#allocation2 + $0xe0] sm:$0xf] %vm321_vm1, %v1515_v3  ;;  %948 = vst.msk [vmem:[#allocation2 + $0xe8] sm:$0xf] %vm321_vm1, %v1514_v4  ;;  %v1533_v24 = vpop.permute.xlu0 %1532  ;;  %1419 = vmatprep.subr.msk.mxu0 %vm1075_vm2, %v1062_v21  ;;  %v1518_v29 = vpop.permute.xlu1 %1517  ;;  %v912_v43 = vcombine.low %v910_v2, %v910_v2 }
  0x98   : > { %542 = vst.msk [vmem:[#allocation2 + $0x58] sm:$0xf] %vm315_vm0, %v1510_v16  ;;  %1014 = vst.msk [vmem:[#allocation2 + $0x130] sm:$0xf] %vm315_vm0, %v1510_v16  ;;  %1420 = vmatpush1.msk.msra.mxu0 %vm1075_vm2, %v1061_v23  ;;  %v1520_v30 = vunpack.i.h.bf16 %v1518_v29  ;;  %v1519_v31 = vunpack.i.l.bf16 %v1518_v29  ;;  %v1535_v47 = vunpack.i.h.bf16 %v1533_v24  ;;  %v1534_v48 = vunpack.i.l.bf16 %v1533_v24 }
  0x99   : > { %1019 = vst.msk [vmem:[#allocation2 + $0x138] sm:$0xf] %vm315_vm0, %v1509_v17  ;;  %v1963_v16 = vmul.f32 %v1809_v35, %v1742_v14  ;;  %v819_v29 = vmul.f32 %v1831_v41, %v1722_v6 }
  0x9a   : > { %483 = vrot.lane.b32.xlu0 %v482_v7, %s1638_s16  ;;  %394 = vrot.lane.b32.xlu1 %v393_v11, %s1640_s22  ;;  %546 = vst.msk [vmem:[#allocation2 + $0x58] sm:$0xf] %vm321_vm1, %v1520_v30  ;;  %1015 = vst.msk [vmem:[#allocation2 + $0x130] sm:$0xf] %vm321_vm1, %v1520_v30  ;;  %v814_v11 = vcombine.low %v812_v60, %v812_v60  ;;  %v896_v30 = vmul.f32 %v1819_v38, %v1720_v5 }
  0x9b   : > { %v1912_v33 = vpop.permute.xlu0 %1547  ;;  %1023 = vst.msk [vmem:[#allocation2 + $0x138] sm:$0xf] %vm321_vm1, %v1519_v31  ;;  %v1523_v46 = vpop.permute.xlu1 %1522  ;;  %v1005_v31 = vcombine.low %v1003_v13, %v1003_v13  ;;  %v931_v13 = vmul.f32 %v1819_v38, %v1755_v19 }
  0x9c   : > { %v1525_v49 = vunpack.i.h.bf16 %v1523_v46  ;;  %v1524_v50 = vunpack.i.l.bf16 %v1523_v46  ;;  %v1550_v21 = vunpack.i.h.bf16 %v1912_v33  ;;  %v1549_v23 = vunpack.i.l.bf16 %v1912_v33 }
  0x9d   : > { %v407_v33 = vcombine.low %v1963_v16, %v1963_v16 }
  0x9e   : > { %401 = vrot.lane.b32.xlu0 %v400_v25, %s1641_s23  ;;  %380 = vrot.lane.b32.xlu1 %v379_v26, %s1640_s22  ;;  %857 = vst.msk [vmem:[#allocation2 + $0xc0] sm:$0xf] %vm315_vm0, %v1525_v49  ;;  %865 = vst.msk [vmem:[#allocation2 + $0xc8] sm:$0xf] %vm315_vm0, %v1524_v50  ;;  %v1987_v49 = vmul.f32 %v1809_v35, %v1744_v15  ;;  %v971_v50 = vmul.f32 %v1809_v35, %v1757_v20 }
  0x9f   : > { %v1553_v51 = vpop.permute.xlu0 %1552  ;;  %v1528_v57 = vpop.permute.xlu1 %1527  ;;  %861 = vst.msk [vmem:[#allocation2 + $0xc0] sm:$0xf] %vm321_vm1, %v1535_v47  ;;  %869 = vst.msk [vmem:[#allocation2 + $0xc8] sm:$0xf] %vm321_vm1, %v1534_v48  ;;  %v821_v47 = vcombine.low %v819_v29, %v819_v29  ;;  %v898_v48 = vcombine.low %v896_v30, %v896_v30  ;;  %v924_v29 = vmul.f32 %v1819_v38, %v1742_v14 }
  0xa0   : > { %v1555_v55 = vunpack.i.h.bf16 %v1553_v51  ;;  %v1554_v56 = vunpack.i.l.bf16 %v1553_v51  ;;  %v1530_v58 = vunpack.i.h.bf16 %v1528_v57  ;;  %v1529_v59 = vunpack.i.l.bf16 %v1528_v57 }
  0xa1   : > { %v1063_v62 = vld [vmem:[#allocation2 + $0x130] sm:$0xf]  ;;  %v966_v20 = vcombine.low %v1987_v49, %v1987_v49  ;;  %v917_v57 = vmul.f32 %v1819_v38, %v1727_v9  ;;  %v926_v30 = vcombine.low %v924_v29, %v924_v29 }
  0xa2   : > { %387 = vrot.lane.b32.xlu0 %v386_v40, %s1641_s23  ;;  %504 = vrot.lane.b32.xlu1 %v503_v45, %s1639_s17  ;;  %725 = vst.msk [vmem:[#allocation2 + $0x80] sm:$0xf0] %vm367_vm3, %v1555_v55  ;;  %735 = vst.msk [vmem:[#allocation2 + $0x88] sm:$0xf0] %vm367_vm3, %v1554_v56  ;;  %v1064_v61 = vld [vmem:[#allocation2 + $0x138] sm:$0xf]  ;;  %v798_v55 = vmul.f32 %v1831_v41, %v1761_v22  ;;  %v973_v56 = vcombine.low %v971_v50, %v971_v50 }
  0xa3   : > { %446 = vst.msk [vmem:[#allocation2 + $0x38] sm:$0xf] %vm315_vm0, %v1530_v58  ;;  %982 = vst.msk [vmem:[#allocation2 + $0x110] sm:$0xf] %vm315_vm0, %v1530_v58  ;;  %1422 = vmatprep.subr.msk.mxu1 %vm1075_vm2, %v1064_v61  ;;  %v1538_v3 = vpop.permute.xlu1 %1537  ;;  %v1568_v26 = vpop.permute.xlu0 %1567 }
  0xa4   : > { %987 = vst.msk [vmem:[#allocation2 + $0x118] sm:$0xf] %vm315_vm0, %v1529_v59  ;;  %1423 = vmatpush1.msk.msra.mxu1 %vm1075_vm2, %v1063_v62  ;;  %v1540_v4 = vunpack.i.h.bf16 %v1538_v3  ;;  %v1539_v7 = vunpack.i.l.bf16 %v1538_v3  ;;  %v1570_v39 = vunpack.i.h.bf16 %v1568_v26  ;;  %v1569_v40 = vunpack.i.l.bf16 %v1568_v26 }
  0xa5   : > { %v800_v61 = vcombine.low %v798_v55, %v798_v55  ;;  %v919_v62 = vcombine.low %v917_v57, %v917_v57 }
  0xa6   : > { %906 = vrot.lane.b32.xlu0 %v905_v53, %s1642_s24  ;;  %892 = vrot.lane.b32.xlu1 %v891_v54, %s1642_s24  ;;  %450 = vst.msk [vmem:[#allocation2 + $0x38] sm:$0xf] %vm321_vm1, %v1540_v4  ;;  %983 = vst.msk [vmem:[#allocation2 + $0x110] sm:$0xf] %vm321_vm1, %v1540_v4  ;;  %v805_v4 = vmul.f32 %v1831_v41, %v1720_v5 }
  0xa7   : > { %991 = vst.msk [vmem:[#allocation2 + $0x118] sm:$0xf] %vm321_vm1, %v1539_v7  ;;  %v1543_v17 = vpop.permute.xlu1 %1542  ;;  %v652_v7 = vmul.f32 %v1833_v42, %v1722_v6 }
  0xa8   : > { %v1545_v24 = vunpack.i.h.bf16 %v1543_v17  ;;  %v1544_v25 = vunpack.i.l.bf16 %v1543_v17  ;;  %v933_v17 = vcombine.low %v931_v13, %v931_v13 }
  0xaa   : > { %999 = vrot.lane.b32.xlu0 %v998_v63, %s1639_s17  ;;  %511 = vrot.lane.b32.xlu1 %v510_v0, %s1638_s16  ;;  %347 = vst.msk [vmem:[#allocation2 + $0x18] sm:$0xf] %vm315_vm0, %v1545_v24  ;;  %949 = vst.msk [vmem:[#allocation2 + $0xf0] sm:$0xf] %vm315_vm0, %v1545_v24  ;;  %v412_v63 = vmul.f32 %v1809_v35, %v1755_v19  ;;  %v840_v0 = vmul.f32 %v1831_v41, %v1755_v19 }
  0xab   : > { %954 = vst.msk [vmem:[#allocation2 + $0xf8] sm:$0xf] %vm315_vm0, %v1544_v25  ;;  %v1558_v34 = vpop.permute.xlu1 %1557  ;;  %v847_v25 = vmul.f32 %v1831_v41, %v1744_v15 }
  0xac   : > { %352 = vst.msk [vmem:[#allocation2 + $0x18] sm:$0xf] %vm321_vm1, %v1550_v21  ;;  %950 = vst.msk [vmem:[#allocation2 + $0xf0] sm:$0xf] %vm321_vm1, %v1550_v21  ;;  %v1560_v45 = vunpack.i.h.bf16 %v1558_v34  ;;  %v1559_v46 = vunpack.i.l.bf16 %v1558_v34  ;;  %v414_v2 = vcombine.low %v412_v63, %v412_v63  ;;  %v842_v3 = vcombine.low %v840_v0, %v840_v0 }
  0xad   : > { %959 = vst.msk [vmem:[#allocation2 + $0xf8] sm:$0xf] %vm321_vm1, %v1549_v23  ;;  %v938_v21 = vmul.f32 %v1819_v38, %v1744_v15  ;;  %v645_v23 = vmul.f32 %v1833_v42, %v1725_v8  ;;  %v849_v26 = vcombine.low %v847_v25, %v847_v25  ;;  %v826_v34 = vmul.f32 %v1831_v41, %v1727_v9 }
  0xae   : > { %913 = vrot.lane.b32.xlu0 %v912_v43, %s1643_s25  ;;  %815 = vrot.lane.b32.xlu1 %v814_v11, %s1644_s26  ;;  %873 = vst.msk [vmem:[#allocation2 + $0xd0] sm:$0xf] %vm315_vm0, %v1560_v45  ;;  %881 = vst.msk [vmem:[#allocation2 + $0xd8] sm:$0xf] %vm315_vm0, %v1559_v46  ;;  %v807_v11 = vcombine.low %v805_v4, %v805_v4  ;;  %v654_v43 = vcombine.low %v652_v7, %v652_v7 }
  0xaf   : > { %v1563_v51 = vpop.permute.xlu1 %1562  ;;  %877 = vst.msk [vmem:[#allocation2 + $0xd0] sm:$0xf] %vm321_vm1, %v1570_v39  ;;  %885 = vst.msk [vmem:[#allocation2 + $0xd8] sm:$0xf] %vm321_vm1, %v1569_v40  ;;  %v940_v24 = vcombine.low %v938_v21, %v938_v21  ;;  %v746_v39 = vcombine.low %v1742_v14, %v1742_v14  ;;  %v756_v40 = vcombine.low %v1744_v15, %v1744_v15 }
  0xb0   : > { %v1565_v53 = vunpack.i.h.bf16 %v1563_v51  ;;  %v1564_v54 = vunpack.i.l.bf16 %v1563_v51  ;;  %v828_v45 = vcombine.low %v826_v34, %v826_v34  ;;  %v547_v46 = vmul.f32 %v1705_v1, %v1761_v22 }
  0xb1   : > { %v1586_v50 = vpack.i.bf16 %v746_v39, %v756_v40  ;;  %v552_v51 = vmul.f32 %v1705_v1, %v1720_v5  ;;  %v666_v25 = vmul.f32 %v1833_v42, %v1742_v14 }
  0xb2   : > { %1006 = vrot.lane.b32.xlu0 %v1005_v31, %s1638_s16  ;;  %408 = vrot.lane.b32.xlu1 %v407_v33, %s1640_s22  ;;  %730 = vst.msk [vmem:[#allocation2 + $0x80] sm:$0xf0] %vm375_vm4, %v1565_v53  ;;  %740 = vst.msk [vmem:[#allocation2 + $0x88] sm:$0xf0] %vm375_vm4, %v1564_v54  ;;  %v631_v31 = vmul.f32 %v1833_v42, %v1761_v22  ;;  %v549_v53 = vcombine.low %v547_v46, %v547_v46 }
  0xb3   : > { %v1573_v58 = vpop.permute.xlu1 %1572 }
  0xb4   : > { %v1575_v59 = vunpack.i.h.bf16 %v1573_v58  ;;  %v1574_v60 = vunpack.i.l.bf16 %v1573_v58  ;;  %v633_v33 = vcombine.low %v631_v31, %v631_v31  ;;  %551 = vst.msk [vmem:[#allocation2 + $0x40] sm:$0xf0] %vm367_vm3, %v549_v53 }
  0xb6   : > { %899 = vrot.lane.b32.xlu0 %v898_v48, %s1643_s25  ;;  %822 = vrot.lane.b32.xlu1 %v821_v47, %s1645_s27  ;;  %598 = vst.msk [vmem:[#allocation2 + $0x60] sm:$0xf] %vm315_vm0, %v1575_v59  ;;  %606 = vst.msk [vmem:[#allocation2 + $0x68] sm:$0xf] %vm315_vm0, %v1574_v60  ;;  %v741_v47 = vcombine.low %v1727_v9, %v1727_v9  ;;  %v559_v48 = vmul.f32 %v1705_v1, %v1725_v8 }
  0xb8   : > { %v561_v54 = vcombine.low %v559_v48, %v559_v48 }
  0xba   : > { %967 = vrot.lane.b32.xlu0 %v966_v20, %s1640_s22  ;;  %974 = vrot.lane.b32.xlu1 %v973_v56, %s1641_s23  ;;  %563 = vst.msk [vmem:[#allocation2 + $0x48] sm:$0xf0] %vm367_vm3, %v561_v54  ;;  %v554_v20 = vcombine.low %v552_v51, %v552_v51  ;;  %v673_v56 = vmul.f32 %v1833_v42, %v1755_v19 }
  0xbc   : > { %v675_v58 = vcombine.low %v673_v56, %v673_v56 }
  0xbe   : > { %801 = vrot.lane.b32.xlu0 %v800_v61, %s1644_s26  ;;  %920 = vrot.lane.b32.xlu1 %v919_v62, %s1642_s24  ;;  %v680_v61 = vmul.f32 %v1833_v42, %v1744_v15 }
  0xc0   : > { %v682_v0 = vcombine.low %v680_v61, %v680_v61 }
  0xc2   : > { %415 = vrot.lane.b32.xlu0 %v414_v2, %s1641_s23  ;;  %843 = vrot.lane.b32.xlu1 %v842_v3, %s1644_s26  ;;  %v588_v3 = vmul.f32 %v1705_v1, %v1744_v15  ;;  %v659_v15 = vmul.f32 %v1833_v42, %v1727_v9 }
  0xc4   : > { %v661_v21 = vcombine.low %v659_v15, %v659_v15 }
  0xc6   : > { %808 = vrot.lane.b32.xlu0 %v807_v11, %s1645_s27  ;;  %1577 = vrot.lane.b32.xlu1 %v1731_v10, %s1637_s15  ;;  %v647_v10 = vcombine.low %v645_v23, %v645_v23 }
  0xca   : > { %934 = vrot.lane.b32.xlu0 %v933_v17, %s1642_s24  ;;  %655 = vrot.lane.b32.xlu1 %v654_v43, %s1646_s28  ;;  %v371_v17 = vcombine.low %v1844_v44, %v1844_v44  ;;  %v571_v44 = vmul.f32 %v1705_v1, %v1727_v9 }
  0xcc   : > { %v573_v31 = vcombine.low %v571_v44, %v571_v44 }
  0xce   : > { %941 = vrot.lane.b32.xlu0 %v940_v24, %s1643_s25  ;;  %791 = vrot.lane.b32.xlu1 %v1933_v36, %s1638_s16  ;;  %v282_v36 = vld [vmem:[%s1715_s8] sm:$0x3]  ;;  %575 = vst.msk [vmem:[#allocation2 + $0x50] sm:$0xf0] %vm367_vm3, %v573_v31 }
  0xcf   : > { %v2047_v38 = vunpack.c.l.bf16 %v282_v36 }
  0xd1   : > { %v459_v11 = vmul.f32 %v1798_v32, %v2047_v38 }
  0xd2   : > { %648 = vrot.lane.b32.xlu0 %v647_v10, %s1647_s29  ;;  %850 = vrot.lane.b32.xlu1 %v849_v26, %s1645_s27 }
  0xd3   : > { %v461_v43 = vcombine.low %v459_v11, %v459_v11 }
  0xd6   : > { %927 = vrot.lane.b32.xlu0 %v926_v30, %s1643_s25  ;;  %711 = vrot.lane.b32.xlu1 %v412_v63, %s1640_s22  ;;  %v668_v30 = vcombine.low %v666_v25, %v666_v25 }
  0xda   : > { %634 = vrot.lane.b32.xlu0 %v633_v33, %s1647_s29  ;;  %781 = vrot.lane.b32.xlu1 %v1909_v27, %s1638_s16  ;;  %v638_v27 = vmul.f32 %v1833_v42, %v1720_v5  ;;  %v564_v5 = vmul.f32 %v1705_v1, %v1722_v6  ;;  %v583_v6 = vmul.f32 %v1705_v1, %v1755_v19 }
  0xdb   : > { %v361_v42 = vmul.f32 %v1809_v35, %v2047_v38  ;;  %v576_v35 = vmul.f32 %v1705_v1, %v1742_v14  ;;  %v1065_v1 = vld [vmem:[%s2257_s2] sm:$0xff] }
  0xdc   : > { %v640_v55 = vcombine.low %v638_v27, %v638_v27  ;;  %v566_v59 = vcombine.low %v564_v5, %v564_v5  ;;  %v585_v2 = vcombine.low %v583_v6, %v583_v6 }
  0xdd   : > { %v363_v34 = vcombine.low %v361_v42, %v361_v42  ;;  %v578_v27 = vcombine.low %v576_v35, %v576_v35 }
  0xde   : > { %777 = vrot.lane.b32.xlu0 %v1860_v52, %s1639_s17  ;;  %515 = vrot.lane.b32.xlu1 %v2047_v38, %s1632_s10  ;;  %v751_v52 = vcombine.low %v1755_v19, %v1755_v19  ;;  %587 = vst.msk [vmem:[#allocation2 + $0x58] sm:$0xf0] %vm367_vm3, %v585_v2  ;;  %v468_v19 = vcombine.low %v1817_v37, %v1817_v37  ;;  %s1429_s10 = sshll.u32 %s2266_s18, 4 }
  0xe0   : > { %v1581_v8 = vpack.i.bf16 %v741_v47, %v751_v52 }
  0xe2   : > { %829 = vrot.lane.b32.xlu0 %v828_v45, %s1644_s26  ;;  %703 = vrot.lane.b32.xlu1 %v1891_v12, %s1640_s22  ;;  %v833_v12 = vmul.f32 %v1831_v41, %v1742_v14  ;;  %v1650_v14 = vmov 0  }
  0xe3   : > { %1601 = vset.pattern.permute.xlu1 %v1650_v14  ;;  %1602 = vset.pattern.permute.xlu0 %v1650_v14 }
  0xe4   : > { %v835_v57 = vcombine.low %v833_v12, %v833_v12 }
  0xe6   : > { %641 = vrot.lane.b32.xlu0 %v640_v55, %s1646_s28  ;;  %1587 = vrot.lane.b32.xlu1 %v1586_v50, %s1636_s14 }
  0xea   : > { %1582 = vrot.lane.b32.xlu0 %v1581_v8, %s1634_s12  ;;  %555 = vrot.lane.b32.xlu1 %v554_v20, %s1648_s30 }
  0xee   : > { %836 = vrot.lane.b32.xlu0 %v835_v57, %s1645_s27  ;;  %676 = vrot.lane.b32.xlu1 %v675_v58, %s1647_s29 }
  0xf2   : > { %567 = vrot.lane.b32.xlu0 %v566_v59, %s1648_s30  ;;  %419 = vrot.lane.b32.xlu1 %v2047_v38, %s1634_s12 }
  0xf4   : > { %v774_v41 = vpop.permute.xlu1 %773  ;;  %v770_v60 = vpop.permute.xlu0 %769 }
  0xf5   : > { %772 = vst.msk [vmem:[#allocation2 + $0xa8] sm:$0xf] %vm315_vm0, %v770_v60 }
  0xf6   : > { %776 = vst.msk [vmem:[#allocation2 + $0xa8] sm:$0xf] %vm321_vm1, %v774_v41  ;;  %717 = vrot.lane.b32.xlu0 %v1987_v49, %s1641_s23  ;;  %1597 = vrot.lane.b32.xlu1 %v1753_v18, %s1637_s15 }
  0xf8   : > { %v696_v62 = vpop.permute.xlu1 %695  ;;  %v762_v63 = vpop.permute.xlu0 %761 }
  0xf9   : > { %698 = vst.msk [vmem:[#allocation2 + $0x88] sm:$0xf] %vm315_vm0, %v696_v62  ;;  %764 = vst.msk [vmem:[#allocation2 + $0xa0] sm:$0xf] %vm315_vm0, %v762_v63 }
  0xfa   : > { %519 = vrot.lane.b32.xlu0 %v1761_v22, %s1633_s11  ;;  %683 = vrot.lane.b32.xlu1 %v682_v0, %s1646_s28 }
  0xfc   : > { %v766_v49 = vpop.permute.xlu1 %765  ;;  %v700_v18 = vpop.permute.xlu0 %699 }
  0xfd   : > { %768 = vst.msk [vmem:[#allocation2 + $0xa0] sm:$0xf] %vm321_vm1, %v766_v49  ;;  %702 = vst.msk [vmem:[#allocation2 + $0x88] sm:$0xf] %vm321_vm1, %v700_v18 }
  0xfe   : > { %1592 = vrot.lane.b32.xlu0 %v1788_v28, %s1635_s13  ;;  %469 = vrot.lane.b32.xlu1 %v468_v19, %s1638_s16  ;;  %v590_v28 = vcombine.low %v588_v3, %v588_v3 }
 0x100   : > { %v786_v4 = vpop.permute.xlu0 %785  ;;  %v688_v7 = vpop.permute.xlu1 %687 }
 0x101   : > { %788 = vst.msk [vmem:[#allocation2 + $0xb8] sm:$0xf] %vm315_vm0, %v786_v4  ;;  %690 = vst.msk [vmem:[#allocation2 + $0x80] sm:$0xf] %vm315_vm0, %v688_v7 }
 0x102   : > { %707 = vrot.lane.b32.xlu0 %v1963_v16, %s1641_s23  ;;  %312 = vrot.lane.b32.xlu1 %v2047_v38, %s1635_s13  ;;  %v1649_v38 = vmov 0.0   ;;  %s272_s13 = scalar_lea.vmem %s2259_s4, %s1429_s10 }
 0x103   : > { %1152 = vmatprep.mubr.f32.mxu0 %v1649_v38  ;;  %1223 = vmatprep.mubr.f32.mxu1 %v1649_v38 }
 0x104   : > { %v491_v37 = vpop.permute.xlu0 %490  ;;  %v692_v13 = vpop.permute.xlu1 %691  ;;  %v1042_v7 = vld [vmem:[#allocation2 + $0x88] sm:$0xff] }
 0x105   : > { %493 = vst.msk [vmem:[#allocation2 + $0x30] sm:$0xf0] %vm367_vm3, %v491_v37  ;;  %994 = vst.msk [vmem:[#allocation2 + $0x108] sm:$0xf0] %vm367_vm3, %v491_v37 }
 0x106   : > { %694 = vst.msk [vmem:[#allocation2 + $0x80] sm:$0xf] %vm321_vm1, %v692_v13  ;;  %591 = vrot.lane.b32.xlu1 %v590_v28, %s1648_s30  ;;  %462 = vrot.lane.b32.xlu0 %v461_v43, %s1639_s17 }
 0x108   : > { %v477_v32 = vpop.permute.xlu0 %476  ;;  %v498_v16 = vpop.permute.xlu1 %497 }
 0x109   : > { %479 = vst.msk [vmem:[#allocation2 + $0x28] sm:$0xf0] %vm367_vm3, %v477_v32  ;;  %992 = vst.msk [vmem:[#allocation2 + $0x100] sm:$0xf0] %vm367_vm3, %v477_v32 }
 0x10a   : > { %500 = vst.msk [vmem:[#allocation2 + $0x30] sm:$0xf0] %vm375_vm4, %v498_v16  ;;  %995 = vst.msk [vmem:[#allocation2 + $0x108] sm:$0xf0] %vm375_vm4, %v498_v16  ;;  %372 = vrot.lane.b32.xlu1 %v371_v17, %s1641_s23  ;;  %662 = vrot.lane.b32.xlu0 %v661_v21, %s1647_s29 }
 0x10c   : > { %v484_v23 = vpop.permute.xlu0 %483  ;;  %v395_v24 = vpop.permute.xlu1 %394 }
 0x10d   : > { %486 = vst.msk [vmem:[#allocation2 + $0x28] sm:$0xf0] %vm375_vm4, %v484_v23  ;;  %993 = vst.msk [vmem:[#allocation2 + $0x100] sm:$0xf0] %vm375_vm4, %v484_v23  ;;  %v1041_v11 = vld [vmem:[#allocation2 + $0x80] sm:$0xff] }
 0x10e   : > { %397 = vst.msk [vmem:[#allocation2 + $0x10] sm:$0xf0] %vm367_vm3, %v395_v24  ;;  %962 = vst.msk [vmem:[#allocation2 + $0xe8] sm:$0xf0] %vm367_vm3, %v395_v24  ;;  %423 = vrot.lane.b32.xlu0 %v1761_v22, %s1636_s14  ;;  %1068 = vperm.xlu1 %1601, %v1065_v1   ;;  %s1407_s14 = sshll.u32 %s2266_s18, 3 }
 0x10f   : > { %s279_s17 = scalar_lea.vmem %s2260_s5, %s1407_s14 }
 0x110   : > { %v402_v10 = vpop.permute.xlu0 %401  ;;  %v381_v26 = vpop.permute.xlu1 %380 }
 0x111   : > { %v1058_v29 = vld [vmem:[#allocation2 + $0x108] sm:$0xff]  ;;  %404 = vst.msk [vmem:[#allocation2 + $0x10] sm:$0xf0] %vm375_vm4, %v402_v10  ;;  %963 = vst.msk [vmem:[#allocation2 + $0xe8] sm:$0xf0] %vm375_vm4, %v402_v10 }
 0x112   : > { %383 = vst.msk [vmem:[#allocation2 + $0x8] sm:$0xf0] %vm367_vm3, %v381_v26  ;;  %960 = vst.msk [vmem:[#allocation2 + $0xe0] sm:$0xf0] %vm367_vm3, %v381_v26  ;;  %1102 = vmatprep.subr.mxu0 %v1058_v29  ;;  %669 = vrot.lane.b32.xlu0 %v668_v30, %s1646_s28 }
 0x114   : > { %v388_v9 = vpop.permute.xlu0 %387  ;;  %v505_v33 = vpop.permute.xlu1 %504  ;;  %v1057_v36 = vld [vmem:[#allocation2 + $0x100] sm:$0xff] }
 0x115   : > { %390 = vst.msk [vmem:[#allocation2 + $0x8] sm:$0xf0] %vm375_vm4, %v388_v9  ;;  %961 = vst.msk [vmem:[#allocation2 + $0xe0] sm:$0xf0] %vm375_vm4, %v388_v9  ;;  %1103 = vmatpush1.msra.mxu0 %v1057_v36 }
 0x116   : > { %507 = vst.msk [vmem:[#allocation2 + $0x38] sm:$0xf0] %vm367_vm3, %v505_v33  ;;  %996 = vst.msk [vmem:[#allocation2 + $0x110] sm:$0xf0] %vm367_vm3, %v505_v33  ;;  %364 = vrot.lane.b32.xlu0 %v363_v34, %s1640_s22 }
 0x118   : > { %v907_v39 = vpop.permute.xlu0 %906  ;;  %v893_v40 = vpop.permute.xlu1 %892  ;;  %v1054_v45 = vld [vmem:[#allocation2 + $0xe8] sm:$0xff] }
 0x119   : > { %909 = vst.msk [vmem:[#allocation2 + $0xc8] sm:$0xf0] %vm367_vm3, %v907_v39  ;;  %895 = vst.msk [vmem:[#allocation2 + $0xc0] sm:$0xf0] %vm367_vm3, %v893_v40  ;;  %1104 = vmatprep.subr.mxu0 %v1054_v45 }
 0x11a   : > { %318 = vrot.lane.b32.xlu0 %v1761_v22, %s1637_s15 }
 0x11c   : > { %v1000_v46 = vpop.permute.xlu0 %999  ;;  %v512_v47 = vpop.permute.xlu1 %511  ;;  %v1053_v52 = vld [vmem:[#allocation2 + $0xe0] sm:$0xff] }
 0x11d   : > { %1002 = vst.msk [vmem:[#allocation2 + $0x118] sm:$0xf0] %vm367_vm3, %v1000_v46  ;;  %1105 = vmatpush1.msra.mxu0 %v1053_v52 }
 0x11e   : > { %514 = vst.msk [vmem:[#allocation2 + $0x38] sm:$0xf0] %vm375_vm4, %v512_v47  ;;  %997 = vst.msk [vmem:[#allocation2 + $0x110] sm:$0xf0] %vm375_vm4, %v512_v47  ;;  %579 = vrot.lane.b32.xlu0 %v578_v27, %s1648_s30 }
 0x120   : > { %v914_v22 = vpop.permute.xlu0 %913  ;;  %v816_v48 = vpop.permute.xlu1 %815 }
 0x121   : > { %916 = vst.msk [vmem:[#allocation2 + $0xc8] sm:$0xf0] %vm375_vm4, %v914_v22 }
 0x122   : > { %818 = vst.msk [vmem:[#allocation2 + $0xa8] sm:$0xf0] %vm367_vm3, %v816_v48 }
 0x124   : > { %v1007_v50 = vpop.permute.xlu0 %1006  ;;  %v409_v51 = vpop.permute.xlu1 %408 }
 0x125   : > { %1009 = vst.msk [vmem:[#allocation2 + $0x118] sm:$0xf0] %vm375_vm4, %v1007_v50  ;;  %v1059_v56 = vld [vmem:[#allocation2 + $0x110] sm:$0xff] }
 0x126   : > { %411 = vst.msk [vmem:[#allocation2 + $0x18] sm:$0xf0] %vm367_vm3, %v409_v51  ;;  %964 = vst.msk [vmem:[#allocation2 + $0xf0] sm:$0xf0] %vm367_vm3, %v409_v51 }
 0x128   : > { %v900_v53 = vpop.permute.xlu0 %899  ;;  %v823_v54 = vpop.permute.xlu1 %822  ;;  %v1050_v55 = vld [vmem:[#allocation2 + $0xc8] sm:$0xff] }
 0x129   : > { %902 = vst.msk [vmem:[#allocation2 + $0xc0] sm:$0xf0] %vm375_vm4, %v900_v53  ;;  %825 = vst.msk [vmem:[#allocation2 + $0xa8] sm:$0xf0] %vm375_vm4, %v823_v54  ;;  %1106 = vmatprep.subr.mxu0 %v1050_v55 }
 0x12c   : > { %v968_v8 = vpop.permute.xlu0 %967  ;;  %v975_v20 = vpop.permute.xlu1 %974  ;;  %v1060_v12 = vld [vmem:[#allocation2 + $0x118] sm:$0xff] }
 0x12d   : > { %970 = vst.msk [vmem:[#allocation2 + $0xf8] sm:$0xf0] %vm367_vm3, %v968_v8  ;;  %1173 = vmatprep.subr.mxu1 %v1060_v12  ;;  %v1030_v12 = vld [vmem:[#allocation2 + $0x28] sm:$0xff] }
 0x12e   : > { %977 = vst.msk [vmem:[#allocation2 + $0xf8] sm:$0xf0] %vm375_vm4, %v975_v20  ;;  %1174 = vmatpush1.msra.mxu1 %v1059_v56 }
 0x130   : > { %v802_v5 = vpop.permute.xlu0 %801  ;;  %v921_v57 = vpop.permute.xlu1 %920  ;;  %v1049_v58 = vld [vmem:[#allocation2 + $0xc0] sm:$0xff]  ;;  %v1046_v59 = vld [vmem:[#allocation2 + $0xa8] sm:$0xff] }
 0x131   : > { %804 = vst.msk [vmem:[#allocation2 + $0xa0] sm:$0xf0] %vm367_vm3, %v802_v5  ;;  %923 = vst.msk [vmem:[#allocation2 + $0xd0] sm:$0xf0] %vm367_vm3, %v921_v57  ;;  %1107 = vmatpush1.msra.mxu0 %v1049_v58 }
 0x132   : > { %1108 = vmatprep.subr.mxu0 %v1046_v59 }
 0x134   : > { %v416_v41 = vpop.permute.xlu0 %415  ;;  %v844_v60 = vpop.permute.xlu1 %843 }
 0x135   : > { %418 = vst.msk [vmem:[#allocation2 + $0x18] sm:$0xf0] %vm375_vm4, %v416_v41  ;;  %965 = vst.msk [vmem:[#allocation2 + $0xf0] sm:$0xf0] %vm375_vm4, %v416_v41  ;;  %v1056_v61 = vld [vmem:[#allocation2 + $0xf8] sm:$0xff] }
 0x136   : > { %846 = vst.msk [vmem:[#allocation2 + $0xb8] sm:$0xf0] %vm367_vm3, %v844_v60  ;;  %1175 = vmatprep.subr.mxu1 %v1056_v61 }
 0x138   : > { %v809_v6 = vpop.permute.xlu0 %808  ;;  %v1578_v62 = vpop.permute.xlu1 %1577 }
 0x139   : > { %811 = vst.msk [vmem:[#allocation2 + $0xa0] sm:$0xf0] %vm375_vm4, %v809_v6  ;;  %v1580_v63 = vunpack.i.h.bf16 %v1578_v62  ;;  %v1579_v0 = vunpack.i.l.bf16 %v1578_v62 }
 0x13b   : > { %602 = vst.msk [vmem:[#allocation2 + $0x60] sm:$0xf] %vm321_vm1, %v1580_v63  ;;  %610 = vst.msk [vmem:[#allocation2 + $0x68] sm:$0xf] %vm321_vm1, %v1579_v0  ;;  %v1026_v63 = vld [vmem:[#allocation2 + $0x8] sm:$0xff] }
 0x13c   : > { %v935_v2 = vpop.permute.xlu0 %934  ;;  %v656_v49 = vpop.permute.xlu1 %655  ;;  %v1055_v18 = vld [vmem:[#allocation2 + $0xf0] sm:$0xff] }
 0x13d   : > { %937 = vst.msk [vmem:[#allocation2 + $0xd8] sm:$0xf0] %vm367_vm3, %v935_v2  ;;  %1176 = vmatpush1.msra.mxu1 %v1055_v18 }
 0x140   : > { %v942_v19 = vpop.permute.xlu0 %941  ;;  %v792_v3 = vpop.permute.xlu1 %791  ;;  %v1045_v4 = vld [vmem:[#allocation2 + $0xa0] sm:$0xff] }
 0x141   : > { %944 = vst.msk [vmem:[#allocation2 + $0xd8] sm:$0xf0] %vm375_vm4, %v942_v19  ;;  %1109 = vmatpush1.msra.mxu0 %v1045_v4  ;;  %v1024_v19 = vld [vmem:[%s2256_s1] sm:$0xff] }
 0x142   : > { %794 = vst.msk [vmem:[#allocation2 + $0xb8] sm:$0xf] %vm321_vm1, %v792_v3  ;;  %1110 = vmatprep.subr.mxu0 %v1042_v7  ;;  %v1032_v7 = vld [vmem:[#allocation2 + $0x38] sm:$0xff] }
 0x143   : > { %1111 = vmatpush1.msra.mxu0 %v1041_v11  ;;  %v1031_v11 = vld [vmem:[#allocation2 + $0x30] sm:$0xff] }
 0x144   : > { %v649_v28 = vpop.permute.xlu0 %648  ;;  %v851_v37 = vpop.permute.xlu1 %850 }
 0x145   : > { %651 = vst.msk [vmem:[#allocation2 + $0x68] sm:$0xf0] %vm367_vm3, %v649_v28  ;;  %v1028_v28 = vld [vmem:[#allocation2 + $0x18] sm:$0xff] }
 0x146   : > { %853 = vst.msk [vmem:[#allocation2 + $0xb8] sm:$0xf0] %vm375_vm4, %v851_v37  ;;  %658 = vst.msk [vmem:[#allocation2 + $0x68] sm:$0xf0] %vm375_vm4, %v656_v49  ;;  %v1027_v37 = vld [vmem:[#allocation2 + $0x10] sm:$0xff] }
 0x148   : > { %v928_v13 = vpop.permute.xlu0 %927  ;;  %v712_v43 = vpop.permute.xlu1 %711  ;;  %v1052_v15 = vld [vmem:[#allocation2 + $0xd8] sm:$0xff] }
 0x149   : > { %930 = vst.msk [vmem:[#allocation2 + $0xd0] sm:$0xf0] %vm375_vm4, %v928_v13  ;;  %1177 = vmatprep.subr.mxu1 %v1052_v15 }
 0x14a   : > { %714 = vst.msk [vmem:[#allocation2 + $0x98] sm:$0xf] %vm315_vm0, %v712_v43 }
 0x14c   : > { %v635_v32 = vpop.permute.xlu0 %634  ;;  %v782_v16 = vpop.permute.xlu1 %781 }
 0x14d   : > { %637 = vst.msk [vmem:[#allocation2 + $0x60] sm:$0xf0] %vm367_vm3, %v635_v32  ;;  %v1038_v17 = vld [vmem:[#allocation2 + $0x68] sm:$0xff]  ;;  %v1048_v25 = vld [vmem:[#allocation2 + $0xb8] sm:$0xff] }
 0x14e   : > { %1112 = vmatprep.subr.mxu0 %v1038_v17 }
 0x150   : > { %v778_v21 = vpop.permute.xlu0 %777  ;;  %v516_v23 = vpop.permute.xlu1 %515  ;;  %v1051_v24 = vld [vmem:[#allocation2 + $0xd0] sm:$0xff] }
 0x151   : > { %780 = vst.msk [vmem:[#allocation2 + $0xb0] sm:$0xf] %vm315_vm0, %v778_v21  ;;  %518 = vst.msk [vmem:[#allocation2 + $0x40] sm:$0xf] %vm315_vm0, %v516_v23  ;;  %1178 = vmatpush1.msra.mxu1 %v1051_v24 }
 0x152   : > { %784 = vst.msk [vmem:[#allocation2 + $0xb0] sm:$0xf] %vm321_vm1, %v782_v16  ;;  %1179 = vmatprep.subr.mxu1 %v1048_v25 }
 0x154   : > { %v830_v44 = vpop.permute.xlu0 %829  ;;  %v704_v10 = vpop.permute.xlu1 %703 }
 0x155   : > { %832 = vst.msk [vmem:[#allocation2 + $0xb0] sm:$0xf0] %vm367_vm3, %v830_v44 }
 0x156   : > { %706 = vst.msk [vmem:[#allocation2 + $0x90] sm:$0xf] %vm315_vm0, %v704_v10 }
 0x158   : > { %v642_v26 = vpop.permute.xlu0 %641  ;;  %v1588_v29 = vpop.permute.xlu1 %1587 }
 0x159   : > { %644 = vst.msk [vmem:[#allocation2 + $0x60] sm:$0xf0] %vm375_vm4, %v642_v26  ;;  %v1590_v30 = vunpack.i.h.bf16 %v1588_v29  ;;  %v1589_v42 = vunpack.i.l.bf16 %v1588_v29 }
 0x15c   : > { %v1583_v31 = vpop.permute.xlu0 %1582  ;;  %v556_v9 = vpop.permute.xlu1 %555 }
 0x15d   : > { %v1585_v33 = vunpack.i.h.bf16 %v1583_v31  ;;  %v1584_v36 = vunpack.i.l.bf16 %v1583_v31  ;;  %558 = vst.msk [vmem:[#allocation2 + $0x40] sm:$0xf0] %vm375_vm4, %v556_v9 }
 0x15f   : > { %745 = vst.msk [vmem:[#allocation2 + $0x90] sm:$0xf0] %vm367_vm3, %v1585_v33  ;;  %755 = vst.msk [vmem:[#allocation2 + $0x98] sm:$0xf0] %vm367_vm3, %v1584_v36 }
 0x160   : > { %750 = vst.msk [vmem:[#allocation2 + $0x90] sm:$0xf0] %vm375_vm4, %v1590_v30  ;;  %760 = vst.msk [vmem:[#allocation2 + $0x98] sm:$0xf0] %vm375_vm4, %v1589_v42  ;;  %v837_v34 = vpop.permute.xlu0 %836  ;;  %v677_v35 = vpop.permute.xlu1 %676  ;;  %v1037_v38 = vld [vmem:[#allocation2 + $0x60] sm:$0xff] }
 0x161   : > { %839 = vst.msk [vmem:[#allocation2 + $0xb0] sm:$0xf0] %vm375_vm4, %v837_v34  ;;  %1113 = vmatpush1.msra.mxu0 %v1037_v38 }
 0x162   : > { %679 = vst.msk [vmem:[#allocation2 + $0x78] sm:$0xf0] %vm367_vm3, %v677_v35 }
 0x164   : > { %v568_v39 = vpop.permute.xlu0 %567  ;;  %v420_v40 = vpop.permute.xlu1 %419 }
 0x165   : > { %570 = vst.msk [vmem:[#allocation2 + $0x48] sm:$0xf0] %vm375_vm4, %v568_v39 }
 0x166   : > { %422 = vst.msk [vmem:[#allocation2 + $0x20] sm:$0xf] %vm315_vm0, %v420_v40 }
 0x168   : > { %v718_v45 = vpop.permute.xlu0 %717  ;;  %v1598_v27 = vpop.permute.xlu1 %1597  ;;  %v1047_v46 = vld [vmem:[#allocation2 + $0xb0] sm:$0xff] }
 0x169   : > { %720 = vst.msk [vmem:[#allocation2 + $0x98] sm:$0xf] %vm321_vm1, %v718_v45  ;;  %1180 = vmatpush1.msra.mxu1 %v1047_v46  ;;  %v1600_v14 = vunpack.i.h.bf16 %v1598_v27  ;;  %v1599_v22 = vunpack.i.l.bf16 %v1598_v27 }
 0x16c   : > { %v520_v47 = vpop.permute.xlu0 %519  ;;  %v684_v52 = vpop.permute.xlu1 %683  ;;  %v1034_v1 = vld [vmem:[#allocation2 + $0x48] sm:$0xff] }
 0x16d   : > { %522 = vst.msk [vmem:[#allocation2 + $0x40] sm:$0xf] %vm321_vm1, %v520_v47  ;;  %1114 = vmatprep.subr.mxu0 %v1034_v1 }
 0x16e   : > { %686 = vst.msk [vmem:[#allocation2 + $0x78] sm:$0xf0] %vm375_vm4, %v684_v52 }
 0x170   : > { %v1593_v48 = vpop.permute.xlu0 %1592  ;;  %v470_v50 = vpop.permute.xlu1 %469  ;;  %v1044_v51 = vld [vmem:[#allocation2 + $0x98] sm:$0xff] }
 0x171   : > { %v1595_v53 = vunpack.i.h.bf16 %v1593_v48  ;;  %v1594_v54 = vunpack.i.l.bf16 %v1593_v48  ;;  %1181 = vmatprep.subr.mxu1 %v1044_v51 }
 0x173   : > { %614 = vst.msk [vmem:[#allocation2 + $0x70] sm:$0xf] %vm315_vm0, %v1595_v53  ;;  %622 = vst.msk [vmem:[#allocation2 + $0x78] sm:$0xf] %vm315_vm0, %v1594_v54 }
 0x174   : > { %618 = vst.msk [vmem:[#allocation2 + $0x70] sm:$0xf] %vm321_vm1, %v1600_v14  ;;  %627 = vst.msk [vmem:[#allocation2 + $0x78] sm:$0xf] %vm321_vm1, %v1599_v22  ;;  %v708_v55 = vpop.permute.xlu0 %707  ;;  %v313_v8 = vpop.permute.xlu1 %312  ;;  %v1033_v20 = vld [vmem:[#allocation2 + $0x40] sm:$0xff] }
 0x175   : > { %710 = vst.msk [vmem:[#allocation2 + $0x90] sm:$0xf] %vm321_vm1, %v708_v55  ;;  %1115 = vmatpush1.msra.mxu0 %v1033_v20 }
 0x176   : > { %316 = vst.msk [vmem:[#allocation2] sm:$0xf] %vm315_vm0, %v313_v8  ;;  %1116 = vmatprep.subr.mxu0 %v1030_v12 }
 0x178   : > { %v592_v56 = vpop.permute.xlu1 %591  ;;  %v463_v5 = vpop.permute.xlu0 %462 }
 0x179   : > { %594 = vst.msk [vmem:[#allocation2 + $0x58] sm:$0xf0] %vm375_vm4, %v592_v56 }
 0x17a   : > { %465 = vst.msk [vmem:[#allocation2 + $0x20] sm:$0xf0] %vm367_vm3, %v463_v5 }
 0x17b   : > { %472 = vst.msk [vmem:[#allocation2 + $0x20] sm:$0xf0] %vm375_vm4, %v470_v50  ;;  %v1040_v59 = vld [vmem:[#allocation2 + $0x78] sm:$0xff] }
 0x17c   : > { %v663_v57 = vpop.permute.xlu0 %662  ;;  %v1043_v58 = vld [vmem:[#allocation2 + $0x90] sm:$0xff]  ;;  %v373_v62 = vpop.permute.xlu1 %372 }
 0x17d   : > { %665 = vst.msk [vmem:[#allocation2 + $0x70] sm:$0xf0] %vm367_vm3, %v663_v57  ;;  %1182 = vmatpush1.msra.mxu1 %v1043_v58 }
 0x17e   : > { %1183 = vmatprep.subr.mxu1 %v1040_v59 }
 0x180   : > { %v424_v41 = vpop.permute.xlu0 %423  ;;  %v1036_v49 = vld [vmem:[#allocation2 + $0x58] sm:$0xff] }
 0x181   : > { %426 = vst.msk [vmem:[#allocation2 + $0x20] sm:$0xf] %vm321_vm1, %v424_v41 }
 0x184   : > { %v670_v60 = vpop.permute.xlu0 %669 }
 0x185   : > { %672 = vst.msk [vmem:[#allocation2 + $0x70] sm:$0xf0] %vm375_vm4, %v670_v60 }
 0x188   : > { %v365_v61 = vpop.permute.xlu0 %364  ;;  %v1029_v6 = vld [vmem:[#allocation2 + $0x20] sm:$0xff] }
 0x189   : > { %368 = vst.msk [vmem:[#allocation2] sm:$0xf0] %vm367_vm3, %v365_v61  ;;  %1117 = vmatpush1.msra.mxu0 %v1029_v6  ;;  %v1069_v13 = vpop.permute.xlu1 %1068 }
 0x18a   : > { %376 = vst.msk [vmem:[#allocation2] sm:$0xf0] %vm375_vm4, %v373_v62  ;;  %1118 = vmatprep.subr.mxu0 %v1026_v63 }
 0x18c   : > { %v319_v0 = vpop.permute.xlu0 %318  ;;  %v1039_v2 = vld [vmem:[#allocation2 + $0x70] sm:$0xff] }
 0x18d   : > { %322 = vst.msk [vmem:[#allocation2] sm:$0xf] %vm321_vm1, %v319_v0  ;;  %1184 = vmatpush1.msra.mxu1 %v1039_v2 }
 0x18e   : > { %1185 = vmatprep.subr.mxu1 %v1036_v49 }
 0x190   : > { %v580_v18 = vpop.permute.xlu0 %579 }
 0x191   : > { %582 = vst.msk [vmem:[#allocation2 + $0x50] sm:$0xf0] %vm375_vm4, %v580_v18 }
 0x194   : > { %v1025_v3 = vld [vmem:[#allocation2] sm:$0xff] }
 0x195   : > { %1119 = vmatpush1.msra.mxu0 %v1025_v3 }
 0x196   : > { %1421 = vmatmul.mubr.msk.f32.vlgmr.msra.gmra.mxu0 %vm1071_vm5, %v1024_v19 }
 0x198   : > { %v1035_v4 = vld [vmem:[#allocation2 + $0x50] sm:$0xff] }
 0x199   : > { %1186 = vmatpush1.msra.mxu1 %v1035_v4 }
 0x19a   : > { %1187 = vmatprep.subr.mxu1 %v1032_v7 }
 0x19b   : > { %1188 = vmatpush1.msra.mxu1 %v1031_v11 }
 0x19c   : > { %1189 = vmatprep.subr.mxu1 %v1028_v28 }
 0x19d   : > { %1190 = vmatpush1.msra.mxu1 %v1027_v37 }
 0x19e   : > { %1424 = vmatmul.mubr.msk.f32.vlgmr.msra.gmra.mxu1 %vm1071_vm5, %v1024_v19 }
 0x256   : > { %v1154_v43 = vpop.f32.mrf.mxu0 }
 0x257   : > { %v1155_v15 = vadd.f32 %v1154_v43, %v1069_v13 }
 0x258   : > { %v1156_v32 = vpop.f32.mrf.mxu0 }
 0x259   : > { %v1157_v16 = vadd.f32 %v1156_v32, %v1069_v13  ;;  %v1255_v21 = vmul.f32 %v1155_v15, %v1155_v15 }
 0x25b   : > { %v1430_v17 = vpack.c.bf16 %v1157_v16, %v1155_v15  ;;  %v1256_v23 = vmul.f32 %v1157_v16, %v1157_v16  ;;  %v1248_v25 = vadd.f32 %v1157_v16, %v1155_v15 }
 0x25d   : > { %1246 = vst [vmem:[%s272_s13] sm:$0xff] %v1430_v17  ;;  %v1259_v26 = vadd.f32 %v1256_v23, %v1255_v21 }
 0x25e   : > { %v1225_v24 = vpop.f32.mrf.mxu1 }
 0x25f   : > { %v1226_v44 = vadd.f32 %v1225_v24, %v1069_v13 }
 0x260   : > { %v1227_v10 = vpop.f32.mrf.mxu1 }
 0x261   : > { %v1249_v29 = vadd.f32 %v1248_v25, %v1226_v44  ;;  %v1257_v30 = vmul.f32 %v1226_v44, %v1226_v44  ;;  %v1228_v42 = vadd.f32 %v1227_v10, %v1069_v13 }
 0x263   : > { %v1431_v31 = vpack.c.bf16 %v1228_v42, %v1226_v44  ;;  %v1258_v9 = vmul.f32 %v1228_v42, %v1228_v42  ;;  %v1250_v33 = vadd.f32 %v1249_v29, %v1228_v42  ;;  %v1260_v36 = vadd.f32 %v1259_v26, %v1257_v30 }
 0x265   : > { %1247 = vst [vmem:[%s272_s13 + $0x8] sm:$0xff] %v1431_v31  ;;  %1251 = vadd.xlane.f32.xlu0 %v1250_v33  ;;  %v1261_v34 = vadd.f32 %v1260_v36, %v1258_v9 }
 0x267   : > { %1262 = vadd.xlane.f32.xlu1 %v1261_v34 }
 0x2ee   : > { %v1252_v35 = vpop.xlane.xlu0 %1251 }
 0x2ef   : > { %1254 = vst.msk [vmem:[%s279_s17] sm:$0xff] %vm1253_vm6, %v1252_v35 }
 0x2f0   : > { %v1263_v38 = vpop.xlane.xlu1 %1262 }
 0x2f1   : > { %1265 = vst.msk [vmem:[%s279_s17] sm:$0xff] %vm1264_vm7, %v1263_v38 }
 0x2f2 PF: > { %s16_s20 = sadd.s32 1, %s1625_s20   ;;  %s2261_s18 = smov %s1621_s19 }
 0x2f3   : > { %p13_p5 = scmp.ge.s32.totalorder %s16_s20, 4   ;;  %s2262_s19 = smov %s2264_s21 }
 0x2f5   :  { %15 = sbr.rel (!%p13_p5) target bundleno = 2 (0x2), region = 87 }

</bundles_post_ra>
